<compile_context>
chip_gen: v7x
topology: tpu7x:2x2x1
jax: 0.10.0
libtpu: 0.0.40
codegen_flags: <defaults>
</compile_context>

<pallas_src>
import functools

import jax
import jax.numpy as jnp
from jax.experimental import pallas as pl
from jax.experimental.pallas import tpu as pltpu


def _mha_kernel(xv_ref, xk_ref, xq_ref,
                wvt_ref, wkt_ref, wqt_ref, wot_ref, bo_ref,
                out_ref, ctx_ref,
                *, batch_block, seq_len, num_heads, head_dim):
    """One grid step: `batch_block` batch elements, rows = batch_block*seq_len.

    xv/xk/xq refs: (rows, E) bf16; w*t refs: (E, E) bf16 pre-transposed
    (PyTorch Linear: y = x @ W.T), wqt additionally pre-scaled by 1/sqrt(E);
    bo: (1, E) f32; out: (rows, E) model dtype;
    ctx_ref: (rows, E) bf16 VMEM scratch holding the merged per-head contexts.
    """
    B, S, H, D = batch_block, seq_len, num_heads, head_dim
    rows = B * S

    # QKV projections: one big (rows, E) @ (E, E) bf16 matmul each, f32 accum.
    v = jnp.dot(xv_ref[...], wvt_ref[...], preferred_element_type=jnp.float32)
    k = jnp.dot(xk_ref[...], wkt_ref[...], preferred_element_type=jnp.float32)
    q = jnp.dot(xq_ref[...], wqt_ref[...], preferred_element_type=jnp.float32)

    # TODO(synk): optional `mask` argument (masked_fill(-1e20)) not implemented;
    # this kernel reproduces the mask=None path of the PyTorch forward.

    # Per-head attention, batched over the batch_block dim with 3-D einsums
    # (one batched dot_general per head instead of a B*H unroll of tiny dots).
    for h in range(H):                               # H is small & static
        c = h * D
        qh = q[:, c:c + D].reshape(B, S, D).astype(jnp.bfloat16)
        kh = k[:, c:c + D].reshape(B, S, D).astype(jnp.bfloat16)
        vh = v[:, c:c + D].reshape(B, S, D).astype(jnp.bfloat16)
        # logits = qh @ kh^T per batch element; q already carries 1/sqrt(E).
        logits = jnp.einsum('bqd,bkd->bqk', qh, kh,
                            preferred_element_type=jnp.float32)      # (B,S,S) f32
        m = jnp.max(logits, axis=-1, keepdims=True)
        p = jnp.exp(logits - m)
        denom = jnp.sum(p, axis=-1, keepdims=True)
        attn = (p * pl.reciprocal(denom, approx=True)).astype(jnp.bfloat16)
        ctx = jnp.einsum('bqk,bkd->bqd', attn, vh,
                         preferred_element_type=jnp.float32)         # (B,S,D) f32
        ctx_ref[:, c:c + D] = ctx.reshape(rows, D).astype(jnp.bfloat16)

    # Consolidated head-merge + output projection: one (rows, E) @ (E, E), K=E.
    proj = jnp.dot(ctx_ref[...], wot_ref[...], preferred_element_type=jnp.float32)
    # Single broadcasted bias add + single lane-dense full-block store.
    out_ref[...] = (proj + bo_ref[...].astype(jnp.float32)).astype(out_ref.dtype)


def _pick_batch_block(n, s, target_rows=256):
    """Largest divisor of n with batch_block*s <= target_rows, while keeping at
    least two grid steps (so both v7x TensorCores get work)."""
    cap_rows = max(1, target_rows // max(s, 1))
    cap_cores = max(1, n // 2)
    bb = max(1, min(n, cap_rows, cap_cores))
    while n % bb:
        bb -= 1
    return bb


def attention_forward(values, keys, query, params, num_heads, *, batch_block=None):
    N, S, E = query.shape
    assert E % num_heads == 0
    head_dim = E // num_heads
    if batch_block is None:
        batch_block = _pick_batch_block(N, S)
    assert N % batch_block == 0
    rows = batch_block * S
    out_dtype = query.dtype

    # Wrapper-side layout plumbing (free in XLA, not compute hoisting):
    #  * fold batch into the matmul M dim: (N, S, E) -> (N*S, E)
    #  * pre-transpose the Linear weights (kernel then does x @ Wt directly)
    #  * fold the 1/sqrt(embed_dim) softmax scale into W_q
    #  * cast MXU operands to bf16 (softmax statistics stay f32 in-kernel)
    scale = 1.0 / (float(E) ** 0.5)
    wvt = params['wv'].T.astype(jnp.bfloat16)
    wkt = params['wk'].T.astype(jnp.bfloat16)
    wqt = (params['wq'].T * scale).astype(jnp.bfloat16)
    wot = params['wo'].T.astype(jnp.bfloat16)
    bo = params['bo'].reshape(1, E).astype(jnp.float32)

    # TODO(synk): when values/keys/query alias (self-attention), a single shared
    # input ref would cut input DMA bytes ~3x; not specialized here.
    xv = values.reshape(N * S, E).astype(jnp.bfloat16)
    xk = keys.reshape(N * S, E).astype(jnp.bfloat16)
    xq = query.reshape(N * S, E).astype(jnp.bfloat16)

    kernel = functools.partial(_mha_kernel, batch_block=batch_block, seq_len=S,
                               num_heads=num_heads, head_dim=head_dim)

    # Explicit VMEM budget: double-buffered activations/output + weights + scratch.
    act_bytes = rows * E * 2                       # bf16 activations
    out_bytes = rows * E * jnp.dtype(out_dtype).itemsize
    w_bytes = 4 * E * E * 2 + E * 4                # bf16 weights + f32 bias
    scratch_bytes = rows * E * 2                   # bf16 ctx scratch
    budget = 2 * (3 * act_bytes + out_bytes) + 2 * w_bytes + scratch_bytes
    vmem_limit = int(min(max(budget + (4 << 20), 32 << 20), 100 << 20))

    def _build(single_buffer_weights):
        w_kwargs = ({'pipeline_mode': pl.Buffered(1)}
                    if single_buffer_weights else {})
        act_spec = pl.BlockSpec((rows, E), lambda n: (n, 0))
        w_spec = pl.BlockSpec((E, E), lambda n: (0, 0), **w_kwargs)
        b_spec = pl.BlockSpec((1, E), lambda n: (0, 0), **w_kwargs)
        return pl.pallas_call(
            kernel,
            out_shape=jax.ShapeDtypeStruct((N * S, E), out_dtype),
            grid=(N // batch_block,),
            in_specs=[act_spec, act_spec, act_spec,
                      w_spec, w_spec, w_spec, w_spec, b_spec],
            out_specs=act_spec,
            scratch_shapes=[pltpu.VMEM((rows, E), jnp.bfloat16)],
            compiler_params=pltpu.CompilerParams(
                dimension_semantics=("parallel",),
                vmem_limit_bytes=vmem_limit),
        )(xv, xk, xq, wvt, wkt, wqt, wot, bo)

    try:
        # Grid-invariant weights: single-buffered to halve resident weight VMEM.
        out = jax.block_until_ready(_build(True))
    except Exception:
        # Fallback for Pallas versions that reject Buffered(1) on inputs.
        out = _build(False)
    return out.reshape(N, S, E)


def attention_reference(values, keys, query, params, num_heads):
    """Pure-JAX reference mirroring the PyTorch forward (mask=None)."""
    N, S, E = query.shape
    D = E // num_heads
    V = (values @ params['wv'].T).reshape(N, S, num_heads, D)
    K = (keys @ params['wk'].T).reshape(N, S, num_heads, D)
    Q = (query @ params['wq'].T).reshape(N, S, num_heads, D)
    energy = jnp.einsum('nqhd,nkhd->nhqk', Q, K)
    attn = jax.nn.softmax(energy / (E ** 0.5), axis=3)
    out = jnp.einsum('nhql,nlhd->nqhd', attn, V).reshape(N, S, E)
    return out @ params['wo'].T + params['bo']


if __name__ == "__main__":
    N, S, E, H = 2, 8, 32, 8

    key = jax.random.PRNGKey(0)
    kv, kk, kq, kvals, kkeys, kqry, kwo, kbo = jax.random.split(key, 8)

    # Deterministic parameter init (shapes from nn.Linear(embed_dim, embed_dim)).
    scale = 1.0 / (E ** 0.5)
    params = {
        'wv': jax.random.uniform(kv, (E, E), jnp.float32, -scale, scale),
        'wk': jax.random.uniform(kk, (E, E), jnp.float32, -scale, scale),
        'wq': jax.random.uniform(kq, (E, E), jnp.float32, -scale, scale),
        'wo': jax.random.uniform(kwo, (E, E), jnp.float32, -scale, scale),
        'bo': jax.random.uniform(kbo, (E,), jnp.float32, -scale, scale),
    }

    values = jax.random.normal(kvals, (N, S, E), jnp.float32)
    keys_x = jax.random.normal(kkeys, (N, S, E), jnp.float32)
    query = jax.random.normal(kqry, (N, S, E), jnp.float32)

    out = attention_forward(values, keys_x, query, params, num_heads=H)
    out = jax.block_until_ready(out)

    ref = attention_reference(values, keys_x, query, params, num_heads=H)
    assert out.shape == (N, S, E)
    err = jnp.max(jnp.abs(out - ref))
    # Tolerance accounts for bf16 MXU operands + approx-reciprocal softmax
    # normalization (reference is pure f32).
    assert jnp.allclose(out, ref, atol=5e-2, rtol=5e-2), f"max abs diff {err}"

    print("KERNEL_OK")
</pallas_src>

<mosaic_0001>
module attributes {stable_mosaic.version = 11 : i64} {
  func.func @_mha_kernel(%arg0: i32, %arg1: memref<8x32xbf16, #tpu.memory_space<vmem>>, %arg2: memref<8x32xbf16, #tpu.memory_space<vmem>>, %arg3: memref<8x32xbf16, #tpu.memory_space<vmem>>, %arg4: memref<32x32xbf16, #tpu.memory_space<vmem>>, %arg5: memref<32x32xbf16, #tpu.memory_space<vmem>>, %arg6: memref<32x32xbf16, #tpu.memory_space<vmem>>, %arg7: memref<32x32xbf16, #tpu.memory_space<vmem>>, %arg8: memref<1x32xf32, #tpu.memory_space<vmem>>, %arg9: memref<8x32xf32, #tpu.memory_space<vmem>>, %arg10: memref<8x32xbf16, #tpu.memory_space<vmem>>) attributes {dimension_semantics = [#tpu.dimension_semantics<parallel>], iteration_bounds = array<i64: 2>, scalar_prefetch = 0 : i64, scratch_operands = 1 : i64, tpu.core_type = #tpu.core_type<tc>, window_params = [{transform_indices = @transform_0, window_bounds = array<i64: 8, 32>}, {transform_indices = @transform_1, window_bounds = array<i64: 8, 32>}, {transform_indices = @transform_2, window_bounds = array<i64: 8, 32>}, {pipeline_mode = #tpu.pipeline_mode<synchronous>, transform_indices = @transform_3, window_bounds = array<i64: 32, 32>}, {pipeline_mode = #tpu.pipeline_mode<synchronous>, transform_indices = @transform_4, window_bounds = array<i64: 32, 32>}, {pipeline_mode = #tpu.pipeline_mode<synchronous>, transform_indices = @transform_5, window_bounds = array<i64: 32, 32>}, {pipeline_mode = #tpu.pipeline_mode<synchronous>, transform_indices = @transform_6, window_bounds = array<i64: 32, 32>}, {pipeline_mode = #tpu.pipeline_mode<synchronous>, transform_indices = @transform_7, window_bounds = array<i64: 1, 32>}, {transform_indices = @transform_8, window_bounds = array<i64: 8, 32>}]} {
    %c0 = arith.constant 0 : index
    %c0_0 = arith.constant 0 : index
    %0 = vector.load %arg1[%c0, %c0_0] : memref<8x32xbf16, #tpu.memory_space<vmem>>, vector<8x32xbf16>
    %c0_1 = arith.constant 0 : index
    %c0_2 = arith.constant 0 : index
    %1 = vector.load %arg4[%c0_1, %c0_2] : memref<32x32xbf16, #tpu.memory_space<vmem>>, vector<32x32xbf16>
    %cst = arith.constant dense<0.000000e+00> : vector<8x32xf32>
    %2 = tpu.matmul %0, %1, %cst {dimension_numbers = #tpu.dot_dimension_numbers<[1], [0], [0], [1], [0, 0, 1, 1], [], []>} : vector<8x32xbf16>, vector<32x32xbf16>, vector<8x32xf32> -> vector<8x32xf32>
    %c0_3 = arith.constant 0 : index
    %c0_4 = arith.constant 0 : index
    %3 = vector.load %arg2[%c0_3, %c0_4] : memref<8x32xbf16, #tpu.memory_space<vmem>>, vector<8x32xbf16>
    %c0_5 = arith.constant 0 : index
    %c0_6 = arith.constant 0 : index
    %4 = vector.load %arg5[%c0_5, %c0_6] : memref<32x32xbf16, #tpu.memory_space<vmem>>, vector<32x32xbf16>
    %cst_7 = arith.constant dense<0.000000e+00> : vector<8x32xf32>
    %5 = tpu.matmul %3, %4, %cst_7 {dimension_numbers = #tpu.dot_dimension_numbers<[1], [0], [0], [1], [0, 0, 1, 1], [], []>} : vector<8x32xbf16>, vector<32x32xbf16>, vector<8x32xf32> -> vector<8x32xf32>
    %c0_8 = arith.constant 0 : index
    %c0_9 = arith.constant 0 : index
    %6 = vector.load %arg3[%c0_8, %c0_9] : memref<8x32xbf16, #tpu.memory_space<vmem>>, vector<8x32xbf16>
    %c0_10 = arith.constant 0 : index
    %c0_11 = arith.constant 0 : index
    %7 = vector.load %arg6[%c0_10, %c0_11] : memref<32x32xbf16, #tpu.memory_space<vmem>>, vector<32x32xbf16>
    %cst_12 = arith.constant dense<0.000000e+00> : vector<8x32xf32>
    %8 = tpu.matmul %6, %7, %cst_12 {dimension_numbers = #tpu.dot_dimension_numbers<[1], [0], [0], [1], [0, 0, 1, 1], [], []>} : vector<8x32xbf16>, vector<32x32xbf16>, vector<8x32xf32> -> vector<8x32xf32>
    %9 = vector.extract_strided_slice %8 {offsets = [0, 0], sizes = [8, 4], strides = [1, 1]} : vector<8x32xf32> to vector<8x4xf32>
    %10 = vector.shape_cast %9 : vector<8x4xf32> to vector<1x8x4xf32>
    %11 = arith.truncf %10 : vector<1x8x4xf32> to vector<1x8x4xbf16>
    %12 = vector.extract_strided_slice %5 {offsets = [0, 0], sizes = [8, 4], strides = [1, 1]} : vector<8x32xf32> to vector<8x4xf32>
    %13 = vector.shape_cast %12 : vector<8x4xf32> to vector<1x8x4xf32>
    %14 = arith.truncf %13 : vector<1x8x4xf32> to vector<1x8x4xbf16>
    %15 = vector.extract_strided_slice %2 {offsets = [0, 0], sizes = [8, 4], strides = [1, 1]} : vector<8x32xf32> to vector<8x4xf32>
    %16 = vector.shape_cast %15 : vector<8x4xf32> to vector<1x8x4xf32>
    %17 = arith.truncf %16 : vector<1x8x4xf32> to vector<1x8x4xbf16>
    "tpu.trace_start"() <{level = 10 : i32, message = "bqd,bkd->bqk"}> : () -> ()
    %cst_13 = arith.constant dense<0.000000e+00> : vector<1x8x8xf32>
    %18 = tpu.matmul %11, %14, %cst_13 {dimension_numbers = #tpu.dot_dimension_numbers<[2], [2], [1], [1], [0, 0, 0, 1, 1, 1], [0], [0]>} : vector<1x8x4xbf16>, vector<1x8x4xbf16>, vector<1x8x8xf32> -> vector<1x8x8xf32>
    "tpu.trace_stop"() : () -> ()
    %cst_14 = arith.constant dense<0xFF800000> : vector<1x8xf32>
    %19 = vector.multi_reduction <maximumf>, %18, %cst_14 [2] : vector<1x8x8xf32> to vector<1x8xf32>
    %20 = vector.shape_cast %19 : vector<1x8xf32> to vector<1x8x1xf32>
    %21 = vector.broadcast %20 : vector<1x8x1xf32> to vector<1x8x8xf32>
    %22 = arith.subf %18, %21 : vector<1x8x8xf32>
    %23 = math.exp %22 : vector<1x8x8xf32>
    %cst_15 = arith.constant dense<0.000000e+00> : vector<1x8xf32>
    %24 = vector.multi_reduction <add>, %23, %cst_15 [2] : vector<1x8x8xf32> to vector<1x8xf32>
    %25 = vector.shape_cast %24 : vector<1x8xf32> to vector<1x8x1xf32>
    %26 = tpu.reciprocal %25 {approx = true} : vector<1x8x1xf32> -> vector<1x8x1xf32>
    %27 = vector.broadcast %26 : vector<1x8x1xf32> to vector<1x8x8xf32>
    %28 = arith.mulf %23, %27 : vector<1x8x8xf32>
    %29 = arith.truncf %28 : vector<1x8x8xf32> to vector<1x8x8xbf16>
    "tpu.trace_start"() <{level = 10 : i32, message = "bqk,bkd->bqd"}> : () -> ()
    %cst_16 = arith.constant dense<0.000000e+00> : vector<1x8x4xf32>
    %30 = tpu.matmul %29, %17, %cst_16 {dimension_numbers = #tpu.dot_dimension_numbers<[2], [1], [1], [2], [0, 0, 0, 1, 1, 2], [0], [0]>} : vector<1x8x8xbf16>, vector<1x8x4xbf16>, vector<1x8x4xf32> -> vector<1x8x4xf32>
    "tpu.trace_stop"() : () -> ()
    %31 = vector.shape_cast %30 : vector<1x8x4xf32> to vector<8x4xf32>
    %32 = arith.truncf %31 : vector<8x4xf32> to vector<8x4xbf16>
    %c0_17 = arith.constant 0 : index
    %c0_18 = arith.constant 0 : index
    %33 = vector.load %arg10[%c0_17, %c0_18] : memref<8x32xbf16, #tpu.memory_space<vmem>>, vector<8x4xbf16>
    tpu.vector_store %arg10[%c0_17, %c0_18], %32 {strides = array<i32>} : memref<8x32xbf16, #tpu.memory_space<vmem>>, vector<8x4xbf16>,
    %34 = vector.extract_strided_slice %8 {offsets = [0, 4], sizes = [8, 4], strides = [1, 1]} : vector<8x32xf32> to vector<8x4xf32>
    %35 = vector.shape_cast %34 : vector<8x4xf32> to vector<1x8x4xf32>
    %36 = arith.truncf %35 : vector<1x8x4xf32> to vector<1x8x4xbf16>
    %37 = vector.extract_strided_slice %5 {offsets = [0, 4], sizes = [8, 4], strides = [1, 1]} : vector<8x32xf32> to vector<8x4xf32>
    %38 = vector.shape_cast %37 : vector<8x4xf32> to vector<1x8x4xf32>
    %39 = arith.truncf %38 : vector<1x8x4xf32> to vector<1x8x4xbf16>
    %40 = vector.extract_strided_slice %2 {offsets = [0, 4], sizes = [8, 4], strides = [1, 1]} : vector<8x32xf32> to vector<8x4xf32>
    %41 = vector.shape_cast %40 : vector<8x4xf32> to vector<1x8x4xf32>
    %42 = arith.truncf %41 : vector<1x8x4xf32> to vector<1x8x4xbf16>
    "tpu.trace_start"() <{level = 10 : i32, message = "bqd,bkd->bqk"}> : () -> ()
    %cst_19 = arith.constant dense<0.000000e+00> : vector<1x8x8xf32>
    %43 = tpu.matmul %36, %39, %cst_19 {dimension_numbers = #tpu.dot_dimension_numbers<[2], [2], [1], [1], [0, 0, 0, 1, 1, 1], [0], [0]>} : vector<1x8x4xbf16>, vector<1x8x4xbf16>, vector<1x8x8xf32> -> vector<1x8x8xf32>
    "tpu.trace_stop"() : () -> ()
    %cst_20 = arith.constant dense<0xFF800000> : vector<1x8xf32>
    %44 = vector.multi_reduction <maximumf>, %43, %cst_20 [2] : vector<1x8x8xf32> to vector<1x8xf32>
    %45 = vector.shape_cast %44 : vector<1x8xf32> to vector<1x8x1xf32>
    %46 = vector.broadcast %45 : vector<1x8x1xf32> to vector<1x8x8xf32>
    %47 = arith.subf %43, %46 : vector<1x8x8xf32>
    %48 = math.exp %47 : vector<1x8x8xf32>
    %cst_21 = arith.constant dense<0.000000e+00> : vector<1x8xf32>
    %49 = vector.multi_reduction <add>, %48, %cst_21 [2] : vector<1x8x8xf32> to vector<1x8xf32>
    %50 = vector.shape_cast %49 : vector<1x8xf32> to vector<1x8x1xf32>
    %51 = tpu.reciprocal %50 {approx = true} : vector<1x8x1xf32> -> vector<1x8x1xf32>
    %52 = vector.broadcast %51 : vector<1x8x1xf32> to vector<1x8x8xf32>
    %53 = arith.mulf %48, %52 : vector<1x8x8xf32>
    %54 = arith.truncf %53 : vector<1x8x8xf32> to vector<1x8x8xbf16>
    "tpu.trace_start"() <{level = 10 : i32, message = "bqk,bkd->bqd"}> : () -> ()
    %cst_22 = arith.constant dense<0.000000e+00> : vector<1x8x4xf32>
    %55 = tpu.matmul %54, %42, %cst_22 {dimension_numbers = #tpu.dot_dimension_numbers<[2], [1], [1], [2], [0, 0, 0, 1, 1, 2], [0], [0]>} : vector<1x8x8xbf16>, vector<1x8x4xbf16>, vector<1x8x4xf32> -> vector<1x8x4xf32>
    "tpu.trace_stop"() : () -> ()
    %56 = vector.shape_cast %55 : vector<1x8x4xf32> to vector<8x4xf32>
    %57 = arith.truncf %56 : vector<8x4xf32> to vector<8x4xbf16>
    %c0_23 = arith.constant 0 : index
    %c4 = arith.constant 4 : index
    %58 = vector.load %arg10[%c0_23, %c4] : memref<8x32xbf16, #tpu.memory_space<vmem>>, vector<8x4xbf16>
    tpu.vector_store %arg10[%c0_23, %c4], %57 {strides = array<i32>} : memref<8x32xbf16, #tpu.memory_space<vmem>>, vector<8x4xbf16>,
    %59 = vector.extract_strided_slice %8 {offsets = [0, 8], sizes = [8, 4], strides = [1, 1]} : vector<8x32xf32> to vector<8x4xf32>
    %60 = vector.shape_cast %59 : vector<8x4xf32> to vector<1x8x4xf32>
    %61 = arith.truncf %60 : vector<1x8x4xf32> to vector<1x8x4xbf16>
    %62 = vector.extract_strided_slice %5 {offsets = [0, 8], sizes = [8, 4], strides = [1, 1]} : vector<8x32xf32> to vector<8x4xf32>
    %63 = vector.shape_cast %62 : vector<8x4xf32> to vector<1x8x4xf32>
    %64 = arith.truncf %63 : vector<1x8x4xf32> to vector<1x8x4xbf16>
    %65 = vector.extract_strided_slice %2 {offsets = [0, 8], sizes = [8, 4], strides = [1, 1]} : vector<8x32xf32> to vector<8x4xf32>
    %66 = vector.shape_cast %65 : vector<8x4xf32> to vector<1x8x4xf32>
    %67 = arith.truncf %66 : vector<1x8x4xf32> to vector<1x8x4xbf16>
    "tpu.trace_start"() <{level = 10 : i32, message = "bqd,bkd->bqk"}> : () -> ()
    %cst_24 = arith.constant dense<0.000000e+00> : vector<1x8x8xf32>
    %68 = tpu.matmul %61, %64, %cst_24 {dimension_numbers = #tpu.dot_dimension_numbers<[2], [2], [1], [1], [0, 0, 0, 1, 1, 1], [0], [0]>} : vector<1x8x4xbf16>, vector<1x8x4xbf16>, vector<1x8x8xf32> -> vector<1x8x8xf32>
    "tpu.trace_stop"() : () -> ()
    %cst_25 = arith.constant dense<0xFF800000> : vector<1x8xf32>
    %69 = vector.multi_reduction <maximumf>, %68, %cst_25 [2] : vector<1x8x8xf32> to vector<1x8xf32>
    %70 = vector.shape_cast %69 : vector<1x8xf32> to vector<1x8x1xf32>
    %71 = vector.broadcast %70 : vector<1x8x1xf32> to vector<1x8x8xf32>
    %72 = arith.subf %68, %71 : vector<1x8x8xf32>
    %73 = math.exp %72 : vector<1x8x8xf32>
    %cst_26 = arith.constant dense<0.000000e+00> : vector<1x8xf32>
    %74 = vector.multi_reduction <add>, %73, %cst_26 [2] : vector<1x8x8xf32> to vector<1x8xf32>
    %75 = vector.shape_cast %74 : vector<1x8xf32> to vector<1x8x1xf32>
    %76 = tpu.reciprocal %75 {approx = true} : vector<1x8x1xf32> -> vector<1x8x1xf32>
    %77 = vector.broadcast %76 : vector<1x8x1xf32> to vector<1x8x8xf32>
    %78 = arith.mulf %73, %77 : vector<1x8x8xf32>
    %79 = arith.truncf %78 : vector<1x8x8xf32> to vector<1x8x8xbf16>
    "tpu.trace_start"() <{level = 10 : i32, message = "bqk,bkd->bqd"}> : () -> ()
    %cst_27 = arith.constant dense<0.000000e+00> : vector<1x8x4xf32>
    %80 = tpu.matmul %79, %67, %cst_27 {dimension_numbers = #tpu.dot_dimension_numbers<[2], [1], [1], [2], [0, 0, 0, 1, 1, 2], [0], [0]>} : vector<1x8x8xbf16>, vector<1x8x4xbf16>, vector<1x8x4xf32> -> vector<1x8x4xf32>
    "tpu.trace_stop"() : () -> ()
    %81 = vector.shape_cast %80 : vector<1x8x4xf32> to vector<8x4xf32>
    %82 = arith.truncf %81 : vector<8x4xf32> to vector<8x4xbf16>
    %c0_28 = arith.constant 0 : index
    %c8 = arith.constant 8 : index
    %83 = vector.load %arg10[%c0_28, %c8] : memref<8x32xbf16, #tpu.memory_space<vmem>>, vector<8x4xbf16>
    tpu.vector_store %arg10[%c0_28, %c8], %82 {strides = array<i32>} : memref<8x32xbf16, #tpu.memory_space<vmem>>, vector<8x4xbf16>,
    %84 = vector.extract_strided_slice %8 {offsets = [0, 12], sizes = [8, 4], strides = [1, 1]} : vector<8x32xf32> to vector<8x4xf32>
    %85 = vector.shape_cast %84 : vector<8x4xf32> to vector<1x8x4xf32>
    %86 = arith.truncf %85 : vector<1x8x4xf32> to vector<1x8x4xbf16>
    %87 = vector.extract_strided_slice %5 {offsets = [0, 12], sizes = [8, 4], strides = [1, 1]} : vector<8x32xf32> to vector<8x4xf32>
    %88 = vector.shape_cast %87 : vector<8x4xf32> to vector<1x8x4xf32>
    %89 = arith.truncf %88 : vector<1x8x4xf32> to vector<1x8x4xbf16>
    %90 = vector.extract_strided_slice %2 {offsets = [0, 12], sizes = [8, 4], strides = [1, 1]} : vector<8x32xf32> to vector<8x4xf32>
    %91 = vector.shape_cast %90 : vector<8x4xf32> to vector<1x8x4xf32>
    %92 = arith.truncf %91 : vector<1x8x4xf32> to vector<1x8x4xbf16>
    "tpu.trace_start"() <{level = 10 : i32, message = "bqd,bkd->bqk"}> : () -> ()
    %cst_29 = arith.constant dense<0.000000e+00> : vector<1x8x8xf32>
    %93 = tpu.matmul %86, %89, %cst_29 {dimension_numbers = #tpu.dot_dimension_numbers<[2], [2], [1], [1], [0, 0, 0, 1, 1, 1], [0], [0]>} : vector<1x8x4xbf16>, vector<1x8x4xbf16>, vector<1x8x8xf32> -> vector<1x8x8xf32>
    "tpu.trace_stop"() : () -> ()
    %cst_30 = arith.constant dense<0xFF800000> : vector<1x8xf32>
    %94 = vector.multi_reduction <maximumf>, %93, %cst_30 [2] : vector<1x8x8xf32> to vector<1x8xf32>
    %95 = vector.shape_cast %94 : vector<1x8xf32> to vector<1x8x1xf32>
    %96 = vector.broadcast %95 : vector<1x8x1xf32> to vector<1x8x8xf32>
    %97 = arith.subf %93, %96 : vector<1x8x8xf32>
    %98 = math.exp %97 : vector<1x8x8xf32>
    %cst_31 = arith.constant dense<0.000000e+00> : vector<1x8xf32>
    %99 = vector.multi_reduction <add>, %98, %cst_31 [2] : vector<1x8x8xf32> to vector<1x8xf32>
    %100 = vector.shape_cast %99 : vector<1x8xf32> to vector<1x8x1xf32>
    %101 = tpu.reciprocal %100 {approx = true} : vector<1x8x1xf32> -> vector<1x8x1xf32>
    %102 = vector.broadcast %101 : vector<1x8x1xf32> to vector<1x8x8xf32>
    %103 = arith.mulf %98, %102 : vector<1x8x8xf32>
    %104 = arith.truncf %103 : vector<1x8x8xf32> to vector<1x8x8xbf16>
    "tpu.trace_start"() <{level = 10 : i32, message = "bqk,bkd->bqd"}> : () -> ()
    %cst_32 = arith.constant dense<0.000000e+00> : vector<1x8x4xf32>
    %105 = tpu.matmul %104, %92, %cst_32 {dimension_numbers = #tpu.dot_dimension_numbers<[2], [1], [1], [2], [0, 0, 0, 1, 1, 2], [0], [0]>} : vector<1x8x8xbf16>, vector<1x8x4xbf16>, vector<1x8x4xf32> -> vector<1x8x4xf32>
    "tpu.trace_stop"() : () -> ()
    %106 = vector.shape_cast %105 : vector<1x8x4xf32> to vector<8x4xf32>
    %107 = arith.truncf %106 : vector<8x4xf32> to vector<8x4xbf16>
    %c0_33 = arith.constant 0 : index
    %c12 = arith.constant 12 : index
    %108 = vector.load %arg10[%c0_33, %c12] : memref<8x32xbf16, #tpu.memory_space<vmem>>, vector<8x4xbf16>
    tpu.vector_store %arg10[%c0_33, %c12], %107 {strides = array<i32>} : memref<8x32xbf16, #tpu.memory_space<vmem>>, vector<8x4xbf16>,
    %109 = vector.extract_strided_slice %8 {offsets = [0, 16], sizes = [8, 4], strides = [1, 1]} : vector<8x32xf32> to vector<8x4xf32>
    %110 = vector.shape_cast %109 : vector<8x4xf32> to vector<1x8x4xf32>
    %111 = arith.truncf %110 : vector<1x8x4xf32> to vector<1x8x4xbf16>
    %112 = vector.extract_strided_slice %5 {offsets = [0, 16], sizes = [8, 4], strides = [1, 1]} : vector<8x32xf32> to vector<8x4xf32>
    %113 = vector.shape_cast %112 : vector<8x4xf32> to vector<1x8x4xf32>
    %114 = arith.truncf %113 : vector<1x8x4xf32> to vector<1x8x4xbf16>
    %115 = vector.extract_strided_slice %2 {offsets = [0, 16], sizes = [8, 4], strides = [1, 1]} : vector<8x32xf32> to vector<8x4xf32>
    %116 = vector.shape_cast %115 : vector<8x4xf32> to vector<1x8x4xf32>
    %117 = arith.truncf %116 : vector<1x8x4xf32> to vector<1x8x4xbf16>
    "tpu.trace_start"() <{level = 10 : i32, message = "bqd,bkd->bqk"}> : () -> ()
    %cst_34 = arith.constant dense<0.000000e+00> : vector<1x8x8xf32>
    %118 = tpu.matmul %111, %114, %cst_34 {dimension_numbers = #tpu.dot_dimension_numbers<[2], [2], [1], [1], [0, 0, 0, 1, 1, 1], [0], [0]>} : vector<1x8x4xbf16>, vector<1x8x4xbf16>, vector<1x8x8xf32> -> vector<1x8x8xf32>
    "tpu.trace_stop"() : () -> ()
    %cst_35 = arith.constant dense<0xFF800000> : vector<1x8xf32>
    %119 = vector.multi_reduction <maximumf>, %118, %cst_35 [2] : vector<1x8x8xf32> to vector<1x8xf32>
    %120 = vector.shape_cast %119 : vector<1x8xf32> to vector<1x8x1xf32>
    %121 = vector.broadcast %120 : vector<1x8x1xf32> to vector<1x8x8xf32>
    %122 = arith.subf %118, %121 : vector<1x8x8xf32>
    %123 = math.exp %122 : vector<1x8x8xf32>
    %cst_36 = arith.constant dense<0.000000e+00> : vector<1x8xf32>
    %124 = vector.multi_reduction <add>, %123, %cst_36 [2] : vector<1x8x8xf32> to vector<1x8xf32>
    %125 = vector.shape_cast %124 : vector<1x8xf32> to vector<1x8x1xf32>
    %126 = tpu.reciprocal %125 {approx = true} : vector<1x8x1xf32> -> vector<1x8x1xf32>
    %127 = vector.broadcast %126 : vector<1x8x1xf32> to vector<1x8x8xf32>
    %128 = arith.mulf %123, %127 : vector<1x8x8xf32>
    %129 = arith.truncf %128 : vector<1x8x8xf32> to vector<1x8x8xbf16>
    "tpu.trace_start"() <{level = 10 : i32, message = "bqk,bkd->bqd"}> : () -> ()
    %cst_37 = arith.constant dense<0.000000e+00> : vector<1x8x4xf32>
    %130 = tpu.matmul %129, %117, %cst_37 {dimension_numbers = #tpu.dot_dimension_numbers<[2], [1], [1], [2], [0, 0, 0, 1, 1, 2], [0], [0]>} : vector<1x8x8xbf16>, vector<1x8x4xbf16>, vector<1x8x4xf32> -> vector<1x8x4xf32>
    "tpu.trace_stop"() : () -> ()
    %131 = vector.shape_cast %130 : vector<1x8x4xf32> to vector<8x4xf32>
    %132 = arith.truncf %131 : vector<8x4xf32> to vector<8x4xbf16>
    %c0_38 = arith.constant 0 : index
    %c16 = arith.constant 16 : index
    %133 = vector.load %arg10[%c0_38, %c16] : memref<8x32xbf16, #tpu.memory_space<vmem>>, vector<8x4xbf16>
    tpu.vector_store %arg10[%c0_38, %c16], %132 {strides = array<i32>} : memref<8x32xbf16, #tpu.memory_space<vmem>>, vector<8x4xbf16>,
    %134 = vector.extract_strided_slice %8 {offsets = [0, 20], sizes = [8, 4], strides = [1, 1]} : vector<8x32xf32> to vector<8x4xf32>
    %135 = vector.shape_cast %134 : vector<8x4xf32> to vector<1x8x4xf32>
    %136 = arith.truncf %135 : vector<1x8x4xf32> to vector<1x8x4xbf16>
    %137 = vector.extract_strided_slice %5 {offsets = [0, 20], sizes = [8, 4], strides = [1, 1]} : vector<8x32xf32> to vector<8x4xf32>
    %138 = vector.shape_cast %137 : vector<8x4xf32> to vector<1x8x4xf32>
    %139 = arith.truncf %138 : vector<1x8x4xf32> to vector<1x8x4xbf16>
    %140 = vector.extract_strided_slice %2 {offsets = [0, 20], sizes = [8, 4], strides = [1, 1]} : vector<8x32xf32> to vector<8x4xf32>
    %141 = vector.shape_cast %140 : vector<8x4xf32> to vector<1x8x4xf32>
    %142 = arith.truncf %141 : vector<1x8x4xf32> to vector<1x8x4xbf16>
    "tpu.trace_start"() <{level = 10 : i32, message = "bqd,bkd->bqk"}> : () -> ()
    %cst_39 = arith.constant dense<0.000000e+00> : vector<1x8x8xf32>
    %143 = tpu.matmul %136, %139, %cst_39 {dimension_numbers = #tpu.dot_dimension_numbers<[2], [2], [1], [1], [0, 0, 0, 1, 1, 1], [0], [0]>} : vector<1x8x4xbf16>, vector<1x8x4xbf16>, vector<1x8x8xf32> -> vector<1x8x8xf32>
    "tpu.trace_stop"() : () -> ()
    %cst_40 = arith.constant dense<0xFF800000> : vector<1x8xf32>
    %144 = vector.multi_reduction <maximumf>, %143, %cst_40 [2] : vector<1x8x8xf32> to vector<1x8xf32>
    %145 = vector.shape_cast %144 : vector<1x8xf32> to vector<1x8x1xf32>
    %146 = vector.broadcast %145 : vector<1x8x1xf32> to vector<1x8x8xf32>
    %147 = arith.subf %143, %146 : vector<1x8x8xf32>
    %148 = math.exp %147 : vector<1x8x8xf32>
    %cst_41 = arith.constant dense<0.000000e+00> : vector<1x8xf32>
    %149 = vector.multi_reduction <add>, %148, %cst_41 [2] : vector<1x8x8xf32> to vector<1x8xf32>
    %150 = vector.shape_cast %149 : vector<1x8xf32> to vector<1x8x1xf32>
    %151 = tpu.reciprocal %150 {approx = true} : vector<1x8x1xf32> -> vector<1x8x1xf32>
    %152 = vector.broadcast %151 : vector<1x8x1xf32> to vector<1x8x8xf32>
    %153 = arith.mulf %148, %152 : vector<1x8x8xf32>
    %154 = arith.truncf %153 : vector<1x8x8xf32> to vector<1x8x8xbf16>
    "tpu.trace_start"() <{level = 10 : i32, message = "bqk,bkd->bqd"}> : () -> ()
    %cst_42 = arith.constant dense<0.000000e+00> : vector<1x8x4xf32>
    %155 = tpu.matmul %154, %142, %cst_42 {dimension_numbers = #tpu.dot_dimension_numbers<[2], [1], [1], [2], [0, 0, 0, 1, 1, 2], [0], [0]>} : vector<1x8x8xbf16>, vector<1x8x4xbf16>, vector<1x8x4xf32> -> vector<1x8x4xf32>
    "tpu.trace_stop"() : () -> ()
    %156 = vector.shape_cast %155 : vector<1x8x4xf32> to vector<8x4xf32>
    %157 = arith.truncf %156 : vector<8x4xf32> to vector<8x4xbf16>
    %c0_43 = arith.constant 0 : index
    %c20 = arith.constant 20 : index
    %158 = vector.load %arg10[%c0_43, %c20] : memref<8x32xbf16, #tpu.memory_space<vmem>>, vector<8x4xbf16>
    tpu.vector_store %arg10[%c0_43, %c20], %157 {strides = array<i32>} : memref<8x32xbf16, #tpu.memory_space<vmem>>, vector<8x4xbf16>,
    %159 = vector.extract_strided_slice %8 {offsets = [0, 24], sizes = [8, 4], strides = [1, 1]} : vector<8x32xf32> to vector<8x4xf32>
    %160 = vector.shape_cast %159 : vector<8x4xf32> to vector<1x8x4xf32>
    %161 = arith.truncf %160 : vector<1x8x4xf32> to vector<1x8x4xbf16>
    %162 = vector.extract_strided_slice %5 {offsets = [0, 24], sizes = [8, 4], strides = [1, 1]} : vector<8x32xf32> to vector<8x4xf32>
    %163 = vector.shape_cast %162 : vector<8x4xf32> to vector<1x8x4xf32>
    %164 = arith.truncf %163 : vector<1x8x4xf32> to vector<1x8x4xbf16>
    %165 = vector.extract_strided_slice %2 {offsets = [0, 24], sizes = [8, 4], strides = [1, 1]} : vector<8x32xf32> to vector<8x4xf32>
    %166 = vector.shape_cast %165 : vector<8x4xf32> to vector<1x8x4xf32>
    %167 = arith.truncf %166 : vector<1x8x4xf32> to vector<1x8x4xbf16>
    "tpu.trace_start"() <{level = 10 : i32, message = "bqd,bkd->bqk"}> : () -> ()
    %cst_44 = arith.constant dense<0.000000e+00> : vector<1x8x8xf32>
    %168 = tpu.matmul %161, %164, %cst_44 {dimension_numbers = #tpu.dot_dimension_numbers<[2], [2], [1], [1], [0, 0, 0, 1, 1, 1], [0], [0]>} : vector<1x8x4xbf16>, vector<1x8x4xbf16>, vector<1x8x8xf32> -> vector<1x8x8xf32>
    "tpu.trace_stop"() : () -> ()
    %cst_45 = arith.constant dense<0xFF800000> : vector<1x8xf32>
    %169 = vector.multi_reduction <maximumf>, %168, %cst_45 [2] : vector<1x8x8xf32> to vector<1x8xf32>
    %170 = vector.shape_cast %169 : vector<1x8xf32> to vector<1x8x1xf32>
    %171 = vector.broadcast %170 : vector<1x8x1xf32> to vector<1x8x8xf32>
    %172 = arith.subf %168, %171 : vector<1x8x8xf32>
    %173 = math.exp %172 : vector<1x8x8xf32>
    %cst_46 = arith.constant dense<0.000000e+00> : vector<1x8xf32>
    %174 = vector.multi_reduction <add>, %173, %cst_46 [2] : vector<1x8x8xf32> to vector<1x8xf32>
    %175 = vector.shape_cast %174 : vector<1x8xf32> to vector<1x8x1xf32>
    %176 = tpu.reciprocal %175 {approx = true} : vector<1x8x1xf32> -> vector<1x8x1xf32>
    %177 = vector.broadcast %176 : vector<1x8x1xf32> to vector<1x8x8xf32>
    %178 = arith.mulf %173, %177 : vector<1x8x8xf32>
    %179 = arith.truncf %178 : vector<1x8x8xf32> to vector<1x8x8xbf16>
    "tpu.trace_start"() <{level = 10 : i32, message = "bqk,bkd->bqd"}> : () -> ()
    %cst_47 = arith.constant dense<0.000000e+00> : vector<1x8x4xf32>
    %180 = tpu.matmul %179, %167, %cst_47 {dimension_numbers = #tpu.dot_dimension_numbers<[2], [1], [1], [2], [0, 0, 0, 1, 1, 2], [0], [0]>} : vector<1x8x8xbf16>, vector<1x8x4xbf16>, vector<1x8x4xf32> -> vector<1x8x4xf32>
    "tpu.trace_stop"() : () -> ()
    %181 = vector.shape_cast %180 : vector<1x8x4xf32> to vector<8x4xf32>
    %182 = arith.truncf %181 : vector<8x4xf32> to vector<8x4xbf16>
    %c0_48 = arith.constant 0 : index
    %c24 = arith.constant 24 : index
    %183 = vector.load %arg10[%c0_48, %c24] : memref<8x32xbf16, #tpu.memory_space<vmem>>, vector<8x4xbf16>
    tpu.vector_store %arg10[%c0_48, %c24], %182 {strides = array<i32>} : memref<8x32xbf16, #tpu.memory_space<vmem>>, vector<8x4xbf16>,
    %184 = vector.extract_strided_slice %8 {offsets = [0, 28], sizes = [8, 4], strides = [1, 1]} : vector<8x32xf32> to vector<8x4xf32>
    %185 = vector.shape_cast %184 : vector<8x4xf32> to vector<1x8x4xf32>
    %186 = arith.truncf %185 : vector<1x8x4xf32> to vector<1x8x4xbf16>
    %187 = vector.extract_strided_slice %5 {offsets = [0, 28], sizes = [8, 4], strides = [1, 1]} : vector<8x32xf32> to vector<8x4xf32>
    %188 = vector.shape_cast %187 : vector<8x4xf32> to vector<1x8x4xf32>
    %189 = arith.truncf %188 : vector<1x8x4xf32> to vector<1x8x4xbf16>
    %190 = vector.extract_strided_slice %2 {offsets = [0, 28], sizes = [8, 4], strides = [1, 1]} : vector<8x32xf32> to vector<8x4xf32>
    %191 = vector.shape_cast %190 : vector<8x4xf32> to vector<1x8x4xf32>
    %192 = arith.truncf %191 : vector<1x8x4xf32> to vector<1x8x4xbf16>
    "tpu.trace_start"() <{level = 10 : i32, message = "bqd,bkd->bqk"}> : () -> ()
    %cst_49 = arith.constant dense<0.000000e+00> : vector<1x8x8xf32>
    %193 = tpu.matmul %186, %189, %cst_49 {dimension_numbers = #tpu.dot_dimension_numbers<[2], [2], [1], [1], [0, 0, 0, 1, 1, 1], [0], [0]>} : vector<1x8x4xbf16>, vector<1x8x4xbf16>, vector<1x8x8xf32> -> vector<1x8x8xf32>
    "tpu.trace_stop"() : () -> ()
    %cst_50 = arith.constant dense<0xFF800000> : vector<1x8xf32>
    %194 = vector.multi_reduction <maximumf>, %193, %cst_50 [2] : vector<1x8x8xf32> to vector<1x8xf32>
    %195 = vector.shape_cast %194 : vector<1x8xf32> to vector<1x8x1xf32>
    %196 = vector.broadcast %195 : vector<1x8x1xf32> to vector<1x8x8xf32>
    %197 = arith.subf %193, %196 : vector<1x8x8xf32>
    %198 = math.exp %197 : vector<1x8x8xf32>
    %cst_51 = arith.constant dense<0.000000e+00> : vector<1x8xf32>
    %199 = vector.multi_reduction <add>, %198, %cst_51 [2] : vector<1x8x8xf32> to vector<1x8xf32>
    %200 = vector.shape_cast %199 : vector<1x8xf32> to vector<1x8x1xf32>
    %201 = tpu.reciprocal %200 {approx = true} : vector<1x8x1xf32> -> vector<1x8x1xf32>
    %202 = vector.broadcast %201 : vector<1x8x1xf32> to vector<1x8x8xf32>
    %203 = arith.mulf %198, %202 : vector<1x8x8xf32>
    %204 = arith.truncf %203 : vector<1x8x8xf32> to vector<1x8x8xbf16>
    "tpu.trace_start"() <{level = 10 : i32, message = "bqk,bkd->bqd"}> : () -> ()
    %cst_52 = arith.constant dense<0.000000e+00> : vector<1x8x4xf32>
    %205 = tpu.matmul %204, %192, %cst_52 {dimension_numbers = #tpu.dot_dimension_numbers<[2], [1], [1], [2], [0, 0, 0, 1, 1, 2], [0], [0]>} : vector<1x8x8xbf16>, vector<1x8x4xbf16>, vector<1x8x4xf32> -> vector<1x8x4xf32>
    "tpu.trace_stop"() : () -> ()
    %206 = vector.shape_cast %205 : vector<1x8x4xf32> to vector<8x4xf32>
    %207 = arith.truncf %206 : vector<8x4xf32> to vector<8x4xbf16>
    %c0_53 = arith.constant 0 : index
    %c28 = arith.constant 28 : index
    %208 = vector.load %arg10[%c0_53, %c28] : memref<8x32xbf16, #tpu.memory_space<vmem>>, vector<8x4xbf16>
    tpu.vector_store %arg10[%c0_53, %c28], %207 {strides = array<i32>} : memref<8x32xbf16, #tpu.memory_space<vmem>>, vector<8x4xbf16>,
    %c0_54 = arith.constant 0 : index
    %c0_55 = arith.constant 0 : index
    %209 = vector.load %arg10[%c0_54, %c0_55] : memref<8x32xbf16, #tpu.memory_space<vmem>>, vector<8x32xbf16>
    %c0_56 = arith.constant 0 : index
    %c0_57 = arith.constant 0 : index
    %210 = vector.load %arg7[%c0_56, %c0_57] : memref<32x32xbf16, #tpu.memory_space<vmem>>, vector<32x32xbf16>
    %cst_58 = arith.constant dense<0.000000e+00> : vector<8x32xf32>
    %211 = tpu.matmul %209, %210, %cst_58 {dimension_numbers = #tpu.dot_dimension_numbers<[1], [0], [0], [1], [0, 0, 1, 1], [], []>} : vector<8x32xbf16>, vector<32x32xbf16>, vector<8x32xf32> -> vector<8x32xf32>
    %c0_59 = arith.constant 0 : index
    %c0_60 = arith.constant 0 : index
    %212 = vector.load %arg8[%c0_59, %c0_60] : memref<1x32xf32, #tpu.memory_space<vmem>>, vector<1x32xf32>
    %213 = vector.broadcast %212 : vector<1x32xf32> to vector<8x32xf32>
    %214 = arith.addf %211, %213 : vector<8x32xf32>
    %c0_61 = arith.constant 0 : index
    %c0_62 = arith.constant 0 : index
    %215 = vector.load %arg9[%c0_61, %c0_62] : memref<8x32xf32, #tpu.memory_space<vmem>>, vector<8x32xf32>
    tpu.vector_store %arg9[%c0_61, %c0_62], %214 {strides = array<i32>} : memref<8x32xf32, #tpu.memory_space<vmem>>, vector<8x32xf32>,
    return
  }
  func.func @transform_0(%arg0: i32) -> (i32, i32) {
    %c0_i32 = arith.constant 0 : i32
    %c0_i32_0 = arith.constant 0 : i32
    return %arg0, %c0_i32 : i32, i32
  }
  func.func @transform_1(%arg0: i32) -> (i32, i32) {
    %c0_i32 = arith.constant 0 : i32
    %c0_i32_0 = arith.constant 0 : i32
    return %arg0, %c0_i32 : i32, i32
  }
  func.func @transform_2(%arg0: i32) -> (i32, i32) {
    %c0_i32 = arith.constant 0 : i32
    %c0_i32_0 = arith.constant 0 : i32
    return %arg0, %c0_i32 : i32, i32
  }
  func.func @transform_3(%arg0: i32) -> (i32, i32) {
    %c0_i32 = arith.constant 0 : i32
    %c0_i32_0 = arith.constant 0 : i32
    %c0_i32_1 = arith.constant 0 : i32
    return %c0_i32, %c0_i32_0 : i32, i32
  }
  func.func @transform_4(%arg0: i32) -> (i32, i32) {
    %c0_i32 = arith.constant 0 : i32
    %c0_i32_0 = arith.constant 0 : i32
    %c0_i32_1 = arith.constant 0 : i32
    return %c0_i32, %c0_i32_0 : i32, i32
  }
  func.func @transform_5(%arg0: i32) -> (i32, i32) {
    %c0_i32 = arith.constant 0 : i32
    %c0_i32_0 = arith.constant 0 : i32
    %c0_i32_1 = arith.constant 0 : i32
    return %c0_i32, %c0_i32_0 : i32, i32
  }
  func.func @transform_6(%arg0: i32) -> (i32, i32) {
    %c0_i32 = arith.constant 0 : i32
    %c0_i32_0 = arith.constant 0 : i32
    %c0_i32_1 = arith.constant 0 : i32
    return %c0_i32, %c0_i32_0 : i32, i32
  }
  func.func @transform_7(%arg0: i32) -> (i32, i32) {
    %c0_i32 = arith.constant 0 : i32
    %c0_i32_0 = arith.constant 0 : i32
    %c0_i32_1 = arith.constant 0 : i32
    return %c0_i32, %c0_i32_0 : i32, i32
  }
  func.func @transform_8(%arg0: i32) -> (i32, i32) {
    %c0_i32 = arith.constant 0 : i32
    %c0_i32_0 = arith.constant 0 : i32
    return %arg0, %c0_i32 : i32, i32
  }
}

module attributes {stable_mosaic.version = 11 : i64} {
  func.func @_mha_kernel(%arg0: i32, %arg1: memref<8x32xbf16, #tpu.memory_space<vmem>>, %arg2: memref<8x32xbf16, #tpu.memory_space<vmem>>, %arg3: memref<8x32xbf16, #tpu.memory_space<vmem>>, %arg4: memref<32x32xbf16, #tpu.memory_space<vmem>>, %arg5: memref<32x32xbf16, #tpu.memory_space<vmem>>, %arg6: memref<32x32xbf16, #tpu.memory_space<vmem>>, %arg7: memref<32x32xbf16, #tpu.memory_space<vmem>>, %arg8: memref<1x32xf32, #tpu.memory_space<vmem>>, %arg9: memref<8x32xf32, #tpu.memory_space<vmem>>, %arg10: memref<8x32xbf16, #tpu.memory_space<vmem>>) attributes {dimension_semantics = [#tpu.dimension_semantics<parallel>], iteration_bounds = array<i64: 2>, scalar_prefetch = 0 : i64, scratch_operands = 1 : i64, tpu.core_type = #tpu.core_type<tc>, window_params = [{transform_indices = @transform_0, window_bounds = array<i64: 8, 32>}, {transform_indices = @transform_1, window_bounds = array<i64: 8, 32>}, {transform_indices = @transform_2, window_bounds = array<i64: 8, 32>}, {pipeline_mode = #tpu.pipeline_mode<synchronous>, transform_indices = @transform_3, window_bounds = array<i64: 32, 32>}, {pipeline_mode = #tpu.pipeline_mode<synchronous>, transform_indices = @transform_4, window_bounds = array<i64: 32, 32>}, {pipeline_mode = #tpu.pipeline_mode<synchronous>, transform_indices = @transform_5, window_bounds = array<i64: 32, 32>}, {pipeline_mode = #tpu.pipeline_mode<synchronous>, transform_indices = @transform_6, window_bounds = array<i64: 32, 32>}, {pipeline_mode = #tpu.pipeline_mode<synchronous>, transform_indices = @transform_7, window_bounds = array<i64: 1, 32>}, {transform_indices = @transform_8, window_bounds = array<i64: 8, 32>}]} {
    %c0 = arith.constant 0 : index
    %c0_0 = arith.constant 0 : index
    %0 = vector.load %arg1[%c0, %c0_0] : memref<8x32xbf16, #tpu.memory_space<vmem>>, vector<8x32xbf16>
    %c0_1 = arith.constant 0 : index
    %c0_2 = arith.constant 0 : index
    %1 = vector.load %arg4[%c0_1, %c0_2] : memref<32x32xbf16, #tpu.memory_space<vmem>>, vector<32x32xbf16>
    %cst = arith.constant dense<0.000000e+00> : vector<8x32xf32>
    %2 = tpu.matmul %0, %1, %cst {dimension_numbers = #tpu.dot_dimension_numbers<[1], [0], [0], [1], [0, 0, 1, 1], [], []>} : vector<8x32xbf16>, vector<32x32xbf16>, vector<8x32xf32> -> vector<8x32xf32>
    %c0_3 = arith.constant 0 : index
    %c0_4 = arith.constant 0 : index
    %3 = vector.load %arg2[%c0_3, %c0_4] : memref<8x32xbf16, #tpu.memory_space<vmem>>, vector<8x32xbf16>
    %c0_5 = arith.constant 0 : index
    %c0_6 = arith.constant 0 : index
    %4 = vector.load %arg5[%c0_5, %c0_6] : memref<32x32xbf16, #tpu.memory_space<vmem>>, vector<32x32xbf16>
    %cst_7 = arith.constant dense<0.000000e+00> : vector<8x32xf32>
    %5 = tpu.matmul %3, %4, %cst_7 {dimension_numbers = #tpu.dot_dimension_numbers<[1], [0], [0], [1], [0, 0, 1, 1], [], []>} : vector<8x32xbf16>, vector<32x32xbf16>, vector<8x32xf32> -> vector<8x32xf32>
    %c0_8 = arith.constant 0 : index
    %c0_9 = arith.constant 0 : index
    %6 = vector.load %arg3[%c0_8, %c0_9] : memref<8x32xbf16, #tpu.memory_space<vmem>>, vector<8x32xbf16>
    %c0_10 = arith.constant 0 : index
    %c0_11 = arith.constant 0 : index
    %7 = vector.load %arg6[%c0_10, %c0_11] : memref<32x32xbf16, #tpu.memory_space<vmem>>, vector<32x32xbf16>
    %cst_12 = arith.constant dense<0.000000e+00> : vector<8x32xf32>
    %8 = tpu.matmul %6, %7, %cst_12 {dimension_numbers = #tpu.dot_dimension_numbers<[1], [0], [0], [1], [0, 0, 1, 1], [], []>} : vector<8x32xbf16>, vector<32x32xbf16>, vector<8x32xf32> -> vector<8x32xf32>
    %9 = vector.extract_strided_slice %8 {offsets = [0, 0], sizes = [8, 4], strides = [1, 1]} : vector<8x32xf32> to vector<8x4xf32>
    %10 = vector.shape_cast %9 : vector<8x4xf32> to vector<1x8x4xf32>
    %11 = arith.truncf %10 : vector<1x8x4xf32> to vector<1x8x4xbf16>
    %12 = vector.extract_strided_slice %5 {offsets = [0, 0], sizes = [8, 4], strides = [1, 1]} : vector<8x32xf32> to vector<8x4xf32>
    %13 = vector.shape_cast %12 : vector<8x4xf32> to vector<1x8x4xf32>
    %14 = arith.truncf %13 : vector<1x8x4xf32> to vector<1x8x4xbf16>
    %15 = vector.extract_strided_slice %2 {offsets = [0, 0], sizes = [8, 4], strides = [1, 1]} : vector<8x32xf32> to vector<8x4xf32>
    %16 = vector.shape_cast %15 : vector<8x4xf32> to vector<1x8x4xf32>
    %17 = arith.truncf %16 : vector<1x8x4xf32> to vector<1x8x4xbf16>
    "tpu.trace_start"() <{level = 10 : i32, message = "bqd,bkd->bqk"}> : () -> ()
    %cst_13 = arith.constant dense<0.000000e+00> : vector<1x8x8xf32>
    %18 = tpu.matmul %11, %14, %cst_13 {dimension_numbers = #tpu.dot_dimension_numbers<[2], [2], [1], [1], [0, 0, 0, 1, 1, 1], [0], [0]>} : vector<1x8x4xbf16>, vector<1x8x4xbf16>, vector<1x8x8xf32> -> vector<1x8x8xf32>
    "tpu.trace_stop"() : () -> ()
    %cst_14 = arith.constant dense<0xFF800000> : vector<1x8xf32>
    %19 = vector.multi_reduction <maximumf>, %18, %cst_14 [2] : vector<1x8x8xf32> to vector<1x8xf32>
    %20 = vector.shape_cast %19 : vector<1x8xf32> to vector<1x8x1xf32>
    %21 = vector.broadcast %20 : vector<1x8x1xf32> to vector<1x8x8xf32>
    %22 = arith.subf %18, %21 : vector<1x8x8xf32>
    %23 = math.exp %22 : vector<1x8x8xf32>
    %cst_15 = arith.constant dense<0.000000e+00> : vector<1x8xf32>
    %24 = vector.multi_reduction <add>, %23, %cst_15 [2] : vector<1x8x8xf32> to vector<1x8xf32>
    %25 = vector.shape_cast %24 : vector<1x8xf32> to vector<1x8x1xf32>
    %26 = tpu.reciprocal %25 {approx = true} : vector<1x8x1xf32> -> vector<1x8x1xf32>
    %27 = vector.broadcast %26 : vector<1x8x1xf32> to vector<1x8x8xf32>
    %28 = arith.mulf %23, %27 : vector<1x8x8xf32>
    %29 = arith.truncf %28 : vector<1x8x8xf32> to vector<1x8x8xbf16>
    "tpu.trace_start"() <{level = 10 : i32, message = "bqk,bkd->bqd"}> : () -> ()
    %cst_16 = arith.constant dense<0.000000e+00> : vector<1x8x4xf32>
    %30 = tpu.matmul %29, %17, %cst_16 {dimension_numbers = #tpu.dot_dimension_numbers<[2], [1], [1], [2], [0, 0, 0, 1, 1, 2], [0], [0]>} : vector<1x8x8xbf16>, vector<1x8x4xbf16>, vector<1x8x4xf32> -> vector<1x8x4xf32>
    "tpu.trace_stop"() : () -> ()
    %31 = vector.shape_cast %30 : vector<1x8x4xf32> to vector<8x4xf32>
    %32 = arith.truncf %31 : vector<8x4xf32> to vector<8x4xbf16>
    %c0_17 = arith.constant 0 : index
    %c0_18 = arith.constant 0 : index
    %33 = vector.load %arg10[%c0_17, %c0_18] : memref<8x32xbf16, #tpu.memory_space<vmem>>, vector<8x4xbf16>
    tpu.vector_store %arg10[%c0_17, %c0_18], %32 {strides = array<i32>} : memref<8x32xbf16, #tpu.memory_space<vmem>>, vector<8x4xbf16>,
    %34 = vector.extract_strided_slice %8 {offsets = [0, 4], sizes = [8, 4], strides = [1, 1]} : vector<8x32xf32> to vector<8x4xf32>
    %35 = vector.shape_cast %34 : vector<8x4xf32> to vector<1x8x4xf32>
    %36 = arith.truncf %35 : vector<1x8x4xf32> to vector<1x8x4xbf16>
    %37 = vector.extract_strided_slice %5 {offsets = [0, 4], sizes = [8, 4], strides = [1, 1]} : vector<8x32xf32> to vector<8x4xf32>
    %38 = vector.shape_cast %37 : vector<8x4xf32> to vector<1x8x4xf32>
    %39 = arith.truncf %38 : vector<1x8x4xf32> to vector<1x8x4xbf16>
    %40 = vector.extract_strided_slice %2 {offsets = [0, 4], sizes = [8, 4], strides = [1, 1]} : vector<8x32xf32> to vector<8x4xf32>
    %41 = vector.shape_cast %40 : vector<8x4xf32> to vector<1x8x4xf32>
    %42 = arith.truncf %41 : vector<1x8x4xf32> to vector<1x8x4xbf16>
    "tpu.trace_start"() <{level = 10 : i32, message = "bqd,bkd->bqk"}> : () -> ()
    %cst_19 = arith.constant dense<0.000000e+00> : vector<1x8x8xf32>
    %43 = tpu.matmul %36, %39, %cst_19 {dimension_numbers = #tpu.dot_dimension_numbers<[2], [2], [1], [1], [0, 0, 0, 1, 1, 1], [0], [0]>} : vector<1x8x4xbf16>, vector<1x8x4xbf16>, vector<1x8x8xf32> -> vector<1x8x8xf32>
    "tpu.trace_stop"() : () -> ()
    %cst_20 = arith.constant dense<0xFF800000> : vector<1x8xf32>
    %44 = vector.multi_reduction <maximumf>, %43, %cst_20 [2] : vector<1x8x8xf32> to vector<1x8xf32>
    %45 = vector.shape_cast %44 : vector<1x8xf32> to vector<1x8x1xf32>
    %46 = vector.broadcast %45 : vector<1x8x1xf32> to vector<1x8x8xf32>
    %47 = arith.subf %43, %46 : vector<1x8x8xf32>
    %48 = math.exp %47 : vector<1x8x8xf32>
    %cst_21 = arith.constant dense<0.000000e+00> : vector<1x8xf32>
    %49 = vector.multi_reduction <add>, %48, %cst_21 [2] : vector<1x8x8xf32> to vector<1x8xf32>
    %50 = vector.shape_cast %49 : vector<1x8xf32> to vector<1x8x1xf32>
    %51 = tpu.reciprocal %50 {approx = true} : vector<1x8x1xf32> -> vector<1x8x1xf32>
    %52 = vector.broadcast %51 : vector<1x8x1xf32> to vector<1x8x8xf32>
    %53 = arith.mulf %48, %52 : vector<1x8x8xf32>
    %54 = arith.truncf %53 : vector<1x8x8xf32> to vector<1x8x8xbf16>
    "tpu.trace_start"() <{level = 10 : i32, message = "bqk,bkd->bqd"}> : () -> ()
    %cst_22 = arith.constant dense<0.000000e+00> : vector<1x8x4xf32>
    %55 = tpu.matmul %54, %42, %cst_22 {dimension_numbers = #tpu.dot_dimension_numbers<[2], [1], [1], [2], [0, 0, 0, 1, 1, 2], [0], [0]>} : vector<1x8x8xbf16>, vector<1x8x4xbf16>, vector<1x8x4xf32> -> vector<1x8x4xf32>
    "tpu.trace_stop"() : () -> ()
    %56 = vector.shape_cast %55 : vector<1x8x4xf32> to vector<8x4xf32>
    %57 = arith.truncf %56 : vector<8x4xf32> to vector<8x4xbf16>
    %c0_23 = arith.constant 0 : index
    %c4 = arith.constant 4 : index
    %58 = vector.load %arg10[%c0_23, %c4] : memref<8x32xbf16, #tpu.memory_space<vmem>>, vector<8x4xbf16>
    tpu.vector_store %arg10[%c0_23, %c4], %57 {strides = array<i32>} : memref<8x32xbf16, #tpu.memory_space<vmem>>, vector<8x4xbf16>,
    %59 = vector.extract_strided_slice %8 {offsets = [0, 8], sizes = [8, 4], strides = [1, 1]} : vector<8x32xf32> to vector<8x4xf32>
    %60 = vector.shape_cast %59 : vector<8x4xf32> to vector<1x8x4xf32>
    %61 = arith.truncf %60 : vector<1x8x4xf32> to vector<1x8x4xbf16>
    %62 = vector.extract_strided_slice %5 {offsets = [0, 8], sizes = [8, 4], strides = [1, 1]} : vector<8x32xf32> to vector<8x4xf32>
    %63 = vector.shape_cast %62 : vector<8x4xf32> to vector<1x8x4xf32>
    %64 = arith.truncf %63 : vector<1x8x4xf32> to vector<1x8x4xbf16>
    %65 = vector.extract_strided_slice %2 {offsets = [0, 8], sizes = [8, 4], strides = [1, 1]} : vector<8x32xf32> to vector<8x4xf32>
    %66 = vector.shape_cast %65 : vector<8x4xf32> to vector<1x8x4xf32>
    %67 = arith.truncf %66 : vector<1x8x4xf32> to vector<1x8x4xbf16>
    "tpu.trace_start"() <{level = 10 : i32, message = "bqd,bkd->bqk"}> : () -> ()
    %cst_24 = arith.constant dense<0.000000e+00> : vector<1x8x8xf32>
    %68 = tpu.matmul %61, %64, %cst_24 {dimension_numbers = #tpu.dot_dimension_numbers<[2], [2], [1], [1], [0, 0, 0, 1, 1, 1], [0], [0]>} : vector<1x8x4xbf16>, vector<1x8x4xbf16>, vector<1x8x8xf32> -> vector<1x8x8xf32>
    "tpu.trace_stop"() : () -> ()
    %cst_25 = arith.constant dense<0xFF800000> : vector<1x8xf32>
    %69 = vector.multi_reduction <maximumf>, %68, %cst_25 [2] : vector<1x8x8xf32> to vector<1x8xf32>
    %70 = vector.shape_cast %69 : vector<1x8xf32> to vector<1x8x1xf32>
    %71 = vector.broadcast %70 : vector<1x8x1xf32> to vector<1x8x8xf32>
    %72 = arith.subf %68, %71 : vector<1x8x8xf32>
    %73 = math.exp %72 : vector<1x8x8xf32>
    %cst_26 = arith.constant dense<0.000000e+00> : vector<1x8xf32>
    %74 = vector.multi_reduction <add>, %73, %cst_26 [2] : vector<1x8x8xf32> to vector<1x8xf32>
    %75 = vector.shape_cast %74 : vector<1x8xf32> to vector<1x8x1xf32>
    %76 = tpu.reciprocal %75 {approx = true} : vector<1x8x1xf32> -> vector<1x8x1xf32>
    %77 = vector.broadcast %76 : vector<1x8x1xf32> to vector<1x8x8xf32>
    %78 = arith.mulf %73, %77 : vector<1x8x8xf32>
    %79 = arith.truncf %78 : vector<1x8x8xf32> to vector<1x8x8xbf16>
    "tpu.trace_start"() <{level = 10 : i32, message = "bqk,bkd->bqd"}> : () -> ()
    %cst_27 = arith.constant dense<0.000000e+00> : vector<1x8x4xf32>
    %80 = tpu.matmul %79, %67, %cst_27 {dimension_numbers = #tpu.dot_dimension_numbers<[2], [1], [1], [2], [0, 0, 0, 1, 1, 2], [0], [0]>} : vector<1x8x8xbf16>, vector<1x8x4xbf16>, vector<1x8x4xf32> -> vector<1x8x4xf32>
    "tpu.trace_stop"() : () -> ()
    %81 = vector.shape_cast %80 : vector<1x8x4xf32> to vector<8x4xf32>
    %82 = arith.truncf %81 : vector<8x4xf32> to vector<8x4xbf16>
    %c0_28 = arith.constant 0 : index
    %c8 = arith.constant 8 : index
    %83 = vector.load %arg10[%c0_28, %c8] : memref<8x32xbf16, #tpu.memory_space<vmem>>, vector<8x4xbf16>
    tpu.vector_store %arg10[%c0_28, %c8], %82 {strides = array<i32>} : memref<8x32xbf16, #tpu.memory_space<vmem>>, vector<8x4xbf16>,
    %84 = vector.extract_strided_slice %8 {offsets = [0, 12], sizes = [8, 4], strides = [1, 1]} : vector<8x32xf32> to vector<8x4xf32>
    %85 = vector.shape_cast %84 : vector<8x4xf32> to vector<1x8x4xf32>
    %86 = arith.truncf %85 : vector<1x8x4xf32> to vector<1x8x4xbf16>
    %87 = vector.extract_strided_slice %5 {offsets = [0, 12], sizes = [8, 4], strides = [1, 1]} : vector<8x32xf32> to vector<8x4xf32>
    %88 = vector.shape_cast %87 : vector<8x4xf32> to vector<1x8x4xf32>
    %89 = arith.truncf %88 : vector<1x8x4xf32> to vector<1x8x4xbf16>
    %90 = vector.extract_strided_slice %2 {offsets = [0, 12], sizes = [8, 4], strides = [1, 1]} : vector<8x32xf32> to vector<8x4xf32>
    %91 = vector.shape_cast %90 : vector<8x4xf32> to vector<1x8x4xf32>
    %92 = arith.truncf %91 : vector<1x8x4xf32> to vector<1x8x4xbf16>
    "tpu.trace_start"() <{level = 10 : i32, message = "bqd,bkd->bqk"}> : () -> ()
    %cst_29 = arith.constant dense<0.000000e+00> : vector<1x8x8xf32>
    %93 = tpu.matmul %86, %89, %cst_29 {dimension_numbers = #tpu.dot_dimension_numbers<[2], [2], [1], [1], [0, 0, 0, 1, 1, 1], [0], [0]>} : vector<1x8x4xbf16>, vector<1x8x4xbf16>, vector<1x8x8xf32> -> vector<1x8x8xf32>
    "tpu.trace_stop"() : () -> ()
    %cst_30 = arith.constant dense<0xFF800000> : vector<1x8xf32>
    %94 = vector.multi_reduction <maximumf>, %93, %cst_30 [2] : vector<1x8x8xf32> to vector<1x8xf32>
    %95 = vector.shape_cast %94 : vector<1x8xf32> to vector<1x8x1xf32>
    %96 = vector.broadcast %95 : vector<1x8x1xf32> to vector<1x8x8xf32>
    %97 = arith.subf %93, %96 : vector<1x8x8xf32>
    %98 = math.exp %97 : vector<1x8x8xf32>
    %cst_31 = arith.constant dense<0.000000e+00> : vector<1x8xf32>
    %99 = vector.multi_reduction <add>, %98, %cst_31 [2] : vector<1x8x8xf32> to vector<1x8xf32>
    %100 = vector.shape_cast %99 : vector<1x8xf32> to vector<1x8x1xf32>
    %101 = tpu.reciprocal %100 {approx = true} : vector<1x8x1xf32> -> vector<1x8x1xf32>
    %102 = vector.broadcast %101 : vector<1x8x1xf32> to vector<1x8x8xf32>
    %103 = arith.mulf %98, %102 : vector<1x8x8xf32>
    %104 = arith.truncf %103 : vector<1x8x8xf32> to vector<1x8x8xbf16>
    "tpu.trace_start"() <{level = 10 : i32, message = "bqk,bkd->bqd"}> : () -> ()
    %cst_32 = arith.constant dense<0.000000e+00> : vector<1x8x4xf32>
    %105 = tpu.matmul %104, %92, %cst_32 {dimension_numbers = #tpu.dot_dimension_numbers<[2], [1], [1], [2], [0, 0, 0, 1, 1, 2], [0], [0]>} : vector<1x8x8xbf16>, vector<1x8x4xbf16>, vector<1x8x4xf32> -> vector<1x8x4xf32>
    "tpu.trace_stop"() : () -> ()
    %106 = vector.shape_cast %105 : vector<1x8x4xf32> to vector<8x4xf32>
    %107 = arith.truncf %106 : vector<8x4xf32> to vector<8x4xbf16>
    %c0_33 = arith.constant 0 : index
    %c12 = arith.constant 12 : index
    %108 = vector.load %arg10[%c0_33, %c12] : memref<8x32xbf16, #tpu.memory_space<vmem>>, vector<8x4xbf16>
    tpu.vector_store %arg10[%c0_33, %c12], %107 {strides = array<i32>} : memref<8x32xbf16, #tpu.memory_space<vmem>>, vector<8x4xbf16>,
    %109 = vector.extract_strided_slice %8 {offsets = [0, 16], sizes = [8, 4], strides = [1, 1]} : vector<8x32xf32> to vector<8x4xf32>
    %110 = vector.shape_cast %109 : vector<8x4xf32> to vector<1x8x4xf32>
    %111 = arith.truncf %110 : vector<1x8x4xf32> to vector<1x8x4xbf16>
    %112 = vector.extract_strided_slice %5 {offsets = [0, 16], sizes = [8, 4], strides = [1, 1]} : vector<8x32xf32> to vector<8x4xf32>
    %113 = vector.shape_cast %112 : vector<8x4xf32> to vector<1x8x4xf32>
    %114 = arith.truncf %113 : vector<1x8x4xf32> to vector<1x8x4xbf16>
    %115 = vector.extract_strided_slice %2 {offsets = [0, 16], sizes = [8, 4], strides = [1, 1]} : vector<8x32xf32> to vector<8x4xf32>
    %116 = vector.shape_cast %115 : vector<8x4xf32> to vector<1x8x4xf32>
    %117 = arith.truncf %116 : vector<1x8x4xf32> to vector<1x8x4xbf16>
    "tpu.trace_start"() <{level = 10 : i32, message = "bqd,bkd->bqk"}> : () -> ()
    %cst_34 = arith.constant dense<0.000000e+00> : vector<1x8x8xf32>
    %118 = tpu.matmul %111, %114, %cst_34 {dimension_numbers = #tpu.dot_dimension_numbers<[2], [2], [1], [1], [0, 0, 0, 1, 1, 1], [0], [0]>} : vector<1x8x4xbf16>, vector<1x8x4xbf16>, vector<1x8x8xf32> -> vector<1x8x8xf32>
    "tpu.trace_stop"() : () -> ()
    %cst_35 = arith.constant dense<0xFF800000> : vector<1x8xf32>
    %119 = vector.multi_reduction <maximumf>, %118, %cst_35 [2] : vector<1x8x8xf32> to vector<1x8xf32>
    %120 = vector.shape_cast %119 : vector<1x8xf32> to vector<1x8x1xf32>
    %121 = vector.broadcast %120 : vector<1x8x1xf32> to vector<1x8x8xf32>
    %122 = arith.subf %118, %121 : vector<1x8x8xf32>
    %123 = math.exp %122 : vector<1x8x8xf32>
    %cst_36 = arith.constant dense<0.000000e+00> : vector<1x8xf32>
    %124 = vector.multi_reduction <add>, %123, %cst_36 [2] : vector<1x8x8xf32> to vector<1x8xf32>
    %125 = vector.shape_cast %124 : vector<1x8xf32> to vector<1x8x1xf32>
    %126 = tpu.reciprocal %125 {approx = true} : vector<1x8x1xf32> -> vector<1x8x1xf32>
    %127 = vector.broadcast %126 : vector<1x8x1xf32> to vector<1x8x8xf32>
    %128 = arith.mulf %123, %127 : vector<1x8x8xf32>
    %129 = arith.truncf %128 : vector<1x8x8xf32> to vector<1x8x8xbf16>
    "tpu.trace_start"() <{level = 10 : i32, message = "bqk,bkd->bqd"}> : () -> ()
    %cst_37 = arith.constant dense<0.000000e+00> : vector<1x8x4xf32>
    %130 = tpu.matmul %129, %117, %cst_37 {dimension_numbers = #tpu.dot_dimension_numbers<[2], [1], [1], [2], [0, 0, 0, 1, 1, 2], [0], [0]>} : vector<1x8x8xbf16>, vector<1x8x4xbf16>, vector<1x8x4xf32> -> vector<1x8x4xf32>
    "tpu.trace_stop"() : () -> ()
    %131 = vector.shape_cast %130 : vector<1x8x4xf32> to vector<8x4xf32>
    %132 = arith.truncf %131 : vector<8x4xf32> to vector<8x4xbf16>
    %c0_38 = arith.constant 0 : index
    %c16 = arith.constant 16 : index
    %133 = vector.load %arg10[%c0_38, %c16] : memref<8x32xbf16, #tpu.memory_space<vmem>>, vector<8x4xbf16>
    tpu.vector_store %arg10[%c0_38, %c16], %132 {strides = array<i32>} : memref<8x32xbf16, #tpu.memory_space<vmem>>, vector<8x4xbf16>,
    %134 = vector.extract_strided_slice %8 {offsets = [0, 20], sizes = [8, 4], strides = [1, 1]} : vector<8x32xf32> to vector<8x4xf32>
    %135 = vector.shape_cast %134 : vector<8x4xf32> to vector<1x8x4xf32>
    %136 = arith.truncf %135 : vector<1x8x4xf32> to vector<1x8x4xbf16>
    %137 = vector.extract_strided_slice %5 {offsets = [0, 20], sizes = [8, 4], strides = [1, 1]} : vector<8x32xf32> to vector<8x4xf32>
    %138 = vector.shape_cast %137 : vector<8x4xf32> to vector<1x8x4xf32>
    %139 = arith.truncf %138 : vector<1x8x4xf32> to vector<1x8x4xbf16>
    %140 = vector.extract_strided_slice %2 {offsets = [0, 20], sizes = [8, 4], strides = [1, 1]} : vector<8x32xf32> to vector<8x4xf32>
    %141 = vector.shape_cast %140 : vector<8x4xf32> to vector<1x8x4xf32>
    %142 = arith.truncf %141 : vector<1x8x4xf32> to vector<1x8x4xbf16>
    "tpu.trace_start"() <{level = 10 : i32, message = "bqd,bkd->bqk"}> : () -> ()
    %cst_39 = arith.constant dense<0.000000e+00> : vector<1x8x8xf32>
    %143 = tpu.matmul %136, %139, %cst_39 {dimension_numbers = #tpu.dot_dimension_numbers<[2], [2], [1], [1], [0, 0, 0, 1, 1, 1], [0], [0]>} : vector<1x8x4xbf16>, vector<1x8x4xbf16>, vector<1x8x8xf32> -> vector<1x8x8xf32>
    "tpu.trace_stop"() : () -> ()
    %cst_40 = arith.constant dense<0xFF800000> : vector<1x8xf32>
    %144 = vector.multi_reduction <maximumf>, %143, %cst_40 [2] : vector<1x8x8xf32> to vector<1x8xf32>
    %145 = vector.shape_cast %144 : vector<1x8xf32> to vector<1x8x1xf32>
    %146 = vector.broadcast %145 : vector<1x8x1xf32> to vector<1x8x8xf32>
    %147 = arith.subf %143, %146 : vector<1x8x8xf32>
    %148 = math.exp %147 : vector<1x8x8xf32>
    %cst_41 = arith.constant dense<0.000000e+00> : vector<1x8xf32>
    %149 = vector.multi_reduction <add>, %148, %cst_41 [2] : vector<1x8x8xf32> to vector<1x8xf32>
    %150 = vector.shape_cast %149 : vector<1x8xf32> to vector<1x8x1xf32>
    %151 = tpu.reciprocal %150 {approx = true} : vector<1x8x1xf32> -> vector<1x8x1xf32>
    %152 = vector.broadcast %151 : vector<1x8x1xf32> to vector<1x8x8xf32>
    %153 = arith.mulf %148, %152 : vector<1x8x8xf32>
    %154 = arith.truncf %153 : vector<1x8x8xf32> to vector<1x8x8xbf16>
    "tpu.trace_start"() <{level = 10 : i32, message = "bqk,bkd->bqd"}> : () -> ()
    %cst_42 = arith.constant dense<0.000000e+00> : vector<1x8x4xf32>
    %155 = tpu.matmul %154, %142, %cst_42 {dimension_numbers = #tpu.dot_dimension_numbers<[2], [1], [1], [2], [0, 0, 0, 1, 1, 2], [0], [0]>} : vector<1x8x8xbf16>, vector<1x8x4xbf16>, vector<1x8x4xf32> -> vector<1x8x4xf32>
    "tpu.trace_stop"() : () -> ()
    %156 = vector.shape_cast %155 : vector<1x8x4xf32> to vector<8x4xf32>
    %157 = arith.truncf %156 : vector<8x4xf32> to vector<8x4xbf16>
    %c0_43 = arith.constant 0 : index
    %c20 = arith.constant 20 : index
    %158 = vector.load %arg10[%c0_43, %c20] : memref<8x32xbf16, #tpu.memory_space<vmem>>, vector<8x4xbf16>
    tpu.vector_store %arg10[%c0_43, %c20], %157 {strides = array<i32>} : memref<8x32xbf16, #tpu.memory_space<vmem>>, vector<8x4xbf16>,
    %159 = vector.extract_strided_slice %8 {offsets = [0, 24], sizes = [8, 4], strides = [1, 1]} : vector<8x32xf32> to vector<8x4xf32>
    %160 = vector.shape_cast %159 : vector<8x4xf32> to vector<1x8x4xf32>
    %161 = arith.truncf %160 : vector<1x8x4xf32> to vector<1x8x4xbf16>
    %162 = vector.extract_strided_slice %5 {offsets = [0, 24], sizes = [8, 4], strides = [1, 1]} : vector<8x32xf32> to vector<8x4xf32>
    %163 = vector.shape_cast %162 : vector<8x4xf32> to vector<1x8x4xf32>
    %164 = arith.truncf %163 : vector<1x8x4xf32> to vector<1x8x4xbf16>
    %165 = vector.extract_strided_slice %2 {offsets = [0, 24], sizes = [8, 4], strides = [1, 1]} : vector<8x32xf32> to vector<8x4xf32>
    %166 = vector.shape_cast %165 : vector<8x4xf32> to vector<1x8x4xf32>
    %167 = arith.truncf %166 : vector<1x8x4xf32> to vector<1x8x4xbf16>
    "tpu.trace_start"() <{level = 10 : i32, message = "bqd,bkd->bqk"}> : () -> ()
    %cst_44 = arith.constant dense<0.000000e+00> : vector<1x8x8xf32>
    %168 = tpu.matmul %161, %164, %cst_44 {dimension_numbers = #tpu.dot_dimension_numbers<[2], [2], [1], [1], [0, 0, 0, 1, 1, 1], [0], [0]>} : vector<1x8x4xbf16>, vector<1x8x4xbf16>, vector<1x8x8xf32> -> vector<1x8x8xf32>
    "tpu.trace_stop"() : () -> ()
    %cst_45 = arith.constant dense<0xFF800000> : vector<1x8xf32>
    %169 = vector.multi_reduction <maximumf>, %168, %cst_45 [2] : vector<1x8x8xf32> to vector<1x8xf32>
    %170 = vector.shape_cast %169 : vector<1x8xf32> to vector<1x8x1xf32>
    %171 = vector.broadcast %170 : vector<1x8x1xf32> to vector<1x8x8xf32>
    %172 = arith.subf %168, %171 : vector<1x8x8xf32>
    %173 = math.exp %172 : vector<1x8x8xf32>
    %cst_46 = arith.constant dense<0.000000e+00> : vector<1x8xf32>
    %174 = vector.multi_reduction <add>, %173, %cst_46 [2] : vector<1x8x8xf32> to vector<1x8xf32>
    %175 = vector.shape_cast %174 : vector<1x8xf32> to vector<1x8x1xf32>
    %176 = tpu.reciprocal %175 {approx = true} : vector<1x8x1xf32> -> vector<1x8x1xf32>
    %177 = vector.broadcast %176 : vector<1x8x1xf32> to vector<1x8x8xf32>
    %178 = arith.mulf %173, %177 : vector<1x8x8xf32>
    %179 = arith.truncf %178 : vector<1x8x8xf32> to vector<1x8x8xbf16>
    "tpu.trace_start"() <{level = 10 : i32, message = "bqk,bkd->bqd"}> : () -> ()
    %cst_47 = arith.constant dense<0.000000e+00> : vector<1x8x4xf32>
    %180 = tpu.matmul %179, %167, %cst_47 {dimension_numbers = #tpu.dot_dimension_numbers<[2], [1], [1], [2], [0, 0, 0, 1, 1, 2], [0], [0]>} : vector<1x8x8xbf16>, vector<1x8x4xbf16>, vector<1x8x4xf32> -> vector<1x8x4xf32>
    "tpu.trace_stop"() : () -> ()
    %181 = vector.shape_cast %180 : vector<1x8x4xf32> to vector<8x4xf32>
    %182 = arith.truncf %181 : vector<8x4xf32> to vector<8x4xbf16>
    %c0_48 = arith.constant 0 : index
    %c24 = arith.constant 24 : index
    %183 = vector.load %arg10[%c0_48, %c24] : memref<8x32xbf16, #tpu.memory_space<vmem>>, vector<8x4xbf16>
    tpu.vector_store %arg10[%c0_48, %c24], %182 {strides = array<i32>} : memref<8x32xbf16, #tpu.memory_space<vmem>>, vector<8x4xbf16>,
    %184 = vector.extract_strided_slice %8 {offsets = [0, 28], sizes = [8, 4], strides = [1, 1]} : vector<8x32xf32> to vector<8x4xf32>
    %185 = vector.shape_cast %184 : vector<8x4xf32> to vector<1x8x4xf32>
    %186 = arith.truncf %185 : vector<1x8x4xf32> to vector<1x8x4xbf16>
    %187 = vector.extract_strided_slice %5 {offsets = [0, 28], sizes = [8, 4], strides = [1, 1]} : vector<8x32xf32> to vector<8x4xf32>
    %188 = vector.shape_cast %187 : vector<8x4xf32> to vector<1x8x4xf32>
    %189 = arith.truncf %188 : vector<1x8x4xf32> to vector<1x8x4xbf16>
    %190 = vector.extract_strided_slice %2 {offsets = [0, 28], sizes = [8, 4], strides = [1, 1]} : vector<8x32xf32> to vector<8x4xf32>
    %191 = vector.shape_cast %190 : vector<8x4xf32> to vector<1x8x4xf32>
    %192 = arith.truncf %191 : vector<1x8x4xf32> to vector<1x8x4xbf16>
    "tpu.trace_start"() <{level = 10 : i32, message = "bqd,bkd->bqk"}> : () -> ()
    %cst_49 = arith.constant dense<0.000000e+00> : vector<1x8x8xf32>
    %193 = tpu.matmul %186, %189, %cst_49 {dimension_numbers = #tpu.dot_dimension_numbers<[2], [2], [1], [1], [0, 0, 0, 1, 1, 1], [0], [0]>} : vector<1x8x4xbf16>, vector<1x8x4xbf16>, vector<1x8x8xf32> -> vector<1x8x8xf32>
    "tpu.trace_stop"() : () -> ()
    %cst_50 = arith.constant dense<0xFF800000> : vector<1x8xf32>
    %194 = vector.multi_reduction <maximumf>, %193, %cst_50 [2] : vector<1x8x8xf32> to vector<1x8xf32>
    %195 = vector.shape_cast %194 : vector<1x8xf32> to vector<1x8x1xf32>
    %196 = vector.broadcast %195 : vector<1x8x1xf32> to vector<1x8x8xf32>
    %197 = arith.subf %193, %196 : vector<1x8x8xf32>
    %198 = math.exp %197 : vector<1x8x8xf32>
    %cst_51 = arith.constant dense<0.000000e+00> : vector<1x8xf32>
    %199 = vector.multi_reduction <add>, %198, %cst_51 [2] : vector<1x8x8xf32> to vector<1x8xf32>
    %200 = vector.shape_cast %199 : vector<1x8xf32> to vector<1x8x1xf32>
    %201 = tpu.reciprocal %200 {approx = true} : vector<1x8x1xf32> -> vector<1x8x1xf32>
    %202 = vector.broadcast %201 : vector<1x8x1xf32> to vector<1x8x8xf32>
    %203 = arith.mulf %198, %202 : vector<1x8x8xf32>
    %204 = arith.truncf %203 : vector<1x8x8xf32> to vector<1x8x8xbf16>
    "tpu.trace_start"() <{level = 10 : i32, message = "bqk,bkd->bqd"}> : () -> ()
    %cst_52 = arith.constant dense<0.000000e+00> : vector<1x8x4xf32>
    %205 = tpu.matmul %204, %192, %cst_52 {dimension_numbers = #tpu.dot_dimension_numbers<[2], [1], [1], [2], [0, 0, 0, 1, 1, 2], [0], [0]>} : vector<1x8x8xbf16>, vector<1x8x4xbf16>, vector<1x8x4xf32> -> vector<1x8x4xf32>
    "tpu.trace_stop"() : () -> ()
    %206 = vector.shape_cast %205 : vector<1x8x4xf32> to vector<8x4xf32>
    %207 = arith.truncf %206 : vector<8x4xf32> to vector<8x4xbf16>
    %c0_53 = arith.constant 0 : index
    %c28 = arith.constant 28 : index
    %208 = vector.load %arg10[%c0_53, %c28] : memref<8x32xbf16, #tpu.memory_space<vmem>>, vector<8x4xbf16>
    tpu.vector_store %arg10[%c0_53, %c28], %207 {strides = array<i32>} : memref<8x32xbf16, #tpu.memory_space<vmem>>, vector<8x4xbf16>,
    %c0_54 = arith.constant 0 : index
    %c0_55 = arith.constant 0 : index
    %209 = vector.load %arg10[%c0_54, %c0_55] : memref<8x32xbf16, #tpu.memory_space<vmem>>, vector<8x32xbf16>
    %c0_56 = arith.constant 0 : index
    %c0_57 = arith.constant 0 : index
    %210 = vector.load %arg7[%c0_56, %c0_57] : memref<32x32xbf16, #tpu.memory_space<vmem>>, vector<32x32xbf16>
    %cst_58 = arith.constant dense<0.000000e+00> : vector<8x32xf32>
    %211 = tpu.matmul %209, %210, %cst_58 {dimension_numbers = #tpu.dot_dimension_numbers<[1], [0], [0], [1], [0, 0, 1, 1], [], []>} : vector<8x32xbf16>, vector<32x32xbf16>, vector<8x32xf32> -> vector<8x32xf32>
    %c0_59 = arith.constant 0 : index
    %c0_60 = arith.constant 0 : index
    %212 = vector.load %arg8[%c0_59, %c0_60] : memref<1x32xf32, #tpu.memory_space<vmem>>, vector<1x32xf32>
    %213 = vector.broadcast %212 : vector<1x32xf32> to vector<8x32xf32>
    %214 = arith.addf %211, %213 : vector<8x32xf32>
    %c0_61 = arith.constant 0 : index
    %c0_62 = arith.constant 0 : index
    %215 = vector.load %arg9[%c0_61, %c0_62] : memref<8x32xf32, #tpu.memory_space<vmem>>, vector<8x32xf32>
    tpu.vector_store %arg9[%c0_61, %c0_62], %214 {strides = array<i32>} : memref<8x32xf32, #tpu.memory_space<vmem>>, vector<8x32xf32>,
    return
  }
  func.func @transform_0(%arg0: i32) -> (i32, i32) {
    %c0_i32 = arith.constant 0 : i32
    %c0_i32_0 = arith.constant 0 : i32
    return %arg0, %c0_i32 : i32, i32
  }
  func.func @transform_1(%arg0: i32) -> (i32, i32) {
    %c0_i32 = arith.constant 0 : i32
    %c0_i32_0 = arith.constant 0 : i32
    return %arg0, %c0_i32 : i32, i32
  }
  func.func @transform_2(%arg0: i32) -> (i32, i32) {
    %c0_i32 = arith.constant 0 : i32
    %c0_i32_0 = arith.constant 0 : i32
    return %arg0, %c0_i32 : i32, i32
  }
  func.func @transform_3(%arg0: i32) -> (i32, i32) {
    %c0_i32 = arith.constant 0 : i32
    %c0_i32_0 = arith.constant 0 : i32
    %c0_i32_1 = arith.constant 0 : i32
    return %c0_i32, %c0_i32_0 : i32, i32
  }
  func.func @transform_4(%arg0: i32) -> (i32, i32) {
    %c0_i32 = arith.constant 0 : i32
    %c0_i32_0 = arith.constant 0 : i32
    %c0_i32_1 = arith.constant 0 : i32
    return %c0_i32, %c0_i32_0 : i32, i32
  }
  func.func @transform_5(%arg0: i32) -> (i32, i32) {
    %c0_i32 = arith.constant 0 : i32
    %c0_i32_0 = arith.constant 0 : i32
    %c0_i32_1 = arith.constant 0 : i32
    return %c0_i32, %c0_i32_0 : i32, i32
  }
  func.func @transform_6(%arg0: i32) -> (i32, i32) {
    %c0_i32 = arith.constant 0 : i32
    %c0_i32_0 = arith.constant 0 : i32
    %c0_i32_1 = arith.constant 0 : i32
    return %c0_i32, %c0_i32_0 : i32, i32
  }
  func.func @transform_7(%arg0: i32) -> (i32, i32) {
    %c0_i32 = arith.constant 0 : i32
    %c0_i32_0 = arith.constant 0 : i32
    %c0_i32_1 = arith.constant 0 : i32
    return %c0_i32, %c0_i32_0 : i32, i32
  }
  func.func @transform_8(%arg0: i32) -> (i32, i32) {
    %c0_i32 = arith.constant 0 : i32
    %c0_i32_0 = arith.constant 0 : i32
    return %arg0, %c0_i32 : i32, i32
  }
}

</mosaic_0001>

<bundles_post_ra>
// kernel: tpu_custom_call.1
= control target key start
LH: loop header
LB: loop body
LE: loop exit
PB: predicated region body
PF: predicated region fallthrough
CT: control target
= control target key end

     0   :  { %s3021_s0 = inlined_call_operand.hbm [shape: bf16[16,32], index: 0, kind: input, shape index: {}]   ;;  %s3022_s1 = inlined_call_operand.hbm [shape: bf16[16,32], index: 1, kind: input, shape index: {}]   ;;  %s3023_s2 = inlined_call_operand.hbm [shape: bf16[16,32], index: 2, kind: input, shape index: {}]   ;;  %s3024_s3 = inlined_call_operand.hbm [shape: bf16[32,32], index: 3, kind: input, shape index: {}]   ;;  %s3025_s4 = inlined_call_operand.hbm [shape: bf16[32,32], index: 4, kind: input, shape index: {}]   ;;  %s3026_s5 = inlined_call_operand.vmem [shape: bf16[32,32], index: 5, kind: input, shape index: {}]   ;;  %s3027_s6 = inlined_call_operand.hbm [shape: bf16[32,32], index: 6, kind: input, shape index: {}]   ;;  %s3028_s7 = inlined_call_operand.vmem [shape: f32[1,32], index: 7, kind: input, shape index: {}]   ;;  %s3029_s8 = inlined_call_operand.hbm [shape: f32[16,32], index: 8, kind: output, shape index: {}]  }
   0x1   :  { %3055 = sst [smem:[#allocation26_spill]] %s3022_s1 }
   0x2   :  { %3056 = sst [smem:[#allocation27_spill]] %s3024_s3 }
   0x3   :  { %3057 = sst [smem:[#allocation28_spill]] %s3029_s8 }
   0x4   :  { %13 = vsyncpa [#allocation4], 0 }
   0x5   :  { %15 = vsyncpa [#allocation4 + $0x1], 0 }
   0x6   :  { %16 = vsyncpa [#allocation7], 0 }
   0x7   :  { %18 = vsyncpa [#allocation7 + $0x1], 0 }
   0x8   :  { %19 = vsyncpa [#allocation10], 0 }
   0x9   :  { %20 = vsyncpa [#allocation13], 0 }
   0xa   :  { %21 = vsyncpa [#allocation5], 0 }
   0xb   :  { %23 = vsyncpa [#allocation5 + $0x1], 0  ;;  %s2499_s27 = smov 0   ;;  %s2501_s28 = smov 0  }
   0xc   :  { %s2503_s29 = smov 0   ;;  %s2505_s30 = smov 0  }
   0xd LB: > { %3058 = sst [smem:[#allocation20_spill]] %s2415_s27  ;;  %s2520_s9 = sadd.s32 4294967295, %s2427_s30   ;;  %s2427_s30 = sphi %s2505_s30, %s3097_s30   ;;  %s2423_s29 = sphi %s2503_s29, %s3101_s29   ;;  %s2419_s28 = sphi %s2501_s28, %s3100_s28   ;;  %s2415_s27 = sphi %s2499_s27, %s3099_s27  }
   0xe   : > { %3059 = sst [smem:[#allocation21_spill]] %s2427_s30  ;;  %s1791_s10 = sadd.s32 4294967294, %s2427_s30  }
   0xf   : > { %p49_p0 = scmp.ne.s32.totalorder %s2419_s28, %s2415_s27  ;;  %p3030_p1 = scmp.eq.s32.totalorder %s2520_s9, 0 }
  0x10   : > { %p236_p3 = scmp.eq.s32.totalorder %s1791_s10, 1  ;;  %p1792_p5 = scmp.ge.s32.totalorder %s2427_s30, 1 }
  0x11   : > { %p2529_p4 = por %p3030_p1, %p49_p0  ;;  %p243_p7 = scmp.lt.s32.totalorder %s2427_s30, 3 }
  0x12   : > { %p2534_p6 = por %p236_p3, %p49_p0  ;;  %s2429_s14 = smov [#allocation9]  }
  0x13   : > { %s3060_s11 = scalar_select %p2529_p4, 1, 0 }
  0x14   : > { %s3061_s12 = scalar_select %p2534_p6, 1, 0 }
  0x15   : > { %p2539_p8 = pnand %p1792_p5, %p243_p7  ;;  %s255_s15 = sshll.u32 %s2429_s14, 4  ;;  %s2543_s15 = int_to_ptr.vmem [resolvable:$true] %s255_s15 }
  0x16   : > { %3062 = sst [smem:[#allocation22_spill]] %s3061_s12  ;;  %s2555_s17 = sadd.s32 1, %s2427_s30  }
  0x17   : > { %s3063_s13 = scalar_select %p2539_p8, 1, 0 }
  0x18   : > { %p2050_p9 = pneg %p2539_p8  ;;  %3065 = sst [smem:[#allocation23_spill]] %s2555_s17 }
  0x19   : > { %s36_s18 = sadd.s32 1, %s2423_s29  ;;  %s33_s19 = ssub.s32 %s2427_s30, %s2555_s17 }
  0x1a   : > { %p2550_p11 = pnand %p2050_p9, %p3030_p1  ;;  %s3066_s3 = sld [smem:[#allocation27_spill]] }
  0x1c   : > { %s3064_s16 = scalar_select %p2550_p11, 1, 0 }
  0x1d   : > { %p2568_p13 = pneg %p2550_p11 }
  0x1f   : > { %s3067_s25 = scalar_select %p2568_p13, 1, 0 }
  0x20   : > { %s2175_s22 = scalar_lea.hbm %s3066_s3, 256 }
  0x21   : > { %p2176_p12 = scmp.ne.s32.totalorder %s3066_s3, %s2175_s22  ;;  %p2182_p5 = scmp.lt.u32.totalorder %s2175_s22, %s3066_s3 }
  0x23   : > { %p2178_p0 = pnand %p2568_p13, %p2176_p12 }
  0x25   : > { %p2179_p3 = pneg %p2178_p0 }
  0x27   : > { %p2184_p7 = pnand %p2182_p5, %p2179_p3 }
  0x29   : > { %2187 = shalt.err (!%p2184_p7)
}
  0x2a   : > { %s2188_s14 = scalar_lea.vmem %s2543_s15, 256  ;;  %p2196_p2 = scmp.lt.s32.totalorder %s2543_s15, %s2543_s15 }
  0x2b   : > { %p2189_p9 = scmp.ne.s32.totalorder %s2543_s15, %s2188_s14  ;;  %p2197_p6 = scmp.lt.s32.totalorder %s2188_s14, %s2188_s14 }
  0x2d   : > { %p2191_p10 = pnand %p2189_p9, %p2568_p13  ;;  %p2198_p12 = por %p2197_p6, %p2196_p2 }
  0x2f   : > { %p2192_p1 = pneg %p2191_p10 }
  0x31   : > { %p2199_p0 = pnand %p2198_p12, %p2192_p1 }
  0x33   : > { %2202 = shalt.err (!%p2199_p0)
}
  0x34   : > { %s3033_s20 = smov 64   ;;  %s3035_s21 = smov 4  }
  0x35   : > { %2053 = dma.hbm_to_vmem [thread:$0]  (!%p2550_p11), %s3066_s3, 256, %s2543_s15, [#allocation10], %s3033_s20, %s3033_s20, %s3035_s21  }
  0x36   : > { %p34_p1 = scmp.eq.s32.totalorder %s33_s19, 0  ;;  %p43_p2 = scmp.ne.s32.totalorder %s2423_s29, %s2419_s28 }
  0x37   : > { %p44_p6 = scmp.eq.s32.totalorder %s2427_s30, 0  ;;  %p2077_p10 = scmp.lt.s32.totalorder %s2427_s30, 2 }
  0x38   : > { %s2597_s24 = scalar_select %p34_p1, %s2423_s29, %s36_s18  }
  0x39   : > { %p45_p3 = por %p44_p6, %p43_p2  ;;  %p3069_p5 = scmp.eq.s32.totalorder %s2520_s9, 1 }
  0x3a   : > { %3068 = sst [smem:[#allocation24_spill]] %s2597_s24  ;;  %s3037_s10 = sand.u32 1, %s2423_s29  }
  0x3b   : > { %p2601_p7 = por %p3069_p5, %p43_p2  ;;  %s2607_s14 = sshll.u32 %s2427_s30, 6 }
  0x3c   : > { %s2611_s17 = sshll.u32 %s3037_s10, 2  ;;  %p2613_p9 = pnand %p2077_p10, %p45_p3 }
  0x3d   : > { %s3070_s26 = scalar_select %p2601_p7, 1, 0 }
  0x3e   : > { %s3072_s15 = scalar_select %p2613_p9, 1, 0 }
  0x3f   : > { %3071 = sst [smem:[#allocation25_spill]] %s3070_s26  ;;  %s319_s18 = sand.u32 1, %s2427_s30  }
  0x40   : > { %s3073_s1 = sld [smem:[#allocation26_spill]]  ;;  %s323_s20 = scalar_lea.vmem [#allocation6], %s2611_s17 }
  0x41   : > { %s330_s21 = sshll.u32 %s323_s20, 4  ;;  %s2627_s10 = scalar_lea.sflag [#allocation7], %s319_s18  ;;  %s2625_s21 = int_to_ptr.vmem [resolvable:$true] %s330_s21 }
  0x42   : > { %p2633_p0 = pneg %p2613_p9 }
  0x44   : > { %s3074_s24 = scalar_select %p2633_p0, 1, 0 }
  0x46   : > { %s2622_s23 = scalar_lea.hbm %s3073_s1, %s2607_s14  ;;  %s2208_s30 = scalar_lea.hbm %s3073_s1, 128 }
  0x47   : > { %s2203_s3 = scalar_lea.hbm %s2622_s23, 64  ;;  %p2209_p6 = scmp.lt.u32.totalorder %s2622_s23, %s3073_s1 }
  0x48   : > { %p2204_p12 = scmp.ne.s32.totalorder %s2622_s23, %s2203_s3  ;;  %p2210_p10 = scmp.lt.u32.totalorder %s2208_s30, %s2203_s3 }
  0x49   : > { %p2212_p5 = scmp.lt.u32.totalorder %s2203_s3, %s2622_s23 }
  0x4a   : > { %p2206_p1 = pnand %p2633_p0, %p2204_p12  ;;  %p2211_p3 = por %p2210_p10, %p2209_p6 }
  0x4c   : > { %p2207_p2 = pneg %p2206_p1  ;;  %p2213_p7 = por %p2212_p5, %p2211_p3 }
  0x4e   : > { %p2214_p4 = pnand %p2213_p7, %p2207_p2 }
  0x50   : > { %2217 = shalt.err (!%p2214_p4)
}
  0x51   : > { %s2218_s18 = scalar_lea.vmem %s2625_s21, 64  ;;  %s2432_s19 = smov [#allocation6]  }
  0x52   : > { %p2219_p12 = scmp.ne.s32.totalorder %s2625_s21, %s2218_s18  ;;  %s2223_s22 = sshll.u32 %s2432_s19, 4  ;;  %s2224_s22 = int_to_ptr.vmem [resolvable:$false] %s2223_s22 }
  0x53   : > { %s2225_s12 = scalar_lea.vmem %s2224_s22, 128  ;;  %p2226_p11 = scmp.lt.s32.totalorder %s2625_s21, %s2224_s22 }
  0x54   : > { %p2221_p1 = pnand %p2219_p12, %p2633_p0  ;;  %p2227_p13 = scmp.lt.s32.totalorder %s2225_s12, %s2218_s18 }
  0x56   : > { %p2222_p8 = pneg %p2221_p1  ;;  %p2228_p6 = por %p2227_p13, %p2226_p11 }
  0x58   : > { %p2229_p10 = pnand %p2228_p6, %p2222_p8 }
  0x5a   : > { %2232 = shalt.err (!%p2229_p10)
}
  0x5b   : > { %2066 = dma.hbm_to_vmem [thread:$0]  (!%p2613_p9), %s2622_s23, 64, %s2625_s21, %s2627_s10  }
  0x5c   : > { %s2433_s3 = smov [#allocation11]   ;;  %s2434_s20 = smov [#allocation12]  }
  0x5d   : > { %s268_s30 = sshll.u32 %s2433_s3, 4  ;;  %s284_s1 = sshll.u32 %s2434_s20, 4  ;;  %s269_s30 = int_to_ptr.vmem [resolvable:$true] %s268_s30  ;;  %s285_s1 = int_to_ptr.vmem [resolvable:$true] %s284_s1 }
  0x5e   : > { %s2233_s22 = scalar_lea.hbm %s3025_s4, 256  ;;  %p3075_p8 = scmp.ne.s32.totalorder %s3067_s25, 0 }
  0x5f   : > { %p2234_p4 = scmp.ne.s32.totalorder %s3025_s4, %s2233_s22  ;;  %p2240_p7 = scmp.lt.u32.totalorder %s2233_s22, %s3025_s4 }
  0x61   : > { %p2236_p11 = pnand %p2234_p4, %p3075_p8 }
  0x63   : > { %p2237_p13 = pneg %p2236_p11 }
  0x65   : > { %p2242_p2 = pnand %p2240_p7, %p2237_p13 }
  0x67   : > { %2245 = shalt.err (!%p2242_p2)
}
  0x68   : > { %s2246_s21 = scalar_lea.vmem %s269_s30, 256  ;;  %p2254_p1 = scmp.lt.s32.totalorder %s269_s30, %s269_s30 }
  0x69   : > { %p2247_p3 = scmp.ne.s32.totalorder %s269_s30, %s2246_s21  ;;  %p2255_p6 = scmp.lt.s32.totalorder %s2246_s21, %s2246_s21 }
  0x6b   : > { %p2249_p5 = pnand %p2247_p3, %p3075_p8  ;;  %p2256_p10 = por %p2255_p6, %p2254_p1 }
  0x6d   : > { %p2250_p12 = pneg %p2249_p5 }
  0x6f   : > { %p2257_p9 = pnand %p2256_p10, %p2250_p12 }
  0x71   : > { %2260 = shalt.err (!%p2257_p9)
}
  0x72   : > { %p3076_p4 = scmp.ne.s32.totalorder %s3064_s16, 0  ;;  %s3077_s27 = smov 4  }
  0x73   : > { %s3078_s23 = smov 64   ;;  %s2261_s19 = scalar_lea.hbm %s3027_s6, 256 }
  0x74   : > { %2056 = dma.hbm_to_vmem [thread:$0]  (!%p3076_p4), %s3025_s4, 256, %s269_s30, [#allocation10], %s3078_s23, %s3078_s23, %s3077_s27  }
  0x75   : > { %p2262_p11 = scmp.ne.s32.totalorder %s3027_s6, %s2261_s19  ;;  %p2268_p7 = scmp.lt.u32.totalorder %s2261_s19, %s3027_s6 }
  0x77   : > { %p2264_p9 = pnand %p2262_p11, %p3075_p8 }
  0x79   : > { %p2265_p13 = pneg %p2264_p9 }
  0x7b   : > { %p2270_p2 = pnand %p2268_p7, %p2265_p13 }
  0x7d   : > { %2273 = shalt.err (!%p2270_p2)
}
  0x7e   : > { %s2274_s8 = scalar_lea.vmem %s285_s1, 256  ;;  %p2282_p1 = scmp.lt.s32.totalorder %s285_s1, %s285_s1 }
  0x7f   : > { %p2275_p3 = scmp.ne.s32.totalorder %s285_s1, %s2274_s8  ;;  %p2283_p6 = scmp.lt.s32.totalorder %s2274_s8, %s2274_s8 }
  0x81   : > { %p2277_p5 = pnand %p2275_p3, %p3075_p8  ;;  %p2284_p10 = por %p2283_p6, %p2282_p1 }
  0x83   : > { %p2278_p12 = pneg %p2277_p5 }
  0x85   : > { %p2285_p0 = pnand %p2284_p10, %p2278_p12 }
  0x87   : > { %2288 = shalt.err (!%p2285_p0)
}
  0x88   : > { %2059 = dma.hbm_to_vmem [thread:$0]  (!%p3076_p4), %s3027_s6, 256, %s285_s1, [#allocation13], %s3078_s23, %s3078_s23, %s3077_s27  }
  0x89   : > { %s2703_s20 = scalar_lea.hbm %s3021_s0, %s2607_s14  ;;  %s305_s16 = scalar_lea.vmem [#allocation3], %s2611_s17 }
  0x8a   : > { %s312_s19 = sshll.u32 %s305_s16, 4  ;;  %s2712_s12 = scalar_lea.hbm %s3023_s2, %s2607_s14  ;;  %s2706_s19 = int_to_ptr.vmem [resolvable:$true] %s312_s19 }
  0x8b   : > { %s3079_s21 = sand.u32 1, %s2423_s29   ;;  %s2289_s27 = scalar_lea.hbm %s2703_s20, 64 }
  0x8c   : > { %s302_s1 = scalar_lea.sflag [#allocation4], %s3079_s21  ;;  %p2290_p0 = scmp.ne.s32.totalorder %s2703_s20, %s2289_s27 }
  0x8d   : > { %p3080_p8 = scmp.ne.s32.totalorder %s3074_s24, 0  ;;  %s2294_s30 = scalar_lea.hbm %s3021_s0, 128 }
  0x8e   : > { %p2295_p9 = scmp.lt.u32.totalorder %s2703_s20, %s3021_s0  ;;  %p2296_p13 = scmp.lt.u32.totalorder %s2294_s30, %s2289_s27 }
  0x8f   : > { %p2292_p4 = pnand %p2290_p0, %p3080_p8  ;;  %p2298_p2 = scmp.lt.u32.totalorder %s2289_s27, %s2703_s20 }
  0x90   : > { %p2297_p7 = por %p2296_p13, %p2295_p9 }
  0x91   : > { %p2293_p11 = pneg %p2292_p4 }
  0x92   : > { %p2299_p3 = por %p2298_p2, %p2297_p7 }
  0x94   : > { %p2300_p5 = pnand %p2299_p3, %p2293_p11 }
  0x96   : > { %2303 = shalt.err (!%p2300_p5)
}
  0x97   : > { %s2304_s14 = scalar_lea.vmem %s2706_s19, 64  ;;  %s2435_s3 = smov [#allocation3]  }
  0x98   : > { %p2305_p12 = scmp.ne.s32.totalorder %s2706_s19, %s2304_s14  ;;  %s2309_s16 = sshll.u32 %s2435_s3, 4  ;;  %s2310_s16 = int_to_ptr.vmem [resolvable:$false] %s2309_s16 }
  0x99   : > { %s2311_s22 = scalar_lea.vmem %s2310_s16, 128  ;;  %p2312_p10 = scmp.lt.s32.totalorder %s2706_s19, %s2310_s16 }
  0x9a   : > { %p2307_p1 = pnand %p2305_p12, %p3080_p8  ;;  %p2313_p0 = scmp.lt.s32.totalorder %s2311_s22, %s2304_s14 }
  0x9c   : > { %p2308_p6 = pneg %p2307_p1  ;;  %p2314_p4 = por %p2313_p0, %p2312_p10 }
  0x9e   : > { %p2315_p9 = pnand %p2314_p4, %p2308_p6 }
  0xa0   : > { %2318 = shalt.err (!%p2315_p9)
}
  0xa1   : > { %p3081_p11 = scmp.ne.s32.totalorder %s3072_s15, 0  ;;  %s341_s18 = scalar_lea.vmem [#allocation8], %s2611_s17 }
  0xa2   : > { %s348_s21 = sshll.u32 %s341_s18, 4  ;;  %s2319_s27 = scalar_lea.hbm %s2712_s12, 64  ;;  %s349_s21 = int_to_ptr.vmem [resolvable:$true] %s348_s21 }
  0xa3   : > { %2063 = dma.hbm_to_vmem [thread:$0]  (!%p3081_p11), %s2703_s20, 64, %s2706_s19, %s302_s1  }
  0xa4   : > { %p2320_p13 = scmp.ne.s32.totalorder %s2712_s12, %s2319_s27  ;;  %s2324_s30 = scalar_lea.hbm %s3023_s2, 128 }
  0xa5   : > { %p2325_p3 = scmp.lt.u32.totalorder %s2712_s12, %s3023_s2  ;;  %p2326_p5 = scmp.lt.u32.totalorder %s2324_s30, %s2319_s27 }
  0xa6   : > { %p2322_p7 = pnand %p2320_p13, %p3080_p8  ;;  %p2328_p1 = scmp.lt.u32.totalorder %s2319_s27, %s2712_s12 }
  0xa7   : > { %p2327_p12 = por %p2326_p5, %p2325_p3 }
  0xa8   : > { %p2323_p2 = pneg %p2322_p7 }
  0xa9   : > { %p2329_p6 = por %p2328_p1, %p2327_p12 }
  0xab   : > { %p2330_p10 = pnand %p2329_p6, %p2323_p2 }
  0xad   : > { %2333 = shalt.err (!%p2330_p10)
}
  0xae   : > { %s2334_s17 = scalar_lea.vmem %s349_s21, 64  ;;  %s2436_s20 = smov [#allocation8]  }
  0xaf   : > { %p2335_p0 = scmp.ne.s32.totalorder %s349_s21, %s2334_s17  ;;  %s2339_s19 = sshll.u32 %s2436_s20, 4  ;;  %s2340_s19 = int_to_ptr.vmem [resolvable:$false] %s2339_s19 }
  0xb0   : > { %s2341_s1 = scalar_lea.vmem %s2340_s19, 128  ;;  %p2342_p13 = scmp.lt.s32.totalorder %s349_s21, %s2340_s19 }
  0xb1   : > { %p2337_p4 = pnand %p2335_p0, %p3080_p8  ;;  %p2343_p7 = scmp.lt.s32.totalorder %s2341_s1, %s2334_s17 }
  0xb3   : > { %p2338_p9 = pneg %p2337_p4  ;;  %p2344_p11 = por %p2343_p7, %p2342_p13 }
  0xb5   : > { %p2345_p3 = pnand %p2344_p11, %p2338_p9 }
  0xb7   : > { %2348 = shalt.err (!%p2345_p3)
}
  0xb8   : > { %p3082_p5 = scmp.ne.s32.totalorder %s3072_s15, 0  ;;  %p3083_p2 = scmp.ne.s32.totalorder %s3063_s13, 0 }
  0xb9   : > { %s2759_s24 = sand.u32 (!%p3083_p2), 1, %s2419_s28   ;;  %p3084_p8 = scmp.ne.s32.totalorder (!%p3083_p2), %s3060_s11, 0 }
  0xba   : > { %2069 = dma.hbm_to_vmem [thread:$0]  (!%p3082_p5), %s2712_s12, 64, %s349_s21, %s2627_s10  }
  0xbb   : > { %357 = sbr.rel (%p3083_p2) target bundleno = 1729 (0x6c1), region = 52  ;;  %s2762_s14 = sshll.u32 (!%p3083_p2), %s2759_s24, 2 }
  0xbc   : > { %s360_s3 = scalar_lea.sflag (!%p3083_p2), [#allocation4], %s2759_s24  ;;  %s363_s16 = scalar_lea.vmem (!%p3083_p2), [#allocation3], %s2762_s14 }
  0xc2   : > { %2394 = dma.done.wait (%p3084_p8), %s360_s3, 64  }
  0xc3   : > { %2396 = vsyncadd (%p3084_p8), %s360_s3, 4294967232  ;;  %s368_s13 = sand.u32 1, %s2520_s9   ;;  %s372_s15 = scalar_lea.vmem [#allocation6], %s2762_s14 }
  0xc4   : > { %s369_s10 = scalar_lea.sflag [#allocation7], %s368_s13 }
  0xc5   : > { %2398 = dma.done.wait (%p3084_p8), %s369_s10, 128  }
  0xc6   : > { %2400 = vsyncadd (%p3084_p8), %s369_s10, 4294967168  ;;  %s381_s12 = scalar_lea.vmem [#allocation8], %s2762_s14  ;;  %p3085_p11 = scmp.eq.s32.totalorder %s2520_s9, 0 }
  0xc8   : > { %2402 = dma.done.wait (%p3085_p11), [#allocation10], 512   ;;  %p3086_p12 = pmov %p3085_p11 }
  0xc9   : > { %p3087_p1 = pmov %p3085_p11 }
  0xca   : > { %2404 = vsyncadd (%p3086_p12), [#allocation10], 4294966784 }
  0xcb   : > { %2406 = dma.done.wait (%p3087_p1), [#allocation13], 256   ;;  %p3088_p6 = pmov %p3087_p1 }
  0xcc   : > { %v2437_v0 = vmov 0.0   ;;  %vm2438_vm0 = vmmov 0   ;;  %v2135_v1 = vld [vmem:[#allocation9] sm:$0xff]   ;;  %v2136_v2 = vld [vmem:[#allocation11] sm:$0xff]   ;;  %v2137_v3 = vld [vmem:[#allocation9 + $0x8] sm:$0xff]   ;;  %vm454_vm1 = vcmask 261120  }
  0xcd   : > { %2408 = vsyncadd (%p3088_p6), [#allocation13], 4294967040  ;;  %1902 = vmatprep.subr.bf16.mxu0 %v2437_v0  ;;  %1910 = vmatprep.subr.bf16.mxu1 %v2437_v0  ;;  %v2138_v4 = vld [vmem:[#allocation11 + $0x8] sm:$0xff]   ;;  %v437_v5 = vld [vmem:[%s363_s16] sm:$0xf]  ;;  %vm684_vm2 = vcmask 1043456  }
  0xce   : > { %1906 = vmatprep.mubr.msk.bf16.mxu0 %vm2438_vm0, %v2437_v0  ;;  %1914 = vmatprep.mubr.msk.bf16.mxu1 %vm2438_vm0, %v2437_v0  ;;  %v498_v6 = vld [vmem:[%s372_s15] sm:$0xf]  ;;  %v2140_v8 = vld [vmem:[%s3026_s5 + $0x8] sm:$0xff]   ;;  %vm621_vm3 = vcmask 31744   ;;  %s2439_s27 = smov 120   ;;  %s2440_s23 = smov 124  }
  0xcf   : > { %1903 = vmatpush3.bf16.msra.mxu0 %v2135_v1  ;;  %1911 = vmatpush3.bf16.msra.mxu1 %v2136_v2  ;;  %v2139_v7 = vld [vmem:[%s3026_s5] sm:$0xff]   ;;  %s2441_s8 = smov 116   ;;  %s2442_s30 = smov 112   ;;  %vm668_vm4 = vcmask 64512   ;;  %vm729_vm5 = vcmask 27648   ;;  %vm851_vm6 = vcmask 60448  }
  0xd0   : > { %1904 = vmatprep.subr.bf16.mxu0 %v2437_v0  ;;  %1912 = vmatprep.subr.bf16.mxu1 %v2437_v0  ;;  %v558_v9 = vld [vmem:[%s381_s12] sm:$0xf]  ;;  %s2443_s26 = smov 108   ;;  %s2444_s25 = smov 104   ;;  %vm970_vm7 = vcmask 93248   ;;  %vm1089_vm8 = vcmask 126048  }
  0xd1   : > { %s2445_s17 = smov 100   ;;  %s2446_s20 = smov 4   ;;  %vm1208_vm9 = vcmask 158848   ;;  %vm1327_vm10 = vcmask 191648   ;;  %vm1446_vm11 = vcmask 224448   ;;  %vm1565_vm12 = vcmask 257248  }
  0xd2   : > { %s2447_s19 = smov 8   ;;  %s2448_s1 = smov 12  }
  0xd3   : > { %1905 = vmatpush3.bf16.msra.mxu0 %v2137_v3  ;;  %1913 = vmatpush3.bf16.msra.mxu1 %v2138_v4  ;;  %s2449_s14 = smov 16   ;;  %s2450_s3 = smov 20  }
  0xd4   : > { %1918 = vmatprep.subr.bf16.mxu0 %v2437_v0  ;;  %1926 = vmatprep.subr.bf16.mxu1 %v2437_v0  ;;  %s2451_s16 = smov 24   ;;  %s2452_s13 = smov 28  }
  0xd5   : > { %s1810_s10 = sshll.u32 %s2759_s24, 3  ;;  %s3089_s11 = sld [smem:[#allocation25_spill]] }
  0xd6   : > { %1907 = vmatmul.mubr.msk.bf16.vlgmr.msra.gmra.mrb[0].mxu0 %vm454_vm1, %v437_v5  ;;  %1915 = vmatmul.mubr.msk.bf16.vlgmr.msra.gmra.mrb[0].mxu1 %vm454_vm1, %v498_v6  ;;  %s1848_s22 = sshll.u32 %s2520_s9, 7  ;;  %s435_s18 = scalar_lea.vmem [#allocation14], %s1810_s10 }
  0xd7   : > { %1919 = vmatpush3.bf16.msra.mxu0 %v2139_v7  ;;  %1922 = vmatprep.mubr.msk.bf16.mxu0 %vm2438_vm0, %v2437_v0  ;;  %s1649_s21 = sshll.u32 %s435_s18, 4  ;;  %s1636_s9 = scalar_lea.sflag [#allocation5], %s2759_s24  ;;  %s2978_s21 = int_to_ptr.vmem [resolvable:$true] %s1649_s21 }
  0xd8   : > { %1920 = vmatprep.subr.bf16.mxu0 %v2437_v0  ;;  %1928 = vmatprep.mubr.msk.bf16.mxu1 %vm2438_vm0, %v2437_v0 }
  0xdb   : > { %1921 = vmatpush3.bf16.msra.mxu0 %v2140_v8  ;;  %p3091_p0 = scmp.ne.s32.totalorder %s3089_s11, 0 }
  0xdc   : > { %1932 = vmatprep.subr.bf16.mxu0 %v2437_v0 }
  0xde   : > { %1923 = vmatmul.mubr.msk.bf16.vlgmr.msra.gmra.mrb[4].mxu0 %vm454_vm1, %v558_v9 }
  0xdf   : > { %1934 = vmatprep.mubr.msk.bf16.mxu0 %vm2438_vm0, %v2437_v0 }
 0x1a9   : > { %v492_v10 = vpop.f32.mrb[0].mxu0  ;;  %v552_v12 = vpop.f32.mrb[0].mxu1 }
 0x1aa   : > { %v2814_v11 = vpack.c.bf16 %v492_v10, %v492_v10  ;;  %v1908_v13 = vpop.f32.mrb[1].mxu0  ;;  %v619_v14 = vpack.c.bf16 %v552_v12, %v552_v12  ;;  %v1916_v15 = vpop.f32.mrb[1].mxu1 }
 0x1ab   : > { %v495_v16 = vpop.f32.mrb[2].mxu0  ;;  %v555_v17 = vpop.f32.mrb[2].mxu1 }
 0x1ac   : > { %v1909_v18 = vpop.f32.mrb[3].mxu0  ;;  %v686_v19 = vsel %vm684_vm2, %v2814_v11, 0  ;;  %855 = vrot.lane.b32.xlu1 %v619_v14, %s2439_s27  ;;  %735 = vrot.lane.b32.xlu0 %v619_v14, %s2440_s23  ;;  %v1917_v20 = vpop.f32.mrb[3].mxu1  ;;  %v626_v21 = vsel %vm621_vm3, %v619_v14, 0 }
 0x1ad   : > { %1927 = vmatpush3.bf16.xpose.msra.mxu1 %v626_v21  ;;  %1933 = vmatpush3.bf16.msra.mxu0 %v686_v19 }
 0x1ae   : > { %1938 = vmatprep.subr.bf16.mxu1 %v2437_v0  ;;  %1944 = vmatprep.subr.bf16.mxu0 %v2437_v0 }
 0x1b1   : > { %v612_v22 = vpop.f32.mrb[4].mxu0 }
 0x1b2   : > { %v618_v23 = vpack.c.bf16 %v612_v22, %v612_v22  ;;  %v1924_v24 = vpop.f32.mrb[5].mxu0 }
 0x1b3   : > { %v615_v25 = vpop.f32.mrb[6].mxu0 }
 0x1b4   : > { %853 = vrot.lane.b32.xlu1 %v618_v23, %s2439_s27  ;;  %732 = vrot.lane.b32.xlu0 %v618_v23, %s2440_s23  ;;  %v1925_v26 = vpop.f32.mrb[7].mxu0 }
 0x1b5   : > { %1929 = vmatmul.mubr.msk.bf16.vlgmr.msra.gmra.mrb[4].mxu1 %vm621_vm3, %v618_v23 }
 0x1b6   : > { %1940 = vmatprep.mubr.msk.bf16.mxu1 %vm2438_vm0, %v2437_v0 }
 0x1b8   : > { %972 = vrot.lane.b32.xlu1 %v618_v23, %s2441_s8  ;;  %974 = vrot.lane.b32.xlu0 %v619_v14, %s2441_s8 }
 0x1bc   : > { %1091 = vrot.lane.b32.xlu1 %v618_v23, %s2442_s30  ;;  %1093 = vrot.lane.b32.xlu0 %v619_v14, %s2442_s30 }
 0x1c0   : > { %1210 = vrot.lane.b32.xlu1 %v618_v23, %s2443_s26  ;;  %1212 = vrot.lane.b32.xlu0 %v619_v14, %s2443_s26 }
 0x1c4   : > { %1329 = vrot.lane.b32.xlu1 %v618_v23, %s2444_s25  ;;  %1331 = vrot.lane.b32.xlu0 %v619_v14, %s2444_s25 }
 0x1c8   : > { %1448 = vrot.lane.b32.xlu1 %v618_v23, %s2445_s17  ;;  %1450 = vrot.lane.b32.xlu0 %v619_v14, %s2445_s17 }
 0x21e   : > { %v736_v27 = vpop.permute.xlu0 %735  ;;  %v856_v29 = vpop.permute.xlu1 %855 }
 0x21f   : > { %v741_v28 = vsel %vm621_vm3, %v736_v27, 0  ;;  %v861_v31 = vsel %vm621_vm3, %v856_v29, 0 }
 0x220   : > { %1939 = vmatpush3.bf16.xpose.msra.mxu1 %v741_v28 }
 0x221   : > { %1950 = vmatprep.subr.bf16.mxu1 %v2437_v0 }
 0x226   : > { %v733_v30 = vpop.permute.xlu0 %732  ;;  %v854_v33 = vpop.permute.xlu1 %853 }
 0x227   : > { %1941 = vmatmul.mubr.msk.bf16.vlgmr.msra.gmra.mrb[8].mxu1 %vm621_vm3, %v733_v30 }
 0x228   : > { %1951 = vmatpush3.bf16.xpose.msra.mxu1 %v861_v31  ;;  %1952 = vmatprep.mubr.msk.bf16.mxu1 %vm2438_vm0, %v2437_v0 }
 0x229   : > { %1962 = vmatprep.subr.bf16.mxu1 %v2437_v0 }
 0x22a   : > { %v975_v32 = vpop.permute.xlu0 %974  ;;  %v973_v36 = vpop.permute.xlu1 %972 }
 0x22b   : > { %v980_v34 = vsel %vm621_vm3, %v975_v32, 0 }
 0x22e   : > { %v1094_v35 = vpop.permute.xlu0 %1093  ;;  %v1092_v39 = vpop.permute.xlu1 %1091 }
 0x22f   : > { %1953 = vmatmul.mubr.msk.bf16.vlgmr.msra.gmra.mrb[12].mxu1 %vm621_vm3, %v854_v33  ;;  %v1099_v37 = vsel %vm621_vm3, %v1094_v35, 0 }
 0x230   : > { %1963 = vmatpush3.bf16.xpose.msra.mxu1 %v980_v34  ;;  %1964 = vmatprep.mubr.msk.bf16.mxu1 %vm2438_vm0, %v2437_v0 }
 0x231   : > { %1974 = vmatprep.subr.bf16.mxu1 %v2437_v0 }
 0x232   : > { %v1213_v38 = vpop.permute.xlu0 %1212  ;;  %v1211_v42 = vpop.permute.xlu1 %1210 }
 0x233   : > { %v1218_v40 = vsel %vm621_vm3, %v1213_v38, 0 }
 0x236   : > { %v1332_v41 = vpop.permute.xlu0 %1331  ;;  %v1330_v45 = vpop.permute.xlu1 %1329 }
 0x237   : > { %1965 = vmatmul.mubr.msk.bf16.vlgmr.msra.gmra.mrb[16].mxu1 %vm621_vm3, %v973_v36  ;;  %v1337_v43 = vsel %vm621_vm3, %v1332_v41, 0 }
 0x238   : > { %1975 = vmatpush3.bf16.xpose.msra.mxu1 %v1099_v37  ;;  %1976 = vmatprep.mubr.msk.bf16.mxu1 %vm2438_vm0, %v2437_v0 }
 0x239   : > { %1986 = vmatprep.subr.bf16.mxu1 %v2437_v0 }
 0x23a   : > { %v1451_v44 = vpop.permute.xlu0 %1450  ;;  %v1449_v47 = vpop.permute.xlu1 %1448 }
 0x23b   : > { %v1456_v46 = vsel %vm621_vm3, %v1451_v44, 0 }
 0x23f   : > { %1977 = vmatmul.mubr.msk.bf16.vlgmr.msra.gmra.mrb[20].mxu1 %vm621_vm3, %v1092_v39 }
 0x240   : > { %1987 = vmatpush3.bf16.xpose.msra.mxu1 %v1218_v40  ;;  %1988 = vmatprep.mubr.msk.bf16.mxu1 %vm2438_vm0, %v2437_v0 }
 0x241   : > { %1998 = vmatprep.subr.bf16.mxu1 %v2437_v0 }
 0x247   : > { %1989 = vmatmul.mubr.msk.bf16.vlgmr.msra.gmra.mrb[24].mxu1 %vm621_vm3, %v1211_v42 }
 0x248   : > { %1999 = vmatpush3.bf16.xpose.msra.mxu1 %v1337_v43  ;;  %2000 = vmatprep.mubr.msk.bf16.mxu1 %vm2438_vm0, %v2437_v0 }
 0x249   : > { %2010 = vmatprep.subr.bf16.mxu1 %v2437_v0 }
 0x24f   : > { %2001 = vmatmul.mubr.msk.bf16.vlgmr.msra.gmra.mrb[28].mxu1 %vm621_vm3, %v1330_v45 }
 0x250   : > { %2011 = vmatpush3.bf16.xpose.msra.mxu1 %v1456_v46  ;;  %2012 = vmatprep.mubr.msk.bf16.mxu1 %vm2438_vm0, %v2437_v0 }
 0x251   : > { %2022 = vmatprep.subr.bf16.mxu1 %v2437_v0 }
 0x257   : > { %2013 = vmatmul.mubr.msk.bf16.vlgmr.msra.gmra.mrb[32].mxu1 %vm621_vm3, %v1449_v47 }
 0x258   : > { %2026 = vmatprep.mubr.msk.bf16.mxu1 %vm2438_vm0, %v2437_v0 }
 0x288   : > { %v662_v48 = vpop.f32.mrb[4].mxu1 }
 0x289   : > { %v1930_v49 = vpop.f32.mrb[5].mxu1  ;;  %v669_v50 = vsel %vm668_vm4, %v662_v48, -inf }
 0x28a   : > { %670 = vmax.xlane.f32.xlu0 %v669_v50  ;;  %v665_v51 = vpop.f32.mrb[6].mxu1 }
 0x28b   : > { %v1931_v52 = vpop.f32.mrb[7].mxu1 }
 0x2fa   : > { %v777_v53 = vpop.f32.mrb[8].mxu1 }
 0x2fb   : > { %v1942_v54 = vpop.f32.mrb[9].mxu1  ;;  %v783_v55 = vsel %vm668_vm4, %v777_v53, -inf }
 0x2fc   : > { %784 = vmax.xlane.f32.xlu1 %v783_v55  ;;  %v780_v56 = vpop.f32.mrb[10].mxu1 }
 0x2fd   : > { %v1943_v57 = vpop.f32.mrb[11].mxu1 }
 0x302   : > { %v897_v58 = vpop.f32.mrb[12].mxu1 }
 0x303   : > { %v1954_v59 = vpop.f32.mrb[13].mxu1  ;;  %v903_v60 = vsel %vm668_vm4, %v897_v58, -inf }
 0x304   : > { %904 = vmax.xlane.f32.xlu0 %v903_v60  ;;  %v900_v61 = vpop.f32.mrb[14].mxu1 }
 0x305   : > { %v1955_v62 = vpop.f32.mrb[15].mxu1 }
 0x30a   : > { %v1016_v63 = vpop.f32.mrb[16].mxu1 }
 0x30b   : > { %v1966_v1 = vpop.f32.mrb[17].mxu1  ;;  %v1022_v2 = vsel %vm668_vm4, %v1016_v63, -inf }
 0x30c   : > { %1023 = vmax.xlane.f32.xlu0 %v1022_v2  ;;  %v1019_v3 = vpop.f32.mrb[18].mxu1 }
 0x30d   : > { %v1967_v4 = vpop.f32.mrb[19].mxu1 }
 0x312   : > { %v2877_v5 = vpop.f32.mrb[20].mxu1 }
 0x313   : > { %v1978_v6 = vpop.f32.mrb[21].mxu1  ;;  %v1141_v7 = vsel %vm668_vm4, %v2877_v5, -inf }
 0x314   : > { %1142 = vmax.xlane.f32.xlu1 %v1141_v7  ;;  %v1138_v8 = vpop.f32.mrb[22].mxu1 }
 0x315   : > { %v1979_v9 = vpop.f32.mrb[23].mxu1 }
 0x317   : > { %v671_v10 = vpop.xlane.xlu0 %670 }
 0x318   : > { %v672_v12 = vsub.f32 %v662_v48, %v671_v10 }
 0x31a   : > { %v673_v13 = vmul.f32 1.442695, %v672_v12  ;;  %v2881_v14 = vpop.f32.mrb[24].mxu1 }
 0x31b   : > { %v1990_v15 = vpop.f32.mrb[25].mxu1  ;;  %v1260_v16 = vsel %vm668_vm4, %v2881_v14, -inf }
 0x31c   : > { %2143 = vpow2.f32 %v673_v13  ;;  %1261 = vmax.xlane.f32.xlu0 %v1260_v16  ;;  %v1257_v17 = vpop.f32.mrb[26].mxu1 }
 0x31d   : > { %v1991_v18 = vpop.f32.mrb[27].mxu1 }
 0x322   : > { %v1373_v19 = vpop.f32.mrb[28].mxu1 }
 0x323   : > { %v2002_v20 = vpop.f32.mrb[29].mxu1  ;;  %v1379_v21 = vsel %vm668_vm4, %v1373_v19, -inf }
 0x324   : > { %1380 = vmax.xlane.f32.xlu1 %v1379_v21  ;;  %v1376_v22 = vpop.f32.mrb[30].mxu1 }
 0x325   : > { %v2003_v24 = vpop.f32.mrb[31].mxu1 }
 0x326   : > { %v2144_v23 = vpop.eup %2143 }
 0x327   : > { %v675_v25 = vsel %vm668_vm4, %v2144_v23, 0.0 }
 0x328   : > { %676 = vadd.xlane.f32.xlu1 %v675_v25 }
 0x32a   : > { %v1492_v26 = vpop.f32.mrb[32].mxu1 }
 0x32b   : > { %v2014_v27 = vpop.f32.mrb[33].mxu1  ;;  %v1498_v28 = vsel %vm668_vm4, %v1492_v26, -inf }
 0x32c   : > { %1499 = vmax.xlane.f32.xlu0 %v1498_v28  ;;  %v1495_v29 = vpop.f32.mrb[34].mxu1 }
 0x32d   : > { %v2015_v30 = vpop.f32.mrb[35].mxu1 }
 0x339   : > { %915 = vrot.lane.b32.xlu1 %v2814_v11, %s2439_s27 }
 0x342   : > { %796 = vrot.lane.b32.xlu0 %v2814_v11, %s2440_s23 }
 0x389   : > { %v785_v31 = vpop.xlane.xlu1 %784 }
 0x38a   : > { %v786_v32 = vsub.f32 %v777_v53, %v785_v31 }
 0x38c   : > { %v787_v33 = vmul.f32 1.442695, %v786_v32 }
 0x38e   : > { %2145 = vpow2.f32 %v787_v33 }
 0x391   : > { %v905_v34 = vpop.xlane.xlu0 %904 }
 0x392   : > { %v906_v35 = vsub.f32 %v897_v58, %v905_v34 }
 0x394   : > { %v907_v36 = vmul.f32 1.442695, %v906_v35 }
 0x396   : > { %2147 = vpow2.f32 %v907_v36 }
 0x398   : > { %v2892_v37 = vpop.eup %2145 }
 0x399   : > { %v1024_v38 = vpop.xlane.xlu0 %1023  ;;  %v789_v39 = vsel %vm668_vm4, %v2892_v37, 0.0 }
 0x39a   : > { %v1025_v40 = vsub.f32 %v1016_v63, %v1024_v38  ;;  %790 = vadd.xlane.f32.xlu0 %v789_v39 }
 0x39c   : > { %v1026_v41 = vmul.f32 1.442695, %v1025_v40 }
 0x39e   : > { %2149 = vpow2.f32 %v1026_v41 }
 0x3a0   : > { %v2896_v42 = vpop.eup %2147 }
 0x3a1   : > { %v909_v43 = vsel %vm668_vm4, %v2896_v42, 0.0  ;;  %v1143_v46 = vpop.xlane.xlu1 %1142 }
 0x3a2   : > { %910 = vadd.xlane.f32.xlu1 %v909_v43  ;;  %v1144_v52 = vsub.f32 %v2877_v5, %v1143_v46 }
 0x3a4   : > { %v1145_v56 = vmul.f32 1.442695, %v1144_v52 }
 0x3a8   : > { %v2900_v44 = vpop.eup %2149 }
 0x3a9   : > { %v1028_v45 = vsel %vm668_vm4, %v2900_v44, 0.0  ;;  %v1262_v49 = vpop.xlane.xlu0 %1261 }
 0x3aa   : > { %1029 = vadd.xlane.f32.xlu0 %v1028_v45  ;;  %v1263_v57 = vsub.f32 %v2881_v14, %v1262_v49 }
 0x3ac   : > { %v1264_v60 = vmul.f32 1.442695, %v1263_v57 }
 0x3b1   : > { %v1381_v47 = vpop.xlane.xlu1 %1380 }
 0x3b2   : > { %v1382_v59 = vsub.f32 %v1373_v19, %v1381_v47 }
 0x3b3   : > { %1034 = vrot.lane.b32.xlu1 %v2814_v11, %s2441_s8  ;;  %s3090_s8 = sld [smem:[#allocation28_spill]] }
 0x3b4   : > { %v1383_v62 = vmul.f32 1.442695, %v1382_v59 }
 0x3b5   : > { %v677_v48 = vpop.xlane.xlu1 %676 }
 0x3b6   : > { %2151 = vrcp.f32 %v677_v48 }
 0x3b7   : > { %2153 = vpow2.f32 %v1145_v56 }
 0x3b8   : > { %2155 = vpow2.f32 %v1264_v60 }
 0x3b9   : > { %v1500_v50 = vpop.xlane.xlu0 %1499  ;;  %2157 = vpow2.f32 %v1383_v62  ;;  %v916_v10 = vpop.permute.xlu1 %915 }
 0x3ba   : > { %v1501_v61 = vsub.f32 %v1492_v26, %v1500_v50  ;;  %v921_v16 = vsel %vm684_vm2, %v916_v10, 0 }
 0x3bc   : > { %v1502_v63 = vmul.f32 1.442695, %v1501_v61 }
 0x3bd   : > { %v797_v54 = vpop.permute.xlu0 %796 }
 0x3be   : > { %v802_v58 = vsel %vm684_vm2, %v797_v54, 0  ;;  %2159 = vpow2.f32 %v1502_v63 }
 0x3c0   : > { %1153 = vrot.lane.b32.xlu0 %v2814_v11, %s2442_s30  ;;  %v2152_v51 = vpop.eup %2151  ;;  %s2976_s30 = scalar_lea.hbm %s3090_s8, %s1848_s22 }
 0x3c1   : > { %v679_v53 = vmul.f32 %v2152_v51, %v2144_v23  ;;  %v2154_v1 = vpop.eup %2153 }
 0x3c2   : > { %v1147_v2 = vsel %vm668_vm4, %v2154_v1, 0.0  ;;  %v2156_v3 = vpop.eup %2155 }
 0x3c3   : > { %v680_v55 = vpack.c.bf16 %v679_v53, %v679_v53  ;;  %v2916_v4 = vpop.eup %2157  ;;  %v1266_v5 = vsel %vm668_vm4, %v2156_v3, 0.0 }
 0x3c4   : > { %v1385_v7 = vsel %vm668_vm4, %v2916_v4, 0.0 }
 0x3c5   : > { %1935 = vmatmul.mubr.msk.bf16.vlgmr.msra.gmra.mrb[8].mxu0 %vm668_vm4, %v680_v55 }
 0x3c6   : > { %1945 = vmatpush3.bf16.msra.mxu0 %v802_v58  ;;  %1946 = vmatprep.mubr.msk.bf16.mxu0 %vm2438_vm0, %v2437_v0 }
 0x3c7   : > { %1956 = vmatprep.subr.bf16.mxu0 %v2437_v0 }
 0x3c8   : > { %v2919_v6 = vpop.eup %2159 }
 0x3c9   : > { %v1504_v8 = vsel %vm668_vm4, %v2919_v6, 0.0 }
 0x3d7   : > { %1148 = vadd.xlane.f32.xlu1 %v1147_v2 }
 0x3db   : > { %1267 = vadd.xlane.f32.xlu1 %v1266_v5 }
 0x3df   : > { %1386 = vadd.xlane.f32.xlu0 %v1385_v7  ;;  %1505 = vadd.xlane.f32.xlu1 %v1504_v8 }
 0x3f0   : > { %1272 = vrot.lane.b32.xlu1 %v2814_v11, %s2443_s26  ;;  %s2349_s26 = scalar_lea.vmem %s2978_s21, 128 }
 0x3f1   : > { %p2350_p10 = scmp.ne.s32.totalorder %s2978_s21, %s2349_s26 }
 0x3f3   : > { %p2351_p4 = pnand %p2350_p10, %p3091_p0 }
 0x3f5   : > { %1391 = vrot.lane.b32.xlu0 %v2814_v11, %s2444_s25  ;;  %p2352_p9 = pneg %p2351_p4  ;;  %s2453_s25 = smov [#allocation14]  }
 0x3f9   : > { %1510 = vrot.lane.b32.xlu0 %v2814_v11, %s2445_s17  ;;  %s2353_s17 = sshll.u32 %s2453_s25, 4  ;;  %s2354_s17 = int_to_ptr.vmem [resolvable:$false] %s2353_s17 }
 0x3fa   : > { %p2356_p13 = scmp.lt.s32.totalorder %s2978_s21, %s2354_s17 }
 0x427   : > { %v791_v9 = vpop.xlane.xlu0 %790 }
 0x428   : > { %2161 = vrcp.f32 %v791_v9 }
 0x42f   : > { %v911_v12 = vpop.xlane.xlu1 %910 }
 0x430   : > { %2163 = vrcp.f32 %v911_v12 }
 0x432   : > { %v2162_v13 = vpop.eup %2161 }
 0x433   : > { %v793_v14 = vmul.f32 %v2162_v13, %v2892_v37  ;;  %v1035_v19 = vpop.permute.xlu1 %1034 }
 0x434   : > { %v1040_v21 = vsel %vm684_vm2, %v1035_v19, 0 }
 0x435   : > { %v794_v15 = vpack.c.bf16 %v793_v14, %v793_v14 }
 0x437   : > { %1947 = vmatmul.mubr.msk.bf16.vlgmr.msra.gmra.mrb[12].mxu0 %vm668_vm4, %v794_v15  ;;  %v1030_v17 = vpop.xlane.xlu0 %1029 }
 0x438   : > { %1957 = vmatpush3.bf16.msra.mxu0 %v921_v16  ;;  %2165 = vrcp.f32 %v1030_v17  ;;  %1958 = vmatprep.mubr.msk.bf16.mxu0 %vm2438_vm0, %v2437_v0  ;;  %v2141_v17 = vld [vmem:[#allocation12] sm:$0xff]  }
 0x439   : > { %1968 = vmatprep.subr.bf16.mxu0 %v2437_v0  ;;  %2023 = vmatpush3.bf16.msra.mxu1 %v2141_v17 }
 0x43a   : > { %v2164_v11 = vpop.eup %2163  ;;  %2024 = vmatprep.subr.bf16.mxu1 %v2437_v0 }
 0x43b   : > { %v913_v18 = vmul.f32 %v2164_v11, %v2896_v42  ;;  %v1154_v24 = vpop.permute.xlu0 %1153 }
 0x43c   : > { %v1159_v26 = vsel %vm684_vm2, %v1154_v24, 0 }
 0x43d   : > { %v914_v20 = vpack.c.bf16 %v913_v18, %v913_v18  ;;  %v2142_v18 = vld [vmem:[#allocation12 + $0x8] sm:$0xff]  }
 0x43e   : > { %2025 = vmatpush3.bf16.msra.mxu1 %v2142_v18 }
 0x43f   : > { %1959 = vmatmul.mubr.msk.bf16.vlgmr.msra.gmra.mrb[16].mxu0 %vm668_vm4, %v914_v20 }
 0x440   : > { %1969 = vmatpush3.bf16.msra.mxu0 %v1040_v21  ;;  %1970 = vmatprep.mubr.msk.bf16.mxu0 %vm2438_vm0, %v2437_v0 }
 0x441   : > { %1980 = vmatprep.subr.bf16.mxu0 %v2437_v0 }
 0x442   : > { %v2166_v22 = vpop.eup %2165 }
 0x443   : > { %v1032_v23 = vmul.f32 %v2166_v22, %v2900_v44 }
 0x445   : > { %v1033_v25 = vpack.c.bf16 %v1032_v23, %v1032_v23 }
 0x447   : > { %1971 = vmatmul.mubr.msk.bf16.vlgmr.msra.gmra.mrb[20].mxu0 %vm668_vm4, %v1033_v25 }
 0x448   : > { %1981 = vmatpush3.bf16.msra.mxu0 %v1159_v26  ;;  %1982 = vmatprep.mubr.msk.bf16.mxu0 %vm2438_vm0, %v2437_v0 }
 0x449   : > { %1992 = vmatprep.subr.bf16.mxu0 %v2437_v0 }
 0x464   : > { %v1149_v27 = vpop.xlane.xlu1 %1148 }
 0x465   : > { %2167 = vrcp.f32 %v1149_v27 }
 0x468   : > { %v1268_v28 = vpop.xlane.xlu1 %1267 }
 0x469   : > { %2169 = vrcp.f32 %v1268_v28 }
 0x46c   : > { %v1506_v29 = vpop.xlane.xlu1 %1505  ;;  %v1387_v30 = vpop.xlane.xlu0 %1386 }
 0x46d   : > { %2171 = vrcp.f32 %v1387_v30 }
 0x46e   : > { %2173 = vrcp.f32 %v1506_v29 }
 0x46f   : > { %v2168_v31 = vpop.eup %2167 }
 0x470   : > { %v1151_v32 = vmul.f32 %v2168_v31, %v2154_v1  ;;  %v1273_v33 = vpop.permute.xlu1 %1272  ;;  %v1392_v38 = vpop.permute.xlu0 %1391 }
 0x471   : > { %v1278_v36 = vsel %vm684_vm2, %v1273_v33, 0  ;;  %v1397_v41 = vsel %vm684_vm2, %v1392_v38, 0 }
 0x472   : > { %v1152_v34 = vpack.c.bf16 %v1151_v32, %v1151_v32 }
 0x473   : > { %v2170_v35 = vpop.eup %2169 }
 0x474   : > { %1983 = vmatmul.mubr.msk.bf16.vlgmr.msra.gmra.mrb[24].mxu0 %vm668_vm4, %v1152_v34  ;;  %v1270_v37 = vmul.f32 %v2170_v35, %v2156_v3  ;;  %v1511_v43 = vpop.permute.xlu0 %1510  ;;  %v1843_v35 = vld [vmem:[%s3028_s7] ss:$0 sm:$0xff] }
 0x475   : > { %1993 = vmatpush3.bf16.msra.mxu0 %v1278_v36  ;;  %1994 = vmatprep.mubr.msk.bf16.mxu0 %vm2438_vm0, %v2437_v0  ;;  %v1516_v46 = vsel %vm684_vm2, %v1511_v43, 0 }
 0x476   : > { %2004 = vmatprep.subr.bf16.mxu0 %v2437_v0  ;;  %v1271_v39 = vpack.c.bf16 %v1270_v37, %v1270_v37 }
 0x477   : > { %v2172_v40 = vpop.eup %2171 }
 0x478   : > { %v1389_v42 = vmul.f32 %v2172_v40, %v2916_v4  ;;  %v2174_v45 = vpop.eup %2173 }
 0x479   : > { %v1508_v47 = vmul.f32 %v2174_v45, %v2919_v6 }
 0x47a   : > { %v1390_v44 = vpack.c.bf16 %v1389_v42, %v1389_v42 }
 0x47b   : > { %v1509_v48 = vpack.c.bf16 %v1508_v47, %v1508_v47 }
 0x47c   : > { %1995 = vmatmul.mubr.msk.bf16.vlgmr.msra.gmra.mrb[28].mxu0 %vm668_vm4, %v1271_v39 }
 0x47d   : > { %2005 = vmatpush3.bf16.msra.mxu0 %v1397_v41  ;;  %2006 = vmatprep.mubr.msk.bf16.mxu0 %vm2438_vm0, %v2437_v0 }
 0x47e   : > { %2016 = vmatprep.subr.bf16.mxu0 %v2437_v0 }
 0x484   : > { %2007 = vmatmul.mubr.msk.bf16.vlgmr.msra.gmra.mrb[32].mxu0 %vm668_vm4, %v1390_v44 }
 0x485   : > { %2017 = vmatpush3.bf16.msra.mxu0 %v1516_v46  ;;  %2018 = vmatprep.mubr.msk.bf16.mxu0 %vm2438_vm0, %v2437_v0 }
 0x48c   : > { %2019 = vmatmul.mubr.msk.bf16.vlgmr.msra.gmra.mrb[36].mxu0 %vm668_vm4, %v1509_v48 }
 0x498   : > { %v722_v49 = vpop.f32.mrb[8].mxu0 }
 0x499   : > { %v728_v50 = vpack.c.bf16 %v722_v49, %v722_v49  ;;  %v1936_v51 = vpop.f32.mrb[9].mxu0 }
 0x49a   : > { %v725_v52 = vpop.f32.mrb[10].mxu0 }
 0x49b   : > { %730 = vst.msk [vmem:[#allocation2] sm:$0xf] %vm729_vm5, %v728_v50  ;;  %v1937_v53 = vpop.f32.mrb[11].mxu0 }
 0x50a   : > { %v838_v54 = vpop.f32.mrb[12].mxu0 }
 0x50b   : > { %v1851_v55 = vpack.c.bf16 %v838_v54, %v838_v54  ;;  %v1948_v56 = vpop.f32.mrb[13].mxu0 }
 0x50c   : > { %v841_v57 = vpop.f32.mrb[14].mxu0 }
 0x50d   : > { %848 = vrot.lane.b32.xlu1 %v1851_v55, %s2446_s20  ;;  %v1949_v58 = vpop.f32.mrb[15].mxu0  ;;  %s2355_s20 = scalar_lea.vmem %s2354_s17, 256 }
 0x50e   : > { %p2357_p7 = scmp.lt.s32.totalorder %s2355_s20, %s2349_s26 }
 0x510   : > { %p2358_p3 = por %p2357_p7, %p2356_p13 }
 0x512   : > { %v957_v59 = vpop.f32.mrb[16].mxu0  ;;  %p2359_p5 = pnand %p2358_p3, %p2352_p9 }
 0x513   : > { %v1852_v60 = vpack.c.bf16 %v957_v59, %v957_v59  ;;  %v1960_v61 = vpop.f32.mrb[17].mxu0 }
 0x514   : > { %v960_v62 = vpop.f32.mrb[18].mxu0 }
 0x515   : > { %967 = vrot.lane.b32.xlu0 %v1852_v60, %s2447_s19  ;;  %v1961_v63 = vpop.f32.mrb[19].mxu0 }
 0x51a   : > { %v1076_v1 = vpop.f32.mrb[20].mxu0 }
 0x51b   : > { %v1853_v2 = vpack.c.bf16 %v1076_v1, %v1076_v1  ;;  %v1972_v3 = vpop.f32.mrb[21].mxu0 }
 0x51c   : > { %v1079_v4 = vpop.f32.mrb[22].mxu0 }
 0x51d   : > { %1086 = vrot.lane.b32.xlu1 %v1853_v2, %s2448_s1  ;;  %v1973_v5 = vpop.f32.mrb[23].mxu0 }
 0x547   : > { %v1195_v6 = vpop.f32.mrb[24].mxu0 }
 0x548   : > { %v1854_v7 = vpack.c.bf16 %v1195_v6, %v1195_v6  ;;  %v1984_v8 = vpop.f32.mrb[25].mxu0 }
 0x549   : > { %v1198_v9 = vpop.f32.mrb[26].mxu0 }
 0x54a   : > { %1205 = vrot.lane.b32.xlu0 %v1854_v7, %s2449_s14  ;;  %v1985_v10 = vpop.f32.mrb[27].mxu0 }
 0x54f   : > { %v1314_v12 = vpop.f32.mrb[28].mxu0 }
 0x550   : > { %v1855_v13 = vpack.c.bf16 %v1314_v12, %v1314_v12  ;;  %v1996_v14 = vpop.f32.mrb[29].mxu0 }
 0x551   : > { %v1317_v15 = vpop.f32.mrb[30].mxu0 }
 0x552   : > { %1324 = vrot.lane.b32.xlu1 %v1855_v13, %s2450_s3  ;;  %v1997_v16 = vpop.f32.mrb[31].mxu0 }
 0x557   : > { %v1433_v11 = vpop.f32.mrb[32].mxu0 }
 0x558   : > { %v1856_v19 = vpack.c.bf16 %v1433_v11, %v1433_v11  ;;  %v2008_v20 = vpop.f32.mrb[33].mxu0 }
 0x559   : > { %v1436_v21 = vpop.f32.mrb[34].mxu0 }
 0x55a   : > { %1443 = vrot.lane.b32.xlu0 %v1856_v19, %s2451_s16  ;;  %v2009_v22 = vpop.f32.mrb[35].mxu0 }
 0x55f   : > { %v1552_v23 = vpop.f32.mrb[36].mxu0 }
 0x560   : > { %v1857_v24 = vpack.c.bf16 %v1552_v23, %v1552_v23  ;;  %v2020_v25 = vpop.f32.mrb[37].mxu0 }
 0x561   : > { %v1555_v26 = vpop.f32.mrb[38].mxu0 }
 0x562   : > { %1562 = vrot.lane.b32.xlu1 %v1857_v24, %s2452_s13  ;;  %v2021_v27 = vpop.f32.mrb[39].mxu0 }
 0x57f   : > { %v849_v28 = vpop.permute.xlu1 %848 }
 0x580   : > { %852 = vst.msk [vmem:[#allocation2] sm:$0xf] %vm851_vm6, %v849_v28 }
 0x587   : > { %v968_v29 = vpop.permute.xlu0 %967 }
 0x588   : > { %971 = vst.msk [vmem:[#allocation2] sm:$0xf] %vm970_vm7, %v968_v29 }
 0x58f   : > { %v1087_v0 = vpop.permute.xlu1 %1086 }
 0x590   : > { %1090 = vst.msk [vmem:[#allocation2] sm:$0xf] %vm1089_vm8, %v1087_v0 }
 0x5bc   : > { %v1206_v30 = vpop.permute.xlu0 %1205 }
 0x5bd   : > { %1209 = vst.msk [vmem:[#allocation2] sm:$0xf] %vm1208_vm9, %v1206_v30 }
 0x5c4   : > { %v1325_v31 = vpop.permute.xlu1 %1324 }
 0x5c5   : > { %1328 = vst.msk [vmem:[#allocation2] sm:$0xf] %vm1327_vm10, %v1325_v31 }
 0x5cc   : > { %v1444_v32 = vpop.permute.xlu0 %1443 }
 0x5cd   : > { %1447 = vst.msk [vmem:[#allocation2] sm:$0xf] %vm1446_vm11, %v1444_v32 }
 0x5d4   : > { %v1563_v33 = vpop.permute.xlu1 %1562 }
 0x5d5   : > { %1566 = vst.msk [vmem:[#allocation2] sm:$0xf] %vm1565_vm12, %v1563_v33 }
 0x5dc   : > { %v1567_v34 = vld [vmem:[#allocation2] sm:$0xf] }
 0x5dd   : > { %2027 = vmatmul.mubr.msk.bf16.vlgmr.msra.gmra.mrb[36].mxu1 %vm454_vm1, %v1567_v34 }
 0x6b0   : > { %v1628_v36 = vpop.f32.mrb[36].mxu1 }
 0x6b1   : > { %v1629_v37 = vadd.f32 %v1843_v35, %v1628_v36  ;;  %v2028_v38 = vpop.f32.mrb[37].mxu1 }
 0x6b2   : > { %v1631_v39 = vpop.f32.mrb[38].mxu1 }
 0x6b3   : > { %v2029_v40 = vpop.f32.mrb[39].mxu1  ;;  %1634 = vst.msk [vmem:[%s435_s18] sm:$0xff] %vm454_vm1, %v1629_v37 }
 0x6b4   : > { %2362 = shalt.err (!%p2359_p5)
}
 0x6b5   : > { %s2363_s24 = scalar_lea.hbm %s2976_s30, 128  ;;  %s2367_s14 = scalar_lea.hbm %s3090_s8, 256 }
 0x6b6   : > { %p2364_p2 = scmp.ne.s32.totalorder %s2976_s30, %s2363_s24  ;;  %p2368_p12 = scmp.lt.u32.totalorder %s2976_s30, %s3090_s8 }
 0x6b7   : > { %p2369_p1 = scmp.lt.u32.totalorder %s2367_s14, %s2363_s24  ;;  %p2371_p10 = scmp.lt.u32.totalorder %s2363_s24, %s2976_s30 }
 0x6b8   : > { %p2365_p8 = pnand %p2364_p2, %p3091_p0 }
 0x6b9   : > { %p2370_p6 = por %p2369_p1, %p2368_p12 }
 0x6ba   : > { %p2366_p11 = pneg %p2365_p8 }
 0x6bb   : > { %p2372_p4 = por %p2371_p10, %p2370_p6 }
 0x6bd   : > { %p2373_p9 = pnand %p2372_p4, %p2366_p11 }
 0x6bf   : > { %2376 = shalt.err (!%p2373_p9)
}
 0x6c0   : > { %2048 = dma.vmem_to_hbm [thread:$0]  (%p3091_p0), %s2978_s21, 128, %s2976_s30, %s1636_s9  }
 0x6c1 PF: > { %s3092_s13 = sld [smem:[#allocation20_spill]]  ;;  %s3093_s10 = sld [smem:[#allocation22_spill]] }
 0x6c2   : > { %s3094_s15 = sld [smem:[#allocation21_spill]] }
 0x6c7   : > { %s1661_s12 = sand.u32 1, %s3092_s13   ;;  %p3095_p13 = scmp.ne.s32.totalorder %s3093_s10, 0 }
 0x6c8   : > { %p3096_p7 = scmp.ge.s32.totalorder %s3094_s15, 2  ;;  %s1662_s22 = scalar_lea.sflag [#allocation5], %s1661_s12 }
 0x6ca   : > { %p2071_p3 = pnand %p3096_p7, %p3095_p13 }
 0x6cc   : > { %2410 = dma.done.wait (!%p2071_p3), %s1662_s22, 128  }
 0x6cd   : > { %2412 = vsyncadd (!%p2071_p3), %s1662_s22, 4294967168  ;;  %s3097_s30 = sld [smem:[#allocation23_spill]]  ;;  %s3098_s18 = sld [smem:[#allocation24_spill]] }
 0x6ce   : > { %s3099_s27 = smov %s2419_s28  ;;  %s3100_s28 = smov %s2423_s29 }
 0x6d3   : > { %p26_p5 = scmp.ge.s32.totalorder %s3097_s30, 4   ;;  %s3101_s29 = smov %s3098_s18 }
 0x6d5   :  { %28 = sbr.rel (!%p26_p5) target bundleno = 13 (0xd), region = 133 }
 0x6dc   :  { %1667 = vsyncpa [#allocation4], 1 }
 0x6dd   :  { %1669 = vsyncpa [#allocation4 + $0x1], 1 }
 0x6de   :  { %1670 = vsyncpa [#allocation7], 1 }
 0x6df   :  { %1672 = vsyncpa [#allocation7 + $0x1], 1 }
 0x6e0   :  { %1673 = vsyncpa [#allocation10], 1 }
 0x6e1   :  { %1674 = vsyncpa [#allocation13], 1 }
 0x6e2   :  { %1675 = vsyncpa [#allocation5], 1 }
 0x6e3   :  { %1677 = vsyncpa [#allocation5 + $0x1], 1 }

// kernel: tpu_custom_call.1
= control target key start
LH: loop header
LB: loop body
LE: loop exit
PB: predicated region body
PF: predicated region fallthrough
CT: control target
= control target key end

     0   :  { %s3021_s0 = inlined_call_operand.hbm [shape: bf16[16,32], index: 0, kind: input, shape index: {}]   ;;  %s3022_s1 = inlined_call_operand.hbm [shape: bf16[16,32], index: 1, kind: input, shape index: {}]   ;;  %s3023_s2 = inlined_call_operand.hbm [shape: bf16[16,32], index: 2, kind: input, shape index: {}]   ;;  %s3024_s3 = inlined_call_operand.hbm [shape: bf16[32,32], index: 3, kind: input, shape index: {}]   ;;  %s3025_s4 = inlined_call_operand.hbm [shape: bf16[32,32], index: 4, kind: input, shape index: {}]   ;;  %s3026_s5 = inlined_call_operand.vmem [shape: bf16[32,32], index: 5, kind: input, shape index: {}]   ;;  %s3027_s6 = inlined_call_operand.hbm [shape: bf16[32,32], index: 6, kind: input, shape index: {}]   ;;  %s3028_s7 = inlined_call_operand.vmem [shape: f32[1,32], index: 7, kind: input, shape index: {}]   ;;  %s3029_s8 = inlined_call_operand.hbm [shape: f32[16,32], index: 8, kind: output, shape index: {}]  }
   0x1   :  { %3055 = sst [smem:[#allocation26_spill]] %s3022_s1 }
   0x2   :  { %3056 = sst [smem:[#allocation27_spill]] %s3024_s3 }
   0x3   :  { %3057 = sst [smem:[#allocation28_spill]] %s3029_s8 }
   0x4   :  { %13 = vsyncpa [#allocation4], 0 }
   0x5   :  { %15 = vsyncpa [#allocation4 + $0x1], 0 }
   0x6   :  { %16 = vsyncpa [#allocation7], 0 }
   0x7   :  { %18 = vsyncpa [#allocation7 + $0x1], 0 }
   0x8   :  { %19 = vsyncpa [#allocation10], 0 }
   0x9   :  { %20 = vsyncpa [#allocation13], 0 }
   0xa   :  { %21 = vsyncpa [#allocation5], 0 }
   0xb   :  { %23 = vsyncpa [#allocation5 + $0x1], 0  ;;  %s2499_s27 = smov 0   ;;  %s2501_s28 = smov 0  }
   0xc   :  { %s2503_s29 = smov 0   ;;  %s2505_s30 = smov 0  }
   0xd LB: > { %3058 = sst [smem:[#allocation20_spill]] %s2415_s27  ;;  %s2520_s9 = sadd.s32 4294967295, %s2427_s30   ;;  %s2427_s30 = sphi %s2505_s30, %s3097_s30   ;;  %s2423_s29 = sphi %s2503_s29, %s3101_s29   ;;  %s2419_s28 = sphi %s2501_s28, %s3100_s28   ;;  %s2415_s27 = sphi %s2499_s27, %s3099_s27  }
   0xe   : > { %3059 = sst [smem:[#allocation21_spill]] %s2427_s30  ;;  %s1791_s10 = sadd.s32 4294967294, %s2427_s30  }
   0xf   : > { %p49_p0 = scmp.ne.s32.totalorder %s2419_s28, %s2415_s27  ;;  %p3030_p1 = scmp.eq.s32.totalorder %s2520_s9, 0 }
  0x10   : > { %p236_p3 = scmp.eq.s32.totalorder %s1791_s10, 1  ;;  %p1792_p5 = scmp.ge.s32.totalorder %s2427_s30, 1 }
  0x11   : > { %p2529_p4 = por %p3030_p1, %p49_p0  ;;  %p243_p7 = scmp.lt.s32.totalorder %s2427_s30, 3 }
  0x12   : > { %p2534_p6 = por %p236_p3, %p49_p0  ;;  %s2429_s14 = smov [#allocation9]  }
  0x13   : > { %s3060_s11 = scalar_select %p2529_p4, 1, 0 }
  0x14   : > { %s3061_s12 = scalar_select %p2534_p6, 1, 0 }
  0x15   : > { %p2539_p8 = pnand %p1792_p5, %p243_p7  ;;  %s255_s15 = sshll.u32 %s2429_s14, 4  ;;  %s2543_s15 = int_to_ptr.vmem [resolvable:$true] %s255_s15 }
  0x16   : > { %3062 = sst [smem:[#allocation22_spill]] %s3061_s12  ;;  %s2555_s17 = sadd.s32 1, %s2427_s30  }
  0x17   : > { %s3063_s13 = scalar_select %p2539_p8, 1, 0 }
  0x18   : > { %p2050_p9 = pneg %p2539_p8  ;;  %3065 = sst [smem:[#allocation23_spill]] %s2555_s17 }
  0x19   : > { %s36_s18 = sadd.s32 1, %s2423_s29  ;;  %s33_s19 = ssub.s32 %s2427_s30, %s2555_s17 }
  0x1a   : > { %p2550_p11 = pnand %p2050_p9, %p3030_p1  ;;  %s3066_s3 = sld [smem:[#allocation27_spill]] }
  0x1c   : > { %s3064_s16 = scalar_select %p2550_p11, 1, 0 }
  0x1d   : > { %p2568_p13 = pneg %p2550_p11 }
  0x1f   : > { %s3067_s25 = scalar_select %p2568_p13, 1, 0 }
  0x20   : > { %s2175_s22 = scalar_lea.hbm %s3066_s3, 256 }
  0x21   : > { %p2176_p12 = scmp.ne.s32.totalorder %s3066_s3, %s2175_s22  ;;  %p2182_p5 = scmp.lt.u32.totalorder %s2175_s22, %s3066_s3 }
  0x23   : > { %p2178_p0 = pnand %p2568_p13, %p2176_p12 }
  0x25   : > { %p2179_p3 = pneg %p2178_p0 }
  0x27   : > { %p2184_p7 = pnand %p2182_p5, %p2179_p3 }
  0x29   : > { %2187 = shalt.err (!%p2184_p7)
}
  0x2a   : > { %s2188_s14 = scalar_lea.vmem %s2543_s15, 256  ;;  %p2196_p2 = scmp.lt.s32.totalorder %s2543_s15, %s2543_s15 }
  0x2b   : > { %p2189_p9 = scmp.ne.s32.totalorder %s2543_s15, %s2188_s14  ;;  %p2197_p6 = scmp.lt.s32.totalorder %s2188_s14, %s2188_s14 }
  0x2d   : > { %p2191_p10 = pnand %p2189_p9, %p2568_p13  ;;  %p2198_p12 = por %p2197_p6, %p2196_p2 }
  0x2f   : > { %p2192_p1 = pneg %p2191_p10 }
  0x31   : > { %p2199_p0 = pnand %p2198_p12, %p2192_p1 }
  0x33   : > { %2202 = shalt.err (!%p2199_p0)
}
  0x34   : > { %s3033_s20 = smov 64   ;;  %s3035_s21 = smov 4  }
  0x35   : > { %2053 = dma.hbm_to_vmem [thread:$0]  (!%p2550_p11), %s3066_s3, 256, %s2543_s15, [#allocation10], %s3033_s20, %s3033_s20, %s3035_s21  }
  0x36   : > { %p34_p1 = scmp.eq.s32.totalorder %s33_s19, 0  ;;  %p43_p2 = scmp.ne.s32.totalorder %s2423_s29, %s2419_s28 }
  0x37   : > { %p44_p6 = scmp.eq.s32.totalorder %s2427_s30, 0  ;;  %p2077_p10 = scmp.lt.s32.totalorder %s2427_s30, 2 }
  0x38   : > { %s2597_s24 = scalar_select %p34_p1, %s2423_s29, %s36_s18  }
  0x39   : > { %p45_p3 = por %p44_p6, %p43_p2  ;;  %p3069_p5 = scmp.eq.s32.totalorder %s2520_s9, 1 }
  0x3a   : > { %3068 = sst [smem:[#allocation24_spill]] %s2597_s24  ;;  %s3037_s10 = sand.u32 1, %s2423_s29  }
  0x3b   : > { %p2601_p7 = por %p3069_p5, %p43_p2  ;;  %s2607_s14 = sshll.u32 %s2427_s30, 6 }
  0x3c   : > { %s2611_s17 = sshll.u32 %s3037_s10, 2  ;;  %p2613_p9 = pnand %p2077_p10, %p45_p3 }
  0x3d   : > { %s3070_s26 = scalar_select %p2601_p7, 1, 0 }
  0x3e   : > { %s3072_s15 = scalar_select %p2613_p9, 1, 0 }
  0x3f   : > { %3071 = sst [smem:[#allocation25_spill]] %s3070_s26  ;;  %s319_s18 = sand.u32 1, %s2427_s30  }
  0x40   : > { %s3073_s1 = sld [smem:[#allocation26_spill]]  ;;  %s323_s20 = scalar_lea.vmem [#allocation6], %s2611_s17 }
  0x41   : > { %s330_s21 = sshll.u32 %s323_s20, 4  ;;  %s2627_s10 = scalar_lea.sflag [#allocation7], %s319_s18  ;;  %s2625_s21 = int_to_ptr.vmem [resolvable:$true] %s330_s21 }
  0x42   : > { %p2633_p0 = pneg %p2613_p9 }
  0x44   : > { %s3074_s24 = scalar_select %p2633_p0, 1, 0 }
  0x46   : > { %s2622_s23 = scalar_lea.hbm %s3073_s1, %s2607_s14  ;;  %s2208_s30 = scalar_lea.hbm %s3073_s1, 128 }
  0x47   : > { %s2203_s3 = scalar_lea.hbm %s2622_s23, 64  ;;  %p2209_p6 = scmp.lt.u32.totalorder %s2622_s23, %s3073_s1 }
  0x48   : > { %p2204_p12 = scmp.ne.s32.totalorder %s2622_s23, %s2203_s3  ;;  %p2210_p10 = scmp.lt.u32.totalorder %s2208_s30, %s2203_s3 }
  0x49   : > { %p2212_p5 = scmp.lt.u32.totalorder %s2203_s3, %s2622_s23 }
  0x4a   : > { %p2206_p1 = pnand %p2633_p0, %p2204_p12  ;;  %p2211_p3 = por %p2210_p10, %p2209_p6 }
  0x4c   : > { %p2207_p2 = pneg %p2206_p1  ;;  %p2213_p7 = por %p2212_p5, %p2211_p3 }
  0x4e   : > { %p2214_p4 = pnand %p2213_p7, %p2207_p2 }
  0x50   : > { %2217 = shalt.err (!%p2214_p4)
}
  0x51   : > { %s2218_s18 = scalar_lea.vmem %s2625_s21, 64  ;;  %s2432_s19 = smov [#allocation6]  }
  0x52   : > { %p2219_p12 = scmp.ne.s32.totalorder %s2625_s21, %s2218_s18  ;;  %s2223_s22 = sshll.u32 %s2432_s19, 4  ;;  %s2224_s22 = int_to_ptr.vmem [resolvable:$false] %s2223_s22 }
  0x53   : > { %s2225_s12 = scalar_lea.vmem %s2224_s22, 128  ;;  %p2226_p11 = scmp.lt.s32.totalorder %s2625_s21, %s2224_s22 }
  0x54   : > { %p2221_p1 = pnand %p2219_p12, %p2633_p0  ;;  %p2227_p13 = scmp.lt.s32.totalorder %s2225_s12, %s2218_s18 }
  0x56   : > { %p2222_p8 = pneg %p2221_p1  ;;  %p2228_p6 = por %p2227_p13, %p2226_p11 }
  0x58   : > { %p2229_p10 = pnand %p2228_p6, %p2222_p8 }
  0x5a   : > { %2232 = shalt.err (!%p2229_p10)
}
  0x5b   : > { %2066 = dma.hbm_to_vmem [thread:$0]  (!%p2613_p9), %s2622_s23, 64, %s2625_s21, %s2627_s10  }
  0x5c   : > { %s2433_s3 = smov [#allocation11]   ;;  %s2434_s20 = smov [#allocation12]  }
  0x5d   : > { %s268_s30 = sshll.u32 %s2433_s3, 4  ;;  %s284_s1 = sshll.u32 %s2434_s20, 4  ;;  %s269_s30 = int_to_ptr.vmem [resolvable:$true] %s268_s30  ;;  %s285_s1 = int_to_ptr.vmem [resolvable:$true] %s284_s1 }
  0x5e   : > { %s2233_s22 = scalar_lea.hbm %s3025_s4, 256  ;;  %p3075_p8 = scmp.ne.s32.totalorder %s3067_s25, 0 }
  0x5f   : > { %p2234_p4 = scmp.ne.s32.totalorder %s3025_s4, %s2233_s22  ;;  %p2240_p7 = scmp.lt.u32.totalorder %s2233_s22, %s3025_s4 }
  0x61   : > { %p2236_p11 = pnand %p2234_p4, %p3075_p8 }
  0x63   : > { %p2237_p13 = pneg %p2236_p11 }
  0x65   : > { %p2242_p2 = pnand %p2240_p7, %p2237_p13 }
  0x67   : > { %2245 = shalt.err (!%p2242_p2)
}
  0x68   : > { %s2246_s21 = scalar_lea.vmem %s269_s30, 256  ;;  %p2254_p1 = scmp.lt.s32.totalorder %s269_s30, %s269_s30 }
  0x69   : > { %p2247_p3 = scmp.ne.s32.totalorder %s269_s30, %s2246_s21  ;;  %p2255_p6 = scmp.lt.s32.totalorder %s2246_s21, %s2246_s21 }
  0x6b   : > { %p2249_p5 = pnand %p2247_p3, %p3075_p8  ;;  %p2256_p10 = por %p2255_p6, %p2254_p1 }
  0x6d   : > { %p2250_p12 = pneg %p2249_p5 }
  0x6f   : > { %p2257_p9 = pnand %p2256_p10, %p2250_p12 }
  0x71   : > { %2260 = shalt.err (!%p2257_p9)
}
  0x72   : > { %p3076_p4 = scmp.ne.s32.totalorder %s3064_s16, 0  ;;  %s3077_s27 = smov 4  }
  0x73   : > { %s3078_s23 = smov 64   ;;  %s2261_s19 = scalar_lea.hbm %s3027_s6, 256 }
  0x74   : > { %2056 = dma.hbm_to_vmem [thread:$0]  (!%p3076_p4), %s3025_s4, 256, %s269_s30, [#allocation10], %s3078_s23, %s3078_s23, %s3077_s27  }
  0x75   : > { %p2262_p11 = scmp.ne.s32.totalorder %s3027_s6, %s2261_s19  ;;  %p2268_p7 = scmp.lt.u32.totalorder %s2261_s19, %s3027_s6 }
  0x77   : > { %p2264_p9 = pnand %p2262_p11, %p3075_p8 }
  0x79   : > { %p2265_p13 = pneg %p2264_p9 }
  0x7b   : > { %p2270_p2 = pnand %p2268_p7, %p2265_p13 }
  0x7d   : > { %2273 = shalt.err (!%p2270_p2)
}
  0x7e   : > { %s2274_s8 = scalar_lea.vmem %s285_s1, 256  ;;  %p2282_p1 = scmp.lt.s32.totalorder %s285_s1, %s285_s1 }
  0x7f   : > { %p2275_p3 = scmp.ne.s32.totalorder %s285_s1, %s2274_s8  ;;  %p2283_p6 = scmp.lt.s32.totalorder %s2274_s8, %s2274_s8 }
  0x81   : > { %p2277_p5 = pnand %p2275_p3, %p3075_p8  ;;  %p2284_p10 = por %p2283_p6, %p2282_p1 }
  0x83   : > { %p2278_p12 = pneg %p2277_p5 }
  0x85   : > { %p2285_p0 = pnand %p2284_p10, %p2278_p12 }
  0x87   : > { %2288 = shalt.err (!%p2285_p0)
}
  0x88   : > { %2059 = dma.hbm_to_vmem [thread:$0]  (!%p3076_p4), %s3027_s6, 256, %s285_s1, [#allocation13], %s3078_s23, %s3078_s23, %s3077_s27  }
  0x89   : > { %s2703_s20 = scalar_lea.hbm %s3021_s0, %s2607_s14  ;;  %s305_s16 = scalar_lea.vmem [#allocation3], %s2611_s17 }
  0x8a   : > { %s312_s19 = sshll.u32 %s305_s16, 4  ;;  %s2712_s12 = scalar_lea.hbm %s3023_s2, %s2607_s14  ;;  %s2706_s19 = int_to_ptr.vmem [resolvable:$true] %s312_s19 }
  0x8b   : > { %s3079_s21 = sand.u32 1, %s2423_s29   ;;  %s2289_s27 = scalar_lea.hbm %s2703_s20, 64 }
  0x8c   : > { %s302_s1 = scalar_lea.sflag [#allocation4], %s3079_s21  ;;  %p2290_p0 = scmp.ne.s32.totalorder %s2703_s20, %s2289_s27 }
  0x8d   : > { %p3080_p8 = scmp.ne.s32.totalorder %s3074_s24, 0  ;;  %s2294_s30 = scalar_lea.hbm %s3021_s0, 128 }
  0x8e   : > { %p2295_p9 = scmp.lt.u32.totalorder %s2703_s20, %s3021_s0  ;;  %p2296_p13 = scmp.lt.u32.totalorder %s2294_s30, %s2289_s27 }
  0x8f   : > { %p2292_p4 = pnand %p2290_p0, %p3080_p8  ;;  %p2298_p2 = scmp.lt.u32.totalorder %s2289_s27, %s2703_s20 }
  0x90   : > { %p2297_p7 = por %p2296_p13, %p2295_p9 }
  0x91   : > { %p2293_p11 = pneg %p2292_p4 }
  0x92   : > { %p2299_p3 = por %p2298_p2, %p2297_p7 }
  0x94   : > { %p2300_p5 = pnand %p2299_p3, %p2293_p11 }
  0x96   : > { %2303 = shalt.err (!%p2300_p5)
}
  0x97   : > { %s2304_s14 = scalar_lea.vmem %s2706_s19, 64  ;;  %s2435_s3 = smov [#allocation3]  }
  0x98   : > { %p2305_p12 = scmp.ne.s32.totalorder %s2706_s19, %s2304_s14  ;;  %s2309_s16 = sshll.u32 %s2435_s3, 4  ;;  %s2310_s16 = int_to_ptr.vmem [resolvable:$false] %s2309_s16 }
  0x99   : > { %s2311_s22 = scalar_lea.vmem %s2310_s16, 128  ;;  %p2312_p10 = scmp.lt.s32.totalorder %s2706_s19, %s2310_s16 }
  0x9a   : > { %p2307_p1 = pnand %p2305_p12, %p3080_p8  ;;  %p2313_p0 = scmp.lt.s32.totalorder %s2311_s22, %s2304_s14 }
  0x9c   : > { %p2308_p6 = pneg %p2307_p1  ;;  %p2314_p4 = por %p2313_p0, %p2312_p10 }
  0x9e   : > { %p2315_p9 = pnand %p2314_p4, %p2308_p6 }
  0xa0   : > { %2318 = shalt.err (!%p2315_p9)
}
  0xa1   : > { %p3081_p11 = scmp.ne.s32.totalorder %s3072_s15, 0  ;;  %s341_s18 = scalar_lea.vmem [#allocation8], %s2611_s17 }
  0xa2   : > { %s348_s21 = sshll.u32 %s341_s18, 4  ;;  %s2319_s27 = scalar_lea.hbm %s2712_s12, 64  ;;  %s349_s21 = int_to_ptr.vmem [resolvable:$true] %s348_s21 }
  0xa3   : > { %2063 = dma.hbm_to_vmem [thread:$0]  (!%p3081_p11), %s2703_s20, 64, %s2706_s19, %s302_s1  }
  0xa4   : > { %p2320_p13 = scmp.ne.s32.totalorder %s2712_s12, %s2319_s27  ;;  %s2324_s30 = scalar_lea.hbm %s3023_s2, 128 }
  0xa5   : > { %p2325_p3 = scmp.lt.u32.totalorder %s2712_s12, %s3023_s2  ;;  %p2326_p5 = scmp.lt.u32.totalorder %s2324_s30, %s2319_s27 }
  0xa6   : > { %p2322_p7 = pnand %p2320_p13, %p3080_p8  ;;  %p2328_p1 = scmp.lt.u32.totalorder %s2319_s27, %s2712_s12 }
  0xa7   : > { %p2327_p12 = por %p2326_p5, %p2325_p3 }
  0xa8   : > { %p2323_p2 = pneg %p2322_p7 }
  0xa9   : > { %p2329_p6 = por %p2328_p1, %p2327_p12 }
  0xab   : > { %p2330_p10 = pnand %p2329_p6, %p2323_p2 }
  0xad   : > { %2333 = shalt.err (!%p2330_p10)
}
  0xae   : > { %s2334_s17 = scalar_lea.vmem %s349_s21, 64  ;;  %s2436_s20 = smov [#allocation8]  }
  0xaf   : > { %p2335_p0 = scmp.ne.s32.totalorder %s349_s21, %s2334_s17  ;;  %s2339_s19 = sshll.u32 %s2436_s20, 4  ;;  %s2340_s19 = int_to_ptr.vmem [resolvable:$false] %s2339_s19 }
  0xb0   : > { %s2341_s1 = scalar_lea.vmem %s2340_s19, 128  ;;  %p2342_p13 = scmp.lt.s32.totalorder %s349_s21, %s2340_s19 }
  0xb1   : > { %p2337_p4 = pnand %p2335_p0, %p3080_p8  ;;  %p2343_p7 = scmp.lt.s32.totalorder %s2341_s1, %s2334_s17 }
  0xb3   : > { %p2338_p9 = pneg %p2337_p4  ;;  %p2344_p11 = por %p2343_p7, %p2342_p13 }
  0xb5   : > { %p2345_p3 = pnand %p2344_p11, %p2338_p9 }
  0xb7   : > { %2348 = shalt.err (!%p2345_p3)
}
  0xb8   : > { %p3082_p5 = scmp.ne.s32.totalorder %s3072_s15, 0  ;;  %p3083_p2 = scmp.ne.s32.totalorder %s3063_s13, 0 }
  0xb9   : > { %s2759_s24 = sand.u32 (!%p3083_p2), 1, %s2419_s28   ;;  %p3084_p8 = scmp.ne.s32.totalorder (!%p3083_p2), %s3060_s11, 0 }
  0xba   : > { %2069 = dma.hbm_to_vmem [thread:$0]  (!%p3082_p5), %s2712_s12, 64, %s349_s21, %s2627_s10  }
  0xbb   : > { %357 = sbr.rel (%p3083_p2) target bundleno = 1729 (0x6c1), region = 52  ;;  %s2762_s14 = sshll.u32 (!%p3083_p2), %s2759_s24, 2 }
  0xbc   : > { %s360_s3 = scalar_lea.sflag (!%p3083_p2), [#allocation4], %s2759_s24  ;;  %s363_s16 = scalar_lea.vmem (!%p3083_p2), [#allocation3], %s2762_s14 }
  0xc2   : > { %2394 = dma.done.wait (%p3084_p8), %s360_s3, 64  }
  0xc3   : > { %2396 = vsyncadd (%p3084_p8), %s360_s3, 4294967232  ;;  %s368_s13 = sand.u32 1, %s2520_s9   ;;  %s372_s15 = scalar_lea.vmem [#allocation6], %s2762_s14 }
  0xc4   : > { %s369_s10 = scalar_lea.sflag [#allocation7], %s368_s13 }
  0xc5   : > { %2398 = dma.done.wait (%p3084_p8), %s369_s10, 128  }
  0xc6   : > { %2400 = vsyncadd (%p3084_p8), %s369_s10, 4294967168  ;;  %s381_s12 = scalar_lea.vmem [#allocation8], %s2762_s14  ;;  %p3085_p11 = scmp.eq.s32.totalorder %s2520_s9, 0 }
  0xc8   : > { %2402 = dma.done.wait (%p3085_p11), [#allocation10], 512   ;;  %p3086_p12 = pmov %p3085_p11 }
  0xc9   : > { %p3087_p1 = pmov %p3085_p11 }
  0xca   : > { %2404 = vsyncadd (%p3086_p12), [#allocation10], 4294966784 }
  0xcb   : > { %2406 = dma.done.wait (%p3087_p1), [#allocation13], 256   ;;  %p3088_p6 = pmov %p3087_p1 }
  0xcc   : > { %v2437_v0 = vmov 0.0   ;;  %vm2438_vm0 = vmmov 0   ;;  %v2135_v1 = vld [vmem:[#allocation9] sm:$0xff]   ;;  %v2136_v2 = vld [vmem:[#allocation11] sm:$0xff]   ;;  %v2137_v3 = vld [vmem:[#allocation9 + $0x8] sm:$0xff]   ;;  %vm454_vm1 = vcmask 261120  }
  0xcd   : > { %2408 = vsyncadd (%p3088_p6), [#allocation13], 4294967040  ;;  %1902 = vmatprep.subr.bf16.mxu0 %v2437_v0  ;;  %1910 = vmatprep.subr.bf16.mxu1 %v2437_v0  ;;  %v2138_v4 = vld [vmem:[#allocation11 + $0x8] sm:$0xff]   ;;  %v437_v5 = vld [vmem:[%s363_s16] sm:$0xf]  ;;  %vm684_vm2 = vcmask 1043456  }
  0xce   : > { %1906 = vmatprep.mubr.msk.bf16.mxu0 %vm2438_vm0, %v2437_v0  ;;  %1914 = vmatprep.mubr.msk.bf16.mxu1 %vm2438_vm0, %v2437_v0  ;;  %v498_v6 = vld [vmem:[%s372_s15] sm:$0xf]  ;;  %v2140_v8 = vld [vmem:[%s3026_s5 + $0x8] sm:$0xff]   ;;  %vm621_vm3 = vcmask 31744   ;;  %s2439_s27 = smov 120   ;;  %s2440_s23 = smov 124  }
  0xcf   : > { %1903 = vmatpush3.bf16.msra.mxu0 %v2135_v1  ;;  %1911 = vmatpush3.bf16.msra.mxu1 %v2136_v2  ;;  %v2139_v7 = vld [vmem:[%s3026_s5] sm:$0xff]   ;;  %s2441_s8 = smov 116   ;;  %s2442_s30 = smov 112   ;;  %vm668_vm4 = vcmask 64512   ;;  %vm729_vm5 = vcmask 27648   ;;  %vm851_vm6 = vcmask 60448  }
  0xd0   : > { %1904 = vmatprep.subr.bf16.mxu0 %v2437_v0  ;;  %1912 = vmatprep.subr.bf16.mxu1 %v2437_v0  ;;  %v558_v9 = vld [vmem:[%s381_s12] sm:$0xf]  ;;  %s2443_s26 = smov 108   ;;  %s2444_s25 = smov 104   ;;  %vm970_vm7 = vcmask 93248   ;;  %vm1089_vm8 = vcmask 126048  }
  0xd1   : > { %s2445_s17 = smov 100   ;;  %s2446_s20 = smov 4   ;;  %vm1208_vm9 = vcmask 158848   ;;  %vm1327_vm10 = vcmask 191648   ;;  %vm1446_vm11 = vcmask 224448   ;;  %vm1565_vm12 = vcmask 257248  }
  0xd2   : > { %s2447_s19 = smov 8   ;;  %s2448_s1 = smov 12  }
  0xd3   : > { %1905 = vmatpush3.bf16.msra.mxu0 %v2137_v3  ;;  %1913 = vmatpush3.bf16.msra.mxu1 %v2138_v4  ;;  %s2449_s14 = smov 16   ;;  %s2450_s3 = smov 20  }
  0xd4   : > { %1918 = vmatprep.subr.bf16.mxu0 %v2437_v0  ;;  %1926 = vmatprep.subr.bf16.mxu1 %v2437_v0  ;;  %s2451_s16 = smov 24   ;;  %s2452_s13 = smov 28  }
  0xd5   : > { %s1810_s10 = sshll.u32 %s2759_s24, 3  ;;  %s3089_s11 = sld [smem:[#allocation25_spill]] }
  0xd6   : > { %1907 = vmatmul.mubr.msk.bf16.vlgmr.msra.gmra.mrb[0].mxu0 %vm454_vm1, %v437_v5  ;;  %1915 = vmatmul.mubr.msk.bf16.vlgmr.msra.gmra.mrb[0].mxu1 %vm454_vm1, %v498_v6  ;;  %s1848_s22 = sshll.u32 %s2520_s9, 7  ;;  %s435_s18 = scalar_lea.vmem [#allocation14], %s1810_s10 }
  0xd7   : > { %1919 = vmatpush3.bf16.msra.mxu0 %v2139_v7  ;;  %1922 = vmatprep.mubr.msk.bf16.mxu0 %vm2438_vm0, %v2437_v0  ;;  %s1649_s21 = sshll.u32 %s435_s18, 4  ;;  %s1636_s9 = scalar_lea.sflag [#allocation5], %s2759_s24  ;;  %s2978_s21 = int_to_ptr.vmem [resolvable:$true] %s1649_s21 }
  0xd8   : > { %1920 = vmatprep.subr.bf16.mxu0 %v2437_v0  ;;  %1928 = vmatprep.mubr.msk.bf16.mxu1 %vm2438_vm0, %v2437_v0 }
  0xdb   : > { %1921 = vmatpush3.bf16.msra.mxu0 %v2140_v8  ;;  %p3091_p0 = scmp.ne.s32.totalorder %s3089_s11, 0 }
  0xdc   : > { %1932 = vmatprep.subr.bf16.mxu0 %v2437_v0 }
  0xde   : > { %1923 = vmatmul.mubr.msk.bf16.vlgmr.msra.gmra.mrb[4].mxu0 %vm454_vm1, %v558_v9 }
  0xdf   : > { %1934 = vmatprep.mubr.msk.bf16.mxu0 %vm2438_vm0, %v2437_v0 }
 0x1a9   : > { %v492_v10 = vpop.f32.mrb[0].mxu0  ;;  %v552_v12 = vpop.f32.mrb[0].mxu1 }
 0x1aa   : > { %v2814_v11 = vpack.c.bf16 %v492_v10, %v492_v10  ;;  %v1908_v13 = vpop.f32.mrb[1].mxu0  ;;  %v619_v14 = vpack.c.bf16 %v552_v12, %v552_v12  ;;  %v1916_v15 = vpop.f32.mrb[1].mxu1 }
 0x1ab   : > { %v495_v16 = vpop.f32.mrb[2].mxu0  ;;  %v555_v17 = vpop.f32.mrb[2].mxu1 }
 0x1ac   : > { %v1909_v18 = vpop.f32.mrb[3].mxu0  ;;  %v686_v19 = vsel %vm684_vm2, %v2814_v11, 0  ;;  %855 = vrot.lane.b32.xlu1 %v619_v14, %s2439_s27  ;;  %735 = vrot.lane.b32.xlu0 %v619_v14, %s2440_s23  ;;  %v1917_v20 = vpop.f32.mrb[3].mxu1  ;;  %v626_v21 = vsel %vm621_vm3, %v619_v14, 0 }
 0x1ad   : > { %1927 = vmatpush3.bf16.xpose.msra.mxu1 %v626_v21  ;;  %1933 = vmatpush3.bf16.msra.mxu0 %v686_v19 }
 0x1ae   : > { %1938 = vmatprep.subr.bf16.mxu1 %v2437_v0  ;;  %1944 = vmatprep.subr.bf16.mxu0 %v2437_v0 }
 0x1b1   : > { %v612_v22 = vpop.f32.mrb[4].mxu0 }
 0x1b2   : > { %v618_v23 = vpack.c.bf16 %v612_v22, %v612_v22  ;;  %v1924_v24 = vpop.f32.mrb[5].mxu0 }
 0x1b3   : > { %v615_v25 = vpop.f32.mrb[6].mxu0 }
 0x1b4   : > { %853 = vrot.lane.b32.xlu1 %v618_v23, %s2439_s27  ;;  %732 = vrot.lane.b32.xlu0 %v618_v23, %s2440_s23  ;;  %v1925_v26 = vpop.f32.mrb[7].mxu0 }
 0x1b5   : > { %1929 = vmatmul.mubr.msk.bf16.vlgmr.msra.gmra.mrb[4].mxu1 %vm621_vm3, %v618_v23 }
 0x1b6   : > { %1940 = vmatprep.mubr.msk.bf16.mxu1 %vm2438_vm0, %v2437_v0 }
 0x1b8   : > { %972 = vrot.lane.b32.xlu1 %v618_v23, %s2441_s8  ;;  %974 = vrot.lane.b32.xlu0 %v619_v14, %s2441_s8 }
 0x1bc   : > { %1091 = vrot.lane.b32.xlu1 %v618_v23, %s2442_s30  ;;  %1093 = vrot.lane.b32.xlu0 %v619_v14, %s2442_s30 }
 0x1c0   : > { %1210 = vrot.lane.b32.xlu1 %v618_v23, %s2443_s26  ;;  %1212 = vrot.lane.b32.xlu0 %v619_v14, %s2443_s26 }
 0x1c4   : > { %1329 = vrot.lane.b32.xlu1 %v618_v23, %s2444_s25  ;;  %1331 = vrot.lane.b32.xlu0 %v619_v14, %s2444_s25 }
 0x1c8   : > { %1448 = vrot.lane.b32.xlu1 %v618_v23, %s2445_s17  ;;  %1450 = vrot.lane.b32.xlu0 %v619_v14, %s2445_s17 }
 0x21e   : > { %v736_v27 = vpop.permute.xlu0 %735  ;;  %v856_v29 = vpop.permute.xlu1 %855 }
 0x21f   : > { %v741_v28 = vsel %vm621_vm3, %v736_v27, 0  ;;  %v861_v31 = vsel %vm621_vm3, %v856_v29, 0 }
 0x220   : > { %1939 = vmatpush3.bf16.xpose.msra.mxu1 %v741_v28 }
 0x221   : > { %1950 = vmatprep.subr.bf16.mxu1 %v2437_v0 }
 0x226   : > { %v733_v30 = vpop.permute.xlu0 %732  ;;  %v854_v33 = vpop.permute.xlu1 %853 }
 0x227   : > { %1941 = vmatmul.mubr.msk.bf16.vlgmr.msra.gmra.mrb[8].mxu1 %vm621_vm3, %v733_v30 }
 0x228   : > { %1951 = vmatpush3.bf16.xpose.msra.mxu1 %v861_v31  ;;  %1952 = vmatprep.mubr.msk.bf16.mxu1 %vm2438_vm0, %v2437_v0 }
 0x229   : > { %1962 = vmatprep.subr.bf16.mxu1 %v2437_v0 }
 0x22a   : > { %v975_v32 = vpop.permute.xlu0 %974  ;;  %v973_v36 = vpop.permute.xlu1 %972 }
 0x22b   : > { %v980_v34 = vsel %vm621_vm3, %v975_v32, 0 }
 0x22e   : > { %v1094_v35 = vpop.permute.xlu0 %1093  ;;  %v1092_v39 = vpop.permute.xlu1 %1091 }
 0x22f   : > { %1953 = vmatmul.mubr.msk.bf16.vlgmr.msra.gmra.mrb[12].mxu1 %vm621_vm3, %v854_v33  ;;  %v1099_v37 = vsel %vm621_vm3, %v1094_v35, 0 }
 0x230   : > { %1963 = vmatpush3.bf16.xpose.msra.mxu1 %v980_v34  ;;  %1964 = vmatprep.mubr.msk.bf16.mxu1 %vm2438_vm0, %v2437_v0 }
 0x231   : > { %1974 = vmatprep.subr.bf16.mxu1 %v2437_v0 }
 0x232   : > { %v1213_v38 = vpop.permute.xlu0 %1212  ;;  %v1211_v42 = vpop.permute.xlu1 %1210 }
 0x233   : > { %v1218_v40 = vsel %vm621_vm3, %v1213_v38, 0 }
 0x236   : > { %v1332_v41 = vpop.permute.xlu0 %1331  ;;  %v1330_v45 = vpop.permute.xlu1 %1329 }
 0x237   : > { %1965 = vmatmul.mubr.msk.bf16.vlgmr.msra.gmra.mrb[16].mxu1 %vm621_vm3, %v973_v36  ;;  %v1337_v43 = vsel %vm621_vm3, %v1332_v41, 0 }
 0x238   : > { %1975 = vmatpush3.bf16.xpose.msra.mxu1 %v1099_v37  ;;  %1976 = vmatprep.mubr.msk.bf16.mxu1 %vm2438_vm0, %v2437_v0 }
 0x239   : > { %1986 = vmatprep.subr.bf16.mxu1 %v2437_v0 }
 0x23a   : > { %v1451_v44 = vpop.permute.xlu0 %1450  ;;  %v1449_v47 = vpop.permute.xlu1 %1448 }
 0x23b   : > { %v1456_v46 = vsel %vm621_vm3, %v1451_v44, 0 }
 0x23f   : > { %1977 = vmatmul.mubr.msk.bf16.vlgmr.msra.gmra.mrb[20].mxu1 %vm621_vm3, %v1092_v39 }
 0x240   : > { %1987 = vmatpush3.bf16.xpose.msra.mxu1 %v1218_v40  ;;  %1988 = vmatprep.mubr.msk.bf16.mxu1 %vm2438_vm0, %v2437_v0 }
 0x241   : > { %1998 = vmatprep.subr.bf16.mxu1 %v2437_v0 }
 0x247   : > { %1989 = vmatmul.mubr.msk.bf16.vlgmr.msra.gmra.mrb[24].mxu1 %vm621_vm3, %v1211_v42 }
 0x248   : > { %1999 = vmatpush3.bf16.xpose.msra.mxu1 %v1337_v43  ;;  %2000 = vmatprep.mubr.msk.bf16.mxu1 %vm2438_vm0, %v2437_v0 }
 0x249   : > { %2010 = vmatprep.subr.bf16.mxu1 %v2437_v0 }
 0x24f   : > { %2001 = vmatmul.mubr.msk.bf16.vlgmr.msra.gmra.mrb[28].mxu1 %vm621_vm3, %v1330_v45 }
 0x250   : > { %2011 = vmatpush3.bf16.xpose.msra.mxu1 %v1456_v46  ;;  %2012 = vmatprep.mubr.msk.bf16.mxu1 %vm2438_vm0, %v2437_v0 }
 0x251   : > { %2022 = vmatprep.subr.bf16.mxu1 %v2437_v0 }
 0x257   : > { %2013 = vmatmul.mubr.msk.bf16.vlgmr.msra.gmra.mrb[32].mxu1 %vm621_vm3, %v1449_v47 }
 0x258   : > { %2026 = vmatprep.mubr.msk.bf16.mxu1 %vm2438_vm0, %v2437_v0 }
 0x288   : > { %v662_v48 = vpop.f32.mrb[4].mxu1 }
 0x289   : > { %v1930_v49 = vpop.f32.mrb[5].mxu1  ;;  %v669_v50 = vsel %vm668_vm4, %v662_v48, -inf }
 0x28a   : > { %670 = vmax.xlane.f32.xlu0 %v669_v50  ;;  %v665_v51 = vpop.f32.mrb[6].mxu1 }
 0x28b   : > { %v1931_v52 = vpop.f32.mrb[7].mxu1 }
 0x2fa   : > { %v777_v53 = vpop.f32.mrb[8].mxu1 }
 0x2fb   : > { %v1942_v54 = vpop.f32.mrb[9].mxu1  ;;  %v783_v55 = vsel %vm668_vm4, %v777_v53, -inf }
 0x2fc   : > { %784 = vmax.xlane.f32.xlu1 %v783_v55  ;;  %v780_v56 = vpop.f32.mrb[10].mxu1 }
 0x2fd   : > { %v1943_v57 = vpop.f32.mrb[11].mxu1 }
 0x302   : > { %v897_v58 = vpop.f32.mrb[12].mxu1 }
 0x303   : > { %v1954_v59 = vpop.f32.mrb[13].mxu1  ;;  %v903_v60 = vsel %vm668_vm4, %v897_v58, -inf }
 0x304   : > { %904 = vmax.xlane.f32.xlu0 %v903_v60  ;;  %v900_v61 = vpop.f32.mrb[14].mxu1 }
 0x305   : > { %v1955_v62 = vpop.f32.mrb[15].mxu1 }
 0x30a   : > { %v1016_v63 = vpop.f32.mrb[16].mxu1 }
 0x30b   : > { %v1966_v1 = vpop.f32.mrb[17].mxu1  ;;  %v1022_v2 = vsel %vm668_vm4, %v1016_v63, -inf }
 0x30c   : > { %1023 = vmax.xlane.f32.xlu0 %v1022_v2  ;;  %v1019_v3 = vpop.f32.mrb[18].mxu1 }
 0x30d   : > { %v1967_v4 = vpop.f32.mrb[19].mxu1 }
 0x312   : > { %v2877_v5 = vpop.f32.mrb[20].mxu1 }
 0x313   : > { %v1978_v6 = vpop.f32.mrb[21].mxu1  ;;  %v1141_v7 = vsel %vm668_vm4, %v2877_v5, -inf }
 0x314   : > { %1142 = vmax.xlane.f32.xlu1 %v1141_v7  ;;  %v1138_v8 = vpop.f32.mrb[22].mxu1 }
 0x315   : > { %v1979_v9 = vpop.f32.mrb[23].mxu1 }
 0x317   : > { %v671_v10 = vpop.xlane.xlu0 %670 }
 0x318   : > { %v672_v12 = vsub.f32 %v662_v48, %v671_v10 }
 0x31a   : > { %v673_v13 = vmul.f32 1.442695, %v672_v12  ;;  %v2881_v14 = vpop.f32.mrb[24].mxu1 }
 0x31b   : > { %v1990_v15 = vpop.f32.mrb[25].mxu1  ;;  %v1260_v16 = vsel %vm668_vm4, %v2881_v14, -inf }
 0x31c   : > { %2143 = vpow2.f32 %v673_v13  ;;  %1261 = vmax.xlane.f32.xlu0 %v1260_v16  ;;  %v1257_v17 = vpop.f32.mrb[26].mxu1 }
 0x31d   : > { %v1991_v18 = vpop.f32.mrb[27].mxu1 }
 0x322   : > { %v1373_v19 = vpop.f32.mrb[28].mxu1 }
 0x323   : > { %v2002_v20 = vpop.f32.mrb[29].mxu1  ;;  %v1379_v21 = vsel %vm668_vm4, %v1373_v19, -inf }
 0x324   : > { %1380 = vmax.xlane.f32.xlu1 %v1379_v21  ;;  %v1376_v22 = vpop.f32.mrb[30].mxu1 }
 0x325   : > { %v2003_v24 = vpop.f32.mrb[31].mxu1 }
 0x326   : > { %v2144_v23 = vpop.eup %2143 }
 0x327   : > { %v675_v25 = vsel %vm668_vm4, %v2144_v23, 0.0 }
 0x328   : > { %676 = vadd.xlane.f32.xlu1 %v675_v25 }
 0x32a   : > { %v1492_v26 = vpop.f32.mrb[32].mxu1 }
 0x32b   : > { %v2014_v27 = vpop.f32.mrb[33].mxu1  ;;  %v1498_v28 = vsel %vm668_vm4, %v1492_v26, -inf }
 0x32c   : > { %1499 = vmax.xlane.f32.xlu0 %v1498_v28  ;;  %v1495_v29 = vpop.f32.mrb[34].mxu1 }
 0x32d   : > { %v2015_v30 = vpop.f32.mrb[35].mxu1 }
 0x339   : > { %915 = vrot.lane.b32.xlu1 %v2814_v11, %s2439_s27 }
 0x342   : > { %796 = vrot.lane.b32.xlu0 %v2814_v11, %s2440_s23 }
 0x389   : > { %v785_v31 = vpop.xlane.xlu1 %784 }
 0x38a   : > { %v786_v32 = vsub.f32 %v777_v53, %v785_v31 }
 0x38c   : > { %v787_v33 = vmul.f32 1.442695, %v786_v32 }
 0x38e   : > { %2145 = vpow2.f32 %v787_v33 }
 0x391   : > { %v905_v34 = vpop.xlane.xlu0 %904 }
 0x392   : > { %v906_v35 = vsub.f32 %v897_v58, %v905_v34 }
 0x394   : > { %v907_v36 = vmul.f32 1.442695, %v906_v35 }
 0x396   : > { %2147 = vpow2.f32 %v907_v36 }
 0x398   : > { %v2892_v37 = vpop.eup %2145 }
 0x399   : > { %v1024_v38 = vpop.xlane.xlu0 %1023  ;;  %v789_v39 = vsel %vm668_vm4, %v2892_v37, 0.0 }
 0x39a   : > { %v1025_v40 = vsub.f32 %v1016_v63, %v1024_v38  ;;  %790 = vadd.xlane.f32.xlu0 %v789_v39 }
 0x39c   : > { %v1026_v41 = vmul.f32 1.442695, %v1025_v40 }
 0x39e   : > { %2149 = vpow2.f32 %v1026_v41 }
 0x3a0   : > { %v2896_v42 = vpop.eup %2147 }
 0x3a1   : > { %v909_v43 = vsel %vm668_vm4, %v2896_v42, 0.0  ;;  %v1143_v46 = vpop.xlane.xlu1 %1142 }
 0x3a2   : > { %910 = vadd.xlane.f32.xlu1 %v909_v43  ;;  %v1144_v52 = vsub.f32 %v2877_v5, %v1143_v46 }
 0x3a4   : > { %v1145_v56 = vmul.f32 1.442695, %v1144_v52 }
 0x3a8   : > { %v2900_v44 = vpop.eup %2149 }
 0x3a9   : > { %v1028_v45 = vsel %vm668_vm4, %v2900_v44, 0.0  ;;  %v1262_v49 = vpop.xlane.xlu0 %1261 }
 0x3aa   : > { %1029 = vadd.xlane.f32.xlu0 %v1028_v45  ;;  %v1263_v57 = vsub.f32 %v2881_v14, %v1262_v49 }
 0x3ac   : > { %v1264_v60 = vmul.f32 1.442695, %v1263_v57 }
 0x3b1   : > { %v1381_v47 = vpop.xlane.xlu1 %1380 }
 0x3b2   : > { %v1382_v59 = vsub.f32 %v1373_v19, %v1381_v47 }
 0x3b3   : > { %1034 = vrot.lane.b32.xlu1 %v2814_v11, %s2441_s8  ;;  %s3090_s8 = sld [smem:[#allocation28_spill]] }
 0x3b4   : > { %v1383_v62 = vmul.f32 1.442695, %v1382_v59 }
 0x3b5   : > { %v677_v48 = vpop.xlane.xlu1 %676 }
 0x3b6   : > { %2151 = vrcp.f32 %v677_v48 }
 0x3b7   : > { %2153 = vpow2.f32 %v1145_v56 }
 0x3b8   : > { %2155 = vpow2.f32 %v1264_v60 }
 0x3b9   : > { %v1500_v50 = vpop.xlane.xlu0 %1499  ;;  %2157 = vpow2.f32 %v1383_v62  ;;  %v916_v10 = vpop.permute.xlu1 %915 }
 0x3ba   : > { %v1501_v61 = vsub.f32 %v1492_v26, %v1500_v50  ;;  %v921_v16 = vsel %vm684_vm2, %v916_v10, 0 }
 0x3bc   : > { %v1502_v63 = vmul.f32 1.442695, %v1501_v61 }
 0x3bd   : > { %v797_v54 = vpop.permute.xlu0 %796 }
 0x3be   : > { %v802_v58 = vsel %vm684_vm2, %v797_v54, 0  ;;  %2159 = vpow2.f32 %v1502_v63 }
 0x3c0   : > { %1153 = vrot.lane.b32.xlu0 %v2814_v11, %s2442_s30  ;;  %v2152_v51 = vpop.eup %2151  ;;  %s2976_s30 = scalar_lea.hbm %s3090_s8, %s1848_s22 }
 0x3c1   : > { %v679_v53 = vmul.f32 %v2152_v51, %v2144_v23  ;;  %v2154_v1 = vpop.eup %2153 }
 0x3c2   : > { %v1147_v2 = vsel %vm668_vm4, %v2154_v1, 0.0  ;;  %v2156_v3 = vpop.eup %2155 }
 0x3c3   : > { %v680_v55 = vpack.c.bf16 %v679_v53, %v679_v53  ;;  %v2916_v4 = vpop.eup %2157  ;;  %v1266_v5 = vsel %vm668_vm4, %v2156_v3, 0.0 }
 0x3c4   : > { %v1385_v7 = vsel %vm668_vm4, %v2916_v4, 0.0 }
 0x3c5   : > { %1935 = vmatmul.mubr.msk.bf16.vlgmr.msra.gmra.mrb[8].mxu0 %vm668_vm4, %v680_v55 }
 0x3c6   : > { %1945 = vmatpush3.bf16.msra.mxu0 %v802_v58  ;;  %1946 = vmatprep.mubr.msk.bf16.mxu0 %vm2438_vm0, %v2437_v0 }
 0x3c7   : > { %1956 = vmatprep.subr.bf16.mxu0 %v2437_v0 }
 0x3c8   : > { %v2919_v6 = vpop.eup %2159 }
 0x3c9   : > { %v1504_v8 = vsel %vm668_vm4, %v2919_v6, 0.0 }
 0x3d7   : > { %1148 = vadd.xlane.f32.xlu1 %v1147_v2 }
 0x3db   : > { %1267 = vadd.xlane.f32.xlu1 %v1266_v5 }
 0x3df   : > { %1386 = vadd.xlane.f32.xlu0 %v1385_v7  ;;  %1505 = vadd.xlane.f32.xlu1 %v1504_v8 }
 0x3f0   : > { %1272 = vrot.lane.b32.xlu1 %v2814_v11, %s2443_s26  ;;  %s2349_s26 = scalar_lea.vmem %s2978_s21, 128 }
 0x3f1   : > { %p2350_p10 = scmp.ne.s32.totalorder %s2978_s21, %s2349_s26 }
 0x3f3   : > { %p2351_p4 = pnand %p2350_p10, %p3091_p0 }
 0x3f5   : > { %1391 = vrot.lane.b32.xlu0 %v2814_v11, %s2444_s25  ;;  %p2352_p9 = pneg %p2351_p4  ;;  %s2453_s25 = smov [#allocation14]  }
 0x3f9   : > { %1510 = vrot.lane.b32.xlu0 %v2814_v11, %s2445_s17  ;;  %s2353_s17 = sshll.u32 %s2453_s25, 4  ;;  %s2354_s17 = int_to_ptr.vmem [resolvable:$false] %s2353_s17 }
 0x3fa   : > { %p2356_p13 = scmp.lt.s32.totalorder %s2978_s21, %s2354_s17 }
 0x427   : > { %v791_v9 = vpop.xlane.xlu0 %790 }
 0x428   : > { %2161 = vrcp.f32 %v791_v9 }
 0x42f   : > { %v911_v12 = vpop.xlane.xlu1 %910 }
 0x430   : > { %2163 = vrcp.f32 %v911_v12 }
 0x432   : > { %v2162_v13 = vpop.eup %2161 }
 0x433   : > { %v793_v14 = vmul.f32 %v2162_v13, %v2892_v37  ;;  %v1035_v19 = vpop.permute.xlu1 %1034 }
 0x434   : > { %v1040_v21 = vsel %vm684_vm2, %v1035_v19, 0 }
 0x435   : > { %v794_v15 = vpack.c.bf16 %v793_v14, %v793_v14 }
 0x437   : > { %1947 = vmatmul.mubr.msk.bf16.vlgmr.msra.gmra.mrb[12].mxu0 %vm668_vm4, %v794_v15  ;;  %v1030_v17 = vpop.xlane.xlu0 %1029 }
 0x438   : > { %1957 = vmatpush3.bf16.msra.mxu0 %v921_v16  ;;  %2165 = vrcp.f32 %v1030_v17  ;;  %1958 = vmatprep.mubr.msk.bf16.mxu0 %vm2438_vm0, %v2437_v0  ;;  %v2141_v17 = vld [vmem:[#allocation12] sm:$0xff]  }
 0x439   : > { %1968 = vmatprep.subr.bf16.mxu0 %v2437_v0  ;;  %2023 = vmatpush3.bf16.msra.mxu1 %v2141_v17 }
 0x43a   : > { %v2164_v11 = vpop.eup %2163  ;;  %2024 = vmatprep.subr.bf16.mxu1 %v2437_v0 }
 0x43b   : > { %v913_v18 = vmul.f32 %v2164_v11, %v2896_v42  ;;  %v1154_v24 = vpop.permute.xlu0 %1153 }
 0x43c   : > { %v1159_v26 = vsel %vm684_vm2, %v1154_v24, 0 }
 0x43d   : > { %v914_v20 = vpack.c.bf16 %v913_v18, %v913_v18  ;;  %v2142_v18 = vld [vmem:[#allocation12 + $0x8] sm:$0xff]  }
 0x43e   : > { %2025 = vmatpush3.bf16.msra.mxu1 %v2142_v18 }
 0x43f   : > { %1959 = vmatmul.mubr.msk.bf16.vlgmr.msra.gmra.mrb[16].mxu0 %vm668_vm4, %v914_v20 }
 0x440   : > { %1969 = vmatpush3.bf16.msra.mxu0 %v1040_v21  ;;  %1970 = vmatprep.mubr.msk.bf16.mxu0 %vm2438_vm0, %v2437_v0 }
 0x441   : > { %1980 = vmatprep.subr.bf16.mxu0 %v2437_v0 }
 0x442   : > { %v2166_v22 = vpop.eup %2165 }
 0x443   : > { %v1032_v23 = vmul.f32 %v2166_v22, %v2900_v44 }
 0x445   : > { %v1033_v25 = vpack.c.bf16 %v1032_v23, %v1032_v23 }
 0x447   : > { %1971 = vmatmul.mubr.msk.bf16.vlgmr.msra.gmra.mrb[20].mxu0 %vm668_vm4, %v1033_v25 }
 0x448   : > { %1981 = vmatpush3.bf16.msra.mxu0 %v1159_v26  ;;  %1982 = vmatprep.mubr.msk.bf16.mxu0 %vm2438_vm0, %v2437_v0 }
 0x449   : > { %1992 = vmatprep.subr.bf16.mxu0 %v2437_v0 }
 0x464   : > { %v1149_v27 = vpop.xlane.xlu1 %1148 }
 0x465   : > { %2167 = vrcp.f32 %v1149_v27 }
 0x468   : > { %v1268_v28 = vpop.xlane.xlu1 %1267 }
 0x469   : > { %2169 = vrcp.f32 %v1268_v28 }
 0x46c   : > { %v1506_v29 = vpop.xlane.xlu1 %1505  ;;  %v1387_v30 = vpop.xlane.xlu0 %1386 }
 0x46d   : > { %2171 = vrcp.f32 %v1387_v30 }
 0x46e   : > { %2173 = vrcp.f32 %v1506_v29 }
 0x46f   : > { %v2168_v31 = vpop.eup %2167 }
 0x470   : > { %v1151_v32 = vmul.f32 %v2168_v31, %v2154_v1  ;;  %v1273_v33 = vpop.permute.xlu1 %1272  ;;  %v1392_v38 = vpop.permute.xlu0 %1391 }
 0x471   : > { %v1278_v36 = vsel %vm684_vm2, %v1273_v33, 0  ;;  %v1397_v41 = vsel %vm684_vm2, %v1392_v38, 0 }
 0x472   : > { %v1152_v34 = vpack.c.bf16 %v1151_v32, %v1151_v32 }
 0x473   : > { %v2170_v35 = vpop.eup %2169 }
 0x474   : > { %1983 = vmatmul.mubr.msk.bf16.vlgmr.msra.gmra.mrb[24].mxu0 %vm668_vm4, %v1152_v34  ;;  %v1270_v37 = vmul.f32 %v2170_v35, %v2156_v3  ;;  %v1511_v43 = vpop.permute.xlu0 %1510  ;;  %v1843_v35 = vld [vmem:[%s3028_s7] ss:$0 sm:$0xff] }
 0x475   : > { %1993 = vmatpush3.bf16.msra.mxu0 %v1278_v36  ;;  %1994 = vmatprep.mubr.msk.bf16.mxu0 %vm2438_vm0, %v2437_v0  ;;  %v1516_v46 = vsel %vm684_vm2, %v1511_v43, 0 }
 0x476   : > { %2004 = vmatprep.subr.bf16.mxu0 %v2437_v0  ;;  %v1271_v39 = vpack.c.bf16 %v1270_v37, %v1270_v37 }
 0x477   : > { %v2172_v40 = vpop.eup %2171 }
 0x478   : > { %v1389_v42 = vmul.f32 %v2172_v40, %v2916_v4  ;;  %v2174_v45 = vpop.eup %2173 }
 0x479   : > { %v1508_v47 = vmul.f32 %v2174_v45, %v2919_v6 }
 0x47a   : > { %v1390_v44 = vpack.c.bf16 %v1389_v42, %v1389_v42 }
 0x47b   : > { %v1509_v48 = vpack.c.bf16 %v1508_v47, %v1508_v47 }
 0x47c   : > { %1995 = vmatmul.mubr.msk.bf16.vlgmr.msra.gmra.mrb[28].mxu0 %vm668_vm4, %v1271_v39 }
 0x47d   : > { %2005 = vmatpush3.bf16.msra.mxu0 %v1397_v41  ;;  %2006 = vmatprep.mubr.msk.bf16.mxu0 %vm2438_vm0, %v2437_v0 }
 0x47e   : > { %2016 = vmatprep.subr.bf16.mxu0 %v2437_v0 }
 0x484   : > { %2007 = vmatmul.mubr.msk.bf16.vlgmr.msra.gmra.mrb[32].mxu0 %vm668_vm4, %v1390_v44 }
 0x485   : > { %2017 = vmatpush3.bf16.msra.mxu0 %v1516_v46  ;;  %2018 = vmatprep.mubr.msk.bf16.mxu0 %vm2438_vm0, %v2437_v0 }
 0x48c   : > { %2019 = vmatmul.mubr.msk.bf16.vlgmr.msra.gmra.mrb[36].mxu0 %vm668_vm4, %v1509_v48 }
 0x498   : > { %v722_v49 = vpop.f32.mrb[8].mxu0 }
 0x499   : > { %v728_v50 = vpack.c.bf16 %v722_v49, %v722_v49  ;;  %v1936_v51 = vpop.f32.mrb[9].mxu0 }
 0x49a   : > { %v725_v52 = vpop.f32.mrb[10].mxu0 }
 0x49b   : > { %730 = vst.msk [vmem:[#allocation2] sm:$0xf] %vm729_vm5, %v728_v50  ;;  %v1937_v53 = vpop.f32.mrb[11].mxu0 }
 0x50a   : > { %v838_v54 = vpop.f32.mrb[12].mxu0 }
 0x50b   : > { %v1851_v55 = vpack.c.bf16 %v838_v54, %v838_v54  ;;  %v1948_v56 = vpop.f32.mrb[13].mxu0 }
 0x50c   : > { %v841_v57 = vpop.f32.mrb[14].mxu0 }
 0x50d   : > { %848 = vrot.lane.b32.xlu1 %v1851_v55, %s2446_s20  ;;  %v1949_v58 = vpop.f32.mrb[15].mxu0  ;;  %s2355_s20 = scalar_lea.vmem %s2354_s17, 256 }
 0x50e   : > { %p2357_p7 = scmp.lt.s32.totalorder %s2355_s20, %s2349_s26 }
 0x510   : > { %p2358_p3 = por %p2357_p7, %p2356_p13 }
 0x512   : > { %v957_v59 = vpop.f32.mrb[16].mxu0  ;;  %p2359_p5 = pnand %p2358_p3, %p2352_p9 }
 0x513   : > { %v1852_v60 = vpack.c.bf16 %v957_v59, %v957_v59  ;;  %v1960_v61 = vpop.f32.mrb[17].mxu0 }
 0x514   : > { %v960_v62 = vpop.f32.mrb[18].mxu0 }
 0x515   : > { %967 = vrot.lane.b32.xlu0 %v1852_v60, %s2447_s19  ;;  %v1961_v63 = vpop.f32.mrb[19].mxu0 }
 0x51a   : > { %v1076_v1 = vpop.f32.mrb[20].mxu0 }
 0x51b   : > { %v1853_v2 = vpack.c.bf16 %v1076_v1, %v1076_v1  ;;  %v1972_v3 = vpop.f32.mrb[21].mxu0 }
 0x51c   : > { %v1079_v4 = vpop.f32.mrb[22].mxu0 }
 0x51d   : > { %1086 = vrot.lane.b32.xlu1 %v1853_v2, %s2448_s1  ;;  %v1973_v5 = vpop.f32.mrb[23].mxu0 }
 0x547   : > { %v1195_v6 = vpop.f32.mrb[24].mxu0 }
 0x548   : > { %v1854_v7 = vpack.c.bf16 %v1195_v6, %v1195_v6  ;;  %v1984_v8 = vpop.f32.mrb[25].mxu0 }
 0x549   : > { %v1198_v9 = vpop.f32.mrb[26].mxu0 }
 0x54a   : > { %1205 = vrot.lane.b32.xlu0 %v1854_v7, %s2449_s14  ;;  %v1985_v10 = vpop.f32.mrb[27].mxu0 }
 0x54f   : > { %v1314_v12 = vpop.f32.mrb[28].mxu0 }
 0x550   : > { %v1855_v13 = vpack.c.bf16 %v1314_v12, %v1314_v12  ;;  %v1996_v14 = vpop.f32.mrb[29].mxu0 }
 0x551   : > { %v1317_v15 = vpop.f32.mrb[30].mxu0 }
 0x552   : > { %1324 = vrot.lane.b32.xlu1 %v1855_v13, %s2450_s3  ;;  %v1997_v16 = vpop.f32.mrb[31].mxu0 }
 0x557   : > { %v1433_v11 = vpop.f32.mrb[32].mxu0 }
 0x558   : > { %v1856_v19 = vpack.c.bf16 %v1433_v11, %v1433_v11  ;;  %v2008_v20 = vpop.f32.mrb[33].mxu0 }
 0x559   : > { %v1436_v21 = vpop.f32.mrb[34].mxu0 }
 0x55a   : > { %1443 = vrot.lane.b32.xlu0 %v1856_v19, %s2451_s16  ;;  %v2009_v22 = vpop.f32.mrb[35].mxu0 }
 0x55f   : > { %v1552_v23 = vpop.f32.mrb[36].mxu0 }
 0x560   : > { %v1857_v24 = vpack.c.bf16 %v1552_v23, %v1552_v23  ;;  %v2020_v25 = vpop.f32.mrb[37].mxu0 }
 0x561   : > { %v1555_v26 = vpop.f32.mrb[38].mxu0 }
 0x562   : > { %1562 = vrot.lane.b32.xlu1 %v1857_v24, %s2452_s13  ;;  %v2021_v27 = vpop.f32.mrb[39].mxu0 }
 0x57f   : > { %v849_v28 = vpop.permute.xlu1 %848 }
 0x580   : > { %852 = vst.msk [vmem:[#allocation2] sm:$0xf] %vm851_vm6, %v849_v28 }
 0x587   : > { %v968_v29 = vpop.permute.xlu0 %967 }
 0x588   : > { %971 = vst.msk [vmem:[#allocation2] sm:$0xf] %vm970_vm7, %v968_v29 }
 0x58f   : > { %v1087_v0 = vpop.permute.xlu1 %1086 }
 0x590   : > { %1090 = vst.msk [vmem:[#allocation2] sm:$0xf] %vm1089_vm8, %v1087_v0 }
 0x5bc   : > { %v1206_v30 = vpop.permute.xlu0 %1205 }
 0x5bd   : > { %1209 = vst.msk [vmem:[#allocation2] sm:$0xf] %vm1208_vm9, %v1206_v30 }
 0x5c4   : > { %v1325_v31 = vpop.permute.xlu1 %1324 }
 0x5c5   : > { %1328 = vst.msk [vmem:[#allocation2] sm:$0xf] %vm1327_vm10, %v1325_v31 }
 0x5cc   : > { %v1444_v32 = vpop.permute.xlu0 %1443 }
 0x5cd   : > { %1447 = vst.msk [vmem:[#allocation2] sm:$0xf] %vm1446_vm11, %v1444_v32 }
 0x5d4   : > { %v1563_v33 = vpop.permute.xlu1 %1562 }
 0x5d5   : > { %1566 = vst.msk [vmem:[#allocation2] sm:$0xf] %vm1565_vm12, %v1563_v33 }
 0x5dc   : > { %v1567_v34 = vld [vmem:[#allocation2] sm:$0xf] }
 0x5dd   : > { %2027 = vmatmul.mubr.msk.bf16.vlgmr.msra.gmra.mrb[36].mxu1 %vm454_vm1, %v1567_v34 }
 0x6b0   : > { %v1628_v36 = vpop.f32.mrb[36].mxu1 }
 0x6b1   : > { %v1629_v37 = vadd.f32 %v1843_v35, %v1628_v36  ;;  %v2028_v38 = vpop.f32.mrb[37].mxu1 }
 0x6b2   : > { %v1631_v39 = vpop.f32.mrb[38].mxu1 }
 0x6b3   : > { %v2029_v40 = vpop.f32.mrb[39].mxu1  ;;  %1634 = vst.msk [vmem:[%s435_s18] sm:$0xff] %vm454_vm1, %v1629_v37 }
 0x6b4   : > { %2362 = shalt.err (!%p2359_p5)
}
 0x6b5   : > { %s2363_s24 = scalar_lea.hbm %s2976_s30, 128  ;;  %s2367_s14 = scalar_lea.hbm %s3090_s8, 256 }
 0x6b6   : > { %p2364_p2 = scmp.ne.s32.totalorder %s2976_s30, %s2363_s24  ;;  %p2368_p12 = scmp.lt.u32.totalorder %s2976_s30, %s3090_s8 }
 0x6b7   : > { %p2369_p1 = scmp.lt.u32.totalorder %s2367_s14, %s2363_s24  ;;  %p2371_p10 = scmp.lt.u32.totalorder %s2363_s24, %s2976_s30 }
 0x6b8   : > { %p2365_p8 = pnand %p2364_p2, %p3091_p0 }
 0x6b9   : > { %p2370_p6 = por %p2369_p1, %p2368_p12 }
 0x6ba   : > { %p2366_p11 = pneg %p2365_p8 }
 0x6bb   : > { %p2372_p4 = por %p2371_p10, %p2370_p6 }
 0x6bd   : > { %p2373_p9 = pnand %p2372_p4, %p2366_p11 }
 0x6bf   : > { %2376 = shalt.err (!%p2373_p9)
}
 0x6c0   : > { %2048 = dma.vmem_to_hbm [thread:$0]  (%p3091_p0), %s2978_s21, 128, %s2976_s30, %s1636_s9  }
 0x6c1 PF: > { %s3092_s13 = sld [smem:[#allocation20_spill]]  ;;  %s3093_s10 = sld [smem:[#allocation22_spill]] }
 0x6c2   : > { %s3094_s15 = sld [smem:[#allocation21_spill]] }
 0x6c7   : > { %s1661_s12 = sand.u32 1, %s3092_s13   ;;  %p3095_p13 = scmp.ne.s32.totalorder %s3093_s10, 0 }
 0x6c8   : > { %p3096_p7 = scmp.ge.s32.totalorder %s3094_s15, 2  ;;  %s1662_s22 = scalar_lea.sflag [#allocation5], %s1661_s12 }
 0x6ca   : > { %p2071_p3 = pnand %p3096_p7, %p3095_p13 }
 0x6cc   : > { %2410 = dma.done.wait (!%p2071_p3), %s1662_s22, 128  }
 0x6cd   : > { %2412 = vsyncadd (!%p2071_p3), %s1662_s22, 4294967168  ;;  %s3097_s30 = sld [smem:[#allocation23_spill]]  ;;  %s3098_s18 = sld [smem:[#allocation24_spill]] }
 0x6ce   : > { %s3099_s27 = smov %s2419_s28  ;;  %s3100_s28 = smov %s2423_s29 }
 0x6d3   : > { %p26_p5 = scmp.ge.s32.totalorder %s3097_s30, 4   ;;  %s3101_s29 = smov %s3098_s18 }
 0x6d5   :  { %28 = sbr.rel (!%p26_p5) target bundleno = 13 (0xd), region = 133 }
 0x6dc   :  { %1667 = vsyncpa [#allocation4], 1 }
 0x6dd   :  { %1669 = vsyncpa [#allocation4 + $0x1], 1 }
 0x6de   :  { %1670 = vsyncpa [#allocation7], 1 }
 0x6df   :  { %1672 = vsyncpa [#allocation7 + $0x1], 1 }
 0x6e0   :  { %1673 = vsyncpa [#allocation10], 1 }
 0x6e1   :  { %1674 = vsyncpa [#allocation13], 1 }
 0x6e2   :  { %1675 = vsyncpa [#allocation5], 1 }
 0x6e3   :  { %1677 = vsyncpa [#allocation5 + $0x1], 1 }

</bundles_post_ra>
